<compile_context>
chip_gen: v5e
topology: v5e:2x2
jax: 0.10.0
libtpu: 0.0.40
codegen_flags: <defaults>
</compile_context>

<pallas_src>
import functools
import numpy as np
import jax
import jax.numpy as jnp
from jax.experimental import pallas as pl
from jax.experimental.pallas import tpu as pltpu


# ----------------------------- fused Pallas kernel ---------------------------

def fused_fpn_atten_kernel(res5_ref, res4_ref, res3_ref, res2_ref,
                           w1_ref, b1_ref, w2_ref, b2_ref,
                           w3_ref, b3_ref, w4_ref, b4_ref,
                           u1_ref, u2_ref, u3_ref,
                           wcat_ref, bcat_ref, wf_ref, bf_ref,
                           o_ref, *, out_dim):
    """One batch element: FPNDecoder + SelfAtten, everything VMEM-resident."""
    f32 = jnp.float32

    # ---- FPNDecoder: 1x1 convs == per-pixel channel matmuls ----------------
    o1 = jnp.dot(res5_ref[0], w1_ref[...], preferred_element_type=f32) + b1_ref[...]
    c4 = jnp.dot(res4_ref[0], w2_ref[...], preferred_element_type=f32) + b2_ref[...]
    c3 = jnp.dot(res3_ref[0], w3_ref[...], preferred_element_type=f32) + b3_ref[...]
    c2 = jnp.dot(res2_ref[0], w4_ref[...], preferred_element_type=f32) + b4_ref[...]
    # bilinear(align_corners=False) upsample as flattened-spatial matmul + add
    o2 = jnp.dot(u1_ref[...], o1, preferred_element_type=f32) + c4
    o3 = jnp.dot(u2_ref[...], o2, preferred_element_type=f32) + c3
    x = jnp.dot(u3_ref[...], o3, preferred_element_type=f32) + c2      # o4: (N, C)

    # ---- SelfAtten (QK folded) ----------------------------------------------
    # wcat = [Wq@Wk^T | Wv], bcat = [bq@Wk^T | bv]  (precomputed in wrapper)
    proj = jnp.dot(x, wcat_ref[...], preferred_element_type=f32) + bcat_ref[...]
    xq = proj[:, :out_dim]            # x@Wqk + bq@Wk^T  (key-bias column term)
    v = proj[:, out_dim:]             # value projection (N, C)
    # energy[s, t] = xq[s, :] . x[t, :]   -> (N, N); 128-deep contraction
    energy = jax.lax.dot_general(xq, x, (((1,), (1,)), ((), ())),
                                 preferred_element_type=f32)
    m = jnp.max(energy, axis=-1, keepdims=True)
    p = jnp.exp(energy - m)
    attn = p * pl.reciprocal(jnp.sum(p, axis=-1, keepdims=True), approx=True)
    out = jnp.dot(attn, v, preferred_element_type=f32)                  # (N, C)
    out = jnp.dot(out, wf_ref[...], preferred_element_type=f32) + bf_ref[...]
    o_ref[0] = out + x                                                  # residual


def panoptic_fpn_pallas(feats, params, upmats):
    res5, res4, res3, res2 = feats["res5"], feats["res4"], feats["res3"], feats["res2"]
    B, N5, C5 = res5.shape
    _, N4, C4 = res4.shape
    _, N3, C3 = res3.shape
    _, N2, C2 = res2.shape
    u1, u2, u3 = upmats
    D = params["layer1_w"].shape[1]                     # out_dim = 128

    # QK fold (exact w.r.t. softmax: dropped bias terms are row-constant)
    wqk = params["q_w"] @ params["k_w"].T               # (D, D)
    ukT = params["q_b"] @ params["k_w"].T               # (1, D)
    wcat = jnp.concatenate([wqk, params["v_w"]], axis=1)          # (D, 2D)
    bcat = jnp.concatenate([ukT, params["v_b"]], axis=1)          # (1, 2D)

    kernel = functools.partial(fused_fpn_atten_kernel, out_dim=D)
    const2 = lambda shape: pl.BlockSpec(shape, lambda i: (0, 0))

    return pl.pallas_call(
        kernel,
        out_shape=jax.ShapeDtypeStruct((B, N2, D), jnp.float32),
        grid=(B,),
        in_specs=[
            pl.BlockSpec((1, N5, C5), lambda i: (i, 0, 0)),
            pl.BlockSpec((1, N4, C4), lambda i: (i, 0, 0)),
            pl.BlockSpec((1, N3, C3), lambda i: (i, 0, 0)),
            pl.BlockSpec((1, N2, C2), lambda i: (i, 0, 0)),
            const2((C5, D)), const2((1, D)),
            const2((C4, D)), const2((1, D)),
            const2((C3, D)), const2((1, D)),
            const2((C2, D)), const2((1, D)),
            const2((N4, N5)), const2((N3, N4)), const2((N2, N3)),
            const2((D, 2 * D)), const2((1, 2 * D)),
            const2((D, D)), const2((1, D)),
        ],
        out_specs=pl.BlockSpec((1, N2, D), lambda i: (i, 0, 0)),
        compiler_params=pltpu.CompilerParams(dimension_semantics=("parallel",)),
    )(res5, res4, res3, res2,
      params["layer1_w"], params["layer1_b"],
      params["layer2_w"], params["layer2_b"],
      params["layer3_w"], params["layer3_b"],
      params["layer4_w"], params["layer4_b"],
      u1, u2, u3,
      wcat, bcat, params["f_w"], params["f_b"])


# ------------------------- glue: interpolation matrices ----------------------

def bilinear_1d_matrix(n_in, n_out):
    # Exact weights of F.interpolate(mode='bilinear', align_corners=False)
    # along one axis, as a dense (n_out, n_in) matrix.
    out_idx = np.arange(n_out)
    src = (out_idx + 0.5) * (n_in / n_out) - 0.5
    src = np.maximum(src, 0.0)                    # PyTorch clamps negative coords
    i0 = np.floor(src).astype(np.int64)
    i0 = np.minimum(i0, n_in - 1)
    i1 = np.minimum(i0 + 1, n_in - 1)
    frac = (src - i0).astype(np.float32)
    m = np.zeros((n_out, n_in), np.float32)
    np.add.at(m, (out_idx, i0), 1.0 - frac)
    np.add.at(m, (out_idx, i1), frac)
    return m


def bilinear_2d_matrix(hw_in, hw_out):
    (hi, wi), (ho, wo) = hw_in, hw_out
    uh = bilinear_1d_matrix(hi, ho)
    uw = bilinear_1d_matrix(wi, wo)
    return jnp.asarray(np.kron(uh, uw))           # (ho*wo, hi*wi), flat index h*W+w


# ------------------------------ backbone stub ---------------------------------

# TODO(synk): the real ResNet-18 backbone is an external pretrained module; it is
# replaced by a deterministic stub (strided average pool + fixed 1x1 projection
# + tanh in plain JAX) that produces the same feature-pyramid shapes.
def backbone_stub(img_nchw, params):
    x = jnp.transpose(img_nchw, (0, 2, 3, 1))     # -> NHWC
    B, H, W, Cin = x.shape
    feats, dims = {}, {}
    for name, stride, cout in (("res2", 4, 64), ("res3", 8, 128),
                               ("res4", 16, 256), ("res5", 32, 512)):
        h, w = H // stride, W // stride
        p = x.reshape(B, h, stride, w, stride, Cin).mean(axis=(2, 4))
        p = jnp.tanh(p @ params[f"{name}_proj"])
        feats[name] = p.reshape(B, h * w, cout)   # (B, HW, C) channels-last
        dims[name] = (h, w)
    return feats, dims


# ------------------------------ parameters ------------------------------------

def init_params(key):
    ks = jax.random.split(key, 24)
    def w(k, cin, cout, scale=0.05):
        return jax.random.normal(k, (cin, cout), jnp.float32) * scale
    def b(k, cout, scale=0.01):
        return jax.random.normal(k, (1, cout), jnp.float32) * scale
    p = {}
    # backbone stub projections
    p["res2_proj"] = w(ks[0], 3, 64, 0.5)
    p["res3_proj"] = w(ks[1], 3, 128, 0.5)
    p["res4_proj"] = w(ks[2], 3, 256, 0.5)
    p["res5_proj"] = w(ks[3], 3, 512, 0.5)
    # FPNDecoder (resnet18: mfactor=1, out_dim=128); weights stored (Cin, Cout)
    p["layer1_w"], p["layer1_b"] = w(ks[4], 512, 128), b(ks[5], 128)
    p["layer2_w"], p["layer2_b"] = w(ks[6], 256, 128), b(ks[7], 128)
    p["layer3_w"], p["layer3_b"] = w(ks[8], 128, 128), b(ks[9], 128)
    p["layer4_w"], p["layer4_b"] = w(ks[10], 64, 128), b(ks[11], 128)
    # SelfAtten(in_dim=128)
    p["q_w"], p["q_b"] = w(ks[12], 128, 16), b(ks[13], 16)
    p["k_w"], p["k_b"] = w(ks[14], 128, 16), b(ks[15], 16)
    p["v_w"], p["v_b"] = w(ks[16], 128, 128), b(ks[17], 128)
    p["f_w"], p["f_b"] = w(ks[18], 128, 128), b(ks[19], 128)
    return p


# ------------------------------ full forward ----------------------------------

def panoptic_fpn_forward(img, params, upmats):
    feats, dims = backbone_stub(img, params)
    out = panoptic_fpn_pallas(feats, params, upmats)   # (B, N, C), lane-dense
    B, N, C = out.shape
    H2, W2 = dims["res2"]
    # Module output is NCHW; transpose only at the boundary.
    return jnp.transpose(out.reshape(B, H2, W2, C), (0, 3, 1, 2))


def reference_forward(img, params, upmats):
    # pure-JAX reference (no Pallas, un-folded attention) for correctness check
    hi = jax.lax.Precision.HIGHEST
    feats, dims = backbone_stub(img, params)
    def c1(x, w, bb): return jnp.einsum('bnc,cd->bnd', x, w, precision=hi) + bb
    def up(x, y, u): return jnp.einsum('on,bnc->boc', u, x, precision=hi) + y
    o1 = c1(feats["res5"], params["layer1_w"], params["layer1_b"])
    o2 = up(o1, c1(feats["res4"], params["layer2_w"], params["layer2_b"]), upmats[0])
    o3 = up(o2, c1(feats["res3"], params["layer3_w"], params["layer3_b"]), upmats[1])
    o4 = up(o3, c1(feats["res2"], params["layer4_w"], params["layer4_b"]), upmats[2])
    q = c1(o4, params["q_w"], params["q_b"])
    k = c1(o4, params["k_w"], params["k_b"])
    v = c1(o4, params["v_w"], params["v_b"])
    energy = jnp.einsum('bnq,bmq->bnm', q, k, precision=hi)
    attn = jax.nn.softmax(energy, axis=-1)
    out = jnp.einsum('bnm,bmc->bnc', attn, v, precision=hi)
    out = c1(out, params["f_w"], params["f_b"]) + o4
    B, N, C = out.shape
    H2, W2 = dims["res2"]
    return jnp.transpose(out.reshape(B, H2, W2, C), (0, 3, 1, 2))


# ---------------------------------- main ---------------------------------------

if __name__ == "__main__":
    key = jax.random.PRNGKey(0)
    k_img, k_param = jax.random.split(key)
    img = jax.random.normal(k_img, (2, 3, 64, 64), jnp.float32)       # NCHW input
    params = init_params(k_param)

    # feature-pyramid spatial sizes: res5=2x2, res4=4x4, res3=8x8, res2=16x16
    upmats = (
        bilinear_2d_matrix((2, 2), (4, 4)),
        bilinear_2d_matrix((4, 4), (8, 8)),
        bilinear_2d_matrix((8, 8), (16, 16)),
    )

    out = panoptic_fpn_forward(img, params, upmats)
    out = jax.block_until_ready(out)
    assert out.shape == (2, 128, 16, 16), out.shape

    ref = jax.block_until_ready(reference_forward(img, params, upmats))
    np.testing.assert_allclose(np.asarray(out), np.asarray(ref), rtol=2e-2, atol=2e-2)

    print("KERNEL_OK")
</pallas_src>

<mosaic_0001>
module attributes {stable_mosaic.version = 11 : i64} {
  func.func @fused_fpn_atten_kernel(%arg0: i32, %arg1: memref<1x4x512xf32, #tpu.memory_space<vmem>>, %arg2: memref<1x16x256xf32, #tpu.memory_space<vmem>>, %arg3: memref<1x64x128xf32, #tpu.memory_space<vmem>>, %arg4: memref<1x256x64xf32, #tpu.memory_space<vmem>>, %arg5: memref<512x128xf32, #tpu.memory_space<vmem>>, %arg6: memref<1x128xf32, #tpu.memory_space<vmem>>, %arg7: memref<256x128xf32, #tpu.memory_space<vmem>>, %arg8: memref<1x128xf32, #tpu.memory_space<vmem>>, %arg9: memref<128x128xf32, #tpu.memory_space<vmem>>, %arg10: memref<1x128xf32, #tpu.memory_space<vmem>>, %arg11: memref<64x128xf32, #tpu.memory_space<vmem>>, %arg12: memref<1x128xf32, #tpu.memory_space<vmem>>, %arg13: memref<16x4xf32, #tpu.memory_space<vmem>>, %arg14: memref<64x16xf32, #tpu.memory_space<vmem>>, %arg15: memref<256x64xf32, #tpu.memory_space<vmem>>, %arg16: memref<128x256xf32, #tpu.memory_space<vmem>>, %arg17: memref<1x256xf32, #tpu.memory_space<vmem>>, %arg18: memref<128x128xf32, #tpu.memory_space<vmem>>, %arg19: memref<1x128xf32, #tpu.memory_space<vmem>>, %arg20: memref<1x256x128xf32, #tpu.memory_space<vmem>>) attributes {dimension_semantics = [#tpu.dimension_semantics<parallel>], iteration_bounds = array<i64: 2>, scalar_prefetch = 0 : i64, scratch_operands = 0 : i64, tpu.core_type = #tpu.core_type<tc>, window_params = [{transform_indices = @transform_0, window_bounds = array<i64: 1, 4, 512>}, {transform_indices = @transform_1, window_bounds = array<i64: 1, 16, 256>}, {transform_indices = @transform_2, window_bounds = array<i64: 1, 64, 128>}, {transform_indices = @transform_3, window_bounds = array<i64: 1, 256, 64>}, {pipeline_mode = #tpu.pipeline_mode<synchronous>, transform_indices = @transform_4, window_bounds = array<i64: 512, 128>}, {pipeline_mode = #tpu.pipeline_mode<synchronous>, transform_indices = @transform_5, window_bounds = array<i64: 1, 128>}, {pipeline_mode = #tpu.pipeline_mode<synchronous>, transform_indices = @transform_6, window_bounds = array<i64: 256, 128>}, {pipeline_mode = #tpu.pipeline_mode<synchronous>, transform_indices = @transform_7, window_bounds = array<i64: 1, 128>}, {pipeline_mode = #tpu.pipeline_mode<synchronous>, transform_indices = @transform_8, window_bounds = array<i64: 128, 128>}, {pipeline_mode = #tpu.pipeline_mode<synchronous>, transform_indices = @transform_9, window_bounds = array<i64: 1, 128>}, {pipeline_mode = #tpu.pipeline_mode<synchronous>, transform_indices = @transform_10, window_bounds = array<i64: 64, 128>}, {pipeline_mode = #tpu.pipeline_mode<synchronous>, transform_indices = @transform_11, window_bounds = array<i64: 1, 128>}, {pipeline_mode = #tpu.pipeline_mode<synchronous>, transform_indices = @transform_12, window_bounds = array<i64: 16, 4>}, {pipeline_mode = #tpu.pipeline_mode<synchronous>, transform_indices = @transform_13, window_bounds = array<i64: 64, 16>}, {pipeline_mode = #tpu.pipeline_mode<synchronous>, transform_indices = @transform_14, window_bounds = array<i64: 256, 64>}, {pipeline_mode = #tpu.pipeline_mode<synchronous>, transform_indices = @transform_15, window_bounds = array<i64: 128, 256>}, {pipeline_mode = #tpu.pipeline_mode<synchronous>, transform_indices = @transform_16, window_bounds = array<i64: 1, 256>}, {pipeline_mode = #tpu.pipeline_mode<synchronous>, transform_indices = @transform_17, window_bounds = array<i64: 128, 128>}, {pipeline_mode = #tpu.pipeline_mode<synchronous>, transform_indices = @transform_18, window_bounds = array<i64: 1, 128>}, {transform_indices = @transform_19, window_bounds = array<i64: 1, 256, 128>}]} {
    %c0 = arith.constant 0 : index
    %c0_0 = arith.constant 0 : index
    %c0_1 = arith.constant 0 : index
    %0 = vector.load %arg1[%c0, %c0_0, %c0_1] : memref<1x4x512xf32, #tpu.memory_space<vmem>>, vector<1x4x512xf32>
    %1 = vector.shape_cast %0 : vector<1x4x512xf32> to vector<4x512xf32>
    %c0_2 = arith.constant 0 : index
    %c0_3 = arith.constant 0 : index
    %2 = vector.load %arg5[%c0_2, %c0_3] : memref<512x128xf32, #tpu.memory_space<vmem>>, vector<512x128xf32>
    %cst = arith.constant dense<0.000000e+00> : vector<4x128xf32>
    %3 = tpu.matmul %1, %2, %cst {dimension_numbers = #tpu.dot_dimension_numbers<[1], [0], [0], [1], [0, 0, 1, 1], [], []>} : vector<4x512xf32>, vector<512x128xf32>, vector<4x128xf32> -> vector<4x128xf32>
    %c0_4 = arith.constant 0 : index
    %c0_5 = arith.constant 0 : index
    %4 = vector.load %arg6[%c0_4, %c0_5] : memref<1x128xf32, #tpu.memory_space<vmem>>, vector<1x128xf32>
    %5 = vector.broadcast %4 : vector<1x128xf32> to vector<4x128xf32>
    %6 = arith.addf %3, %5 : vector<4x128xf32>
    %c0_6 = arith.constant 0 : index
    %c0_7 = arith.constant 0 : index
    %c0_8 = arith.constant 0 : index
    %7 = vector.load %arg2[%c0_6, %c0_7, %c0_8] : memref<1x16x256xf32, #tpu.memory_space<vmem>>, vector<1x16x256xf32>
    %8 = vector.shape_cast %7 : vector<1x16x256xf32> to vector<16x256xf32>
    %c0_9 = arith.constant 0 : index
    %c0_10 = arith.constant 0 : index
    %9 = vector.load %arg7[%c0_9, %c0_10] : memref<256x128xf32, #tpu.memory_space<vmem>>, vector<256x128xf32>
    %cst_11 = arith.constant dense<0.000000e+00> : vector<16x128xf32>
    %10 = tpu.matmul %8, %9, %cst_11 {dimension_numbers = #tpu.dot_dimension_numbers<[1], [0], [0], [1], [0, 0, 1, 1], [], []>} : vector<16x256xf32>, vector<256x128xf32>, vector<16x128xf32> -> vector<16x128xf32>
    %c0_12 = arith.constant 0 : index
    %c0_13 = arith.constant 0 : index
    %11 = vector.load %arg8[%c0_12, %c0_13] : memref<1x128xf32, #tpu.memory_space<vmem>>, vector<1x128xf32>
    %12 = vector.broadcast %11 : vector<1x128xf32> to vector<16x128xf32>
    %13 = arith.addf %10, %12 : vector<16x128xf32>
    %c0_14 = arith.constant 0 : index
    %c0_15 = arith.constant 0 : index
    %c0_16 = arith.constant 0 : index
    %14 = vector.load %arg3[%c0_14, %c0_15, %c0_16] : memref<1x64x128xf32, #tpu.memory_space<vmem>>, vector<1x64x128xf32>
    %15 = vector.shape_cast %14 : vector<1x64x128xf32> to vector<64x128xf32>
    %c0_17 = arith.constant 0 : index
    %c0_18 = arith.constant 0 : index
    %16 = vector.load %arg9[%c0_17, %c0_18] : memref<128x128xf32, #tpu.memory_space<vmem>>, vector<128x128xf32>
    %cst_19 = arith.constant dense<0.000000e+00> : vector<64x128xf32>
    %17 = tpu.matmul %15, %16, %cst_19 {dimension_numbers = #tpu.dot_dimension_numbers<[1], [0], [0], [1], [0, 0, 1, 1], [], []>} : vector<64x128xf32>, vector<128x128xf32>, vector<64x128xf32> -> vector<64x128xf32>
    %c0_20 = arith.constant 0 : index
    %c0_21 = arith.constant 0 : index
    %18 = vector.load %arg10[%c0_20, %c0_21] : memref<1x128xf32, #tpu.memory_space<vmem>>, vector<1x128xf32>
    %19 = vector.broadcast %18 : vector<1x128xf32> to vector<64x128xf32>
    %20 = arith.addf %17, %19 : vector<64x128xf32>
    %c0_22 = arith.constant 0 : index
    %c0_23 = arith.constant 0 : index
    %c0_24 = arith.constant 0 : index
    %21 = vector.load %arg4[%c0_22, %c0_23, %c0_24] : memref<1x256x64xf32, #tpu.memory_space<vmem>>, vector<1x256x64xf32>
    %22 = vector.shape_cast %21 : vector<1x256x64xf32> to vector<256x64xf32>
    %c0_25 = arith.constant 0 : index
    %c0_26 = arith.constant 0 : index
    %23 = vector.load %arg11[%c0_25, %c0_26] : memref<64x128xf32, #tpu.memory_space<vmem>>, vector<64x128xf32>
    %cst_27 = arith.constant dense<0.000000e+00> : vector<256x128xf32>
    %24 = tpu.matmul %22, %23, %cst_27 {dimension_numbers = #tpu.dot_dimension_numbers<[1], [0], [0], [1], [0, 0, 1, 1], [], []>} : vector<256x64xf32>, vector<64x128xf32>, vector<256x128xf32> -> vector<256x128xf32>
    %c0_28 = arith.constant 0 : index
    %c0_29 = arith.constant 0 : index
    %25 = vector.load %arg12[%c0_28, %c0_29] : memref<1x128xf32, #tpu.memory_space<vmem>>, vector<1x128xf32>
    %26 = vector.broadcast %25 : vector<1x128xf32> to vector<256x128xf32>
    %27 = arith.addf %24, %26 : vector<256x128xf32>
    %c0_30 = arith.constant 0 : index
    %c0_31 = arith.constant 0 : index
    %28 = vector.load %arg13[%c0_30, %c0_31] : memref<16x4xf32, #tpu.memory_space<vmem>>, vector<16x4xf32>
    %cst_32 = arith.constant dense<0.000000e+00> : vector<16x128xf32>
    %29 = tpu.matmul %28, %6, %cst_32 {dimension_numbers = #tpu.dot_dimension_numbers<[1], [0], [0], [1], [0, 0, 1, 1], [], []>} : vector<16x4xf32>, vector<4x128xf32>, vector<16x128xf32> -> vector<16x128xf32>
    %30 = arith.addf %29, %13 : vector<16x128xf32>
    %c0_33 = arith.constant 0 : index
    %c0_34 = arith.constant 0 : index
    %31 = vector.load %arg14[%c0_33, %c0_34] : memref<64x16xf32, #tpu.memory_space<vmem>>, vector<64x16xf32>
    %cst_35 = arith.constant dense<0.000000e+00> : vector<64x128xf32>
    %32 = tpu.matmul %31, %30, %cst_35 {dimension_numbers = #tpu.dot_dimension_numbers<[1], [0], [0], [1], [0, 0, 1, 1], [], []>} : vector<64x16xf32>, vector<16x128xf32>, vector<64x128xf32> -> vector<64x128xf32>
    %33 = arith.addf %32, %20 : vector<64x128xf32>
    %c0_36 = arith.constant 0 : index
    %c0_37 = arith.constant 0 : index
    %34 = vector.load %arg15[%c0_36, %c0_37] : memref<256x64xf32, #tpu.memory_space<vmem>>, vector<256x64xf32>
    %cst_38 = arith.constant dense<0.000000e+00> : vector<256x128xf32>
    %35 = tpu.matmul %34, %33, %cst_38 {dimension_numbers = #tpu.dot_dimension_numbers<[1], [0], [0], [1], [0, 0, 1, 1], [], []>} : vector<256x64xf32>, vector<64x128xf32>, vector<256x128xf32> -> vector<256x128xf32>
    %36 = arith.addf %35, %27 : vector<256x128xf32>
    %c0_39 = arith.constant 0 : index
    %c0_40 = arith.constant 0 : index
    %37 = vector.load %arg16[%c0_39, %c0_40] : memref<128x256xf32, #tpu.memory_space<vmem>>, vector<128x256xf32>
    %cst_41 = arith.constant dense<0.000000e+00> : vector<256x256xf32>
    %38 = tpu.matmul %36, %37, %cst_41 {dimension_numbers = #tpu.dot_dimension_numbers<[1], [0], [0], [1], [0, 0, 1, 1], [], []>} : vector<256x128xf32>, vector<128x256xf32>, vector<256x256xf32> -> vector<256x256xf32>
    %c0_42 = arith.constant 0 : index
    %c0_43 = arith.constant 0 : index
    %39 = vector.load %arg17[%c0_42, %c0_43] : memref<1x256xf32, #tpu.memory_space<vmem>>, vector<1x256xf32>
    %40 = vector.broadcast %39 : vector<1x256xf32> to vector<256x256xf32>
    %41 = arith.addf %38, %40 : vector<256x256xf32>
    %42 = vector.extract_strided_slice %41 {offsets = [0, 0], sizes = [256, 128], strides = [1, 1]} : vector<256x256xf32> to vector<256x128xf32>
    %43 = vector.extract_strided_slice %41 {offsets = [0, 128], sizes = [256, 128], strides = [1, 1]} : vector<256x256xf32> to vector<256x128xf32>
    %cst_44 = arith.constant dense<0.000000e+00> : vector<256x256xf32>
    %44 = tpu.matmul %42, %36, %cst_44 {dimension_numbers = #tpu.dot_dimension_numbers<[1], [1], [0], [0], [0, 0, 1, 0], [], []>} : vector<256x128xf32>, vector<256x128xf32>, vector<256x256xf32> -> vector<256x256xf32>
    %cst_45 = arith.constant dense<0xFF800000> : vector<256xf32>
    %45 = vector.multi_reduction <maximumf>, %44, %cst_45 [1] : vector<256x256xf32> to vector<256xf32>
    %46 = vector.shape_cast %45 : vector<256xf32> to vector<256x1xf32>
    %47 = vector.broadcast %46 : vector<256x1xf32> to vector<256x256xf32>
    %48 = arith.subf %44, %47 : vector<256x256xf32>
    %49 = math.exp %48 : vector<256x256xf32>
    %cst_46 = arith.constant dense<0.000000e+00> : vector<256xf32>
    %50 = vector.multi_reduction <add>, %49, %cst_46 [1] : vector<256x256xf32> to vector<256xf32>
    %51 = vector.shape_cast %50 : vector<256xf32> to vector<256x1xf32>
    %52 = tpu.reciprocal %51 {approx = true} : vector<256x1xf32> -> vector<256x1xf32>
    %53 = vector.broadcast %52 : vector<256x1xf32> to vector<256x256xf32>
    %54 = arith.mulf %49, %53 : vector<256x256xf32>
    %cst_47 = arith.constant dense<0.000000e+00> : vector<256x128xf32>
    %55 = tpu.matmul %54, %43, %cst_47 {dimension_numbers = #tpu.dot_dimension_numbers<[1], [0], [0], [1], [0, 0, 1, 1], [], []>} : vector<256x256xf32>, vector<256x128xf32>, vector<256x128xf32> -> vector<256x128xf32>
    %c0_48 = arith.constant 0 : index
    %c0_49 = arith.constant 0 : index
    %56 = vector.load %arg18[%c0_48, %c0_49] : memref<128x128xf32, #tpu.memory_space<vmem>>, vector<128x128xf32>
    %cst_50 = arith.constant dense<0.000000e+00> : vector<256x128xf32>
    %57 = tpu.matmul %55, %56, %cst_50 {dimension_numbers = #tpu.dot_dimension_numbers<[1], [0], [0], [1], [0, 0, 1, 1], [], []>} : vector<256x128xf32>, vector<128x128xf32>, vector<256x128xf32> -> vector<256x128xf32>
    %c0_51 = arith.constant 0 : index
    %c0_52 = arith.constant 0 : index
    %58 = vector.load %arg19[%c0_51, %c0_52] : memref<1x128xf32, #tpu.memory_space<vmem>>, vector<1x128xf32>
    %59 = vector.broadcast %58 : vector<1x128xf32> to vector<256x128xf32>
    %60 = arith.addf %57, %59 : vector<256x128xf32>
    %61 = arith.addf %60, %36 : vector<256x128xf32>
    %c0_53 = arith.constant 0 : index
    %c0_54 = arith.constant 0 : index
    %c0_55 = arith.constant 0 : index
    %62 = vector.load %arg20[%c0_53, %c0_54, %c0_55] : memref<1x256x128xf32, #tpu.memory_space<vmem>>, vector<1x256x128xf32>
    %63 = vector.shape_cast %62 : vector<1x256x128xf32> to vector<256x128xf32>
    %64 = vector.shape_cast %61 : vector<256x128xf32> to vector<1x256x128xf32>
    tpu.vector_store %arg20[%c0_53, %c0_54, %c0_55], %64 {strides = array<i32>} : memref<1x256x128xf32, #tpu.memory_space<vmem>>, vector<1x256x128xf32>,
    return
  }
  func.func @transform_0(%arg0: i32) -> (i32, i32, i32) {
    %c0_i32 = arith.constant 0 : i32
    %c0_i32_0 = arith.constant 0 : i32
    %c0_i32_1 = arith.constant 0 : i32
    return %arg0, %c0_i32, %c0_i32_0 : i32, i32, i32
  }
  func.func @transform_1(%arg0: i32) -> (i32, i32, i32) {
    %c0_i32 = arith.constant 0 : i32
    %c0_i32_0 = arith.constant 0 : i32
    %c0_i32_1 = arith.constant 0 : i32
    return %arg0, %c0_i32, %c0_i32_0 : i32, i32, i32
  }
  func.func @transform_2(%arg0: i32) -> (i32, i32, i32) {
    %c0_i32 = arith.constant 0 : i32
    %c0_i32_0 = arith.constant 0 : i32
    %c0_i32_1 = arith.constant 0 : i32
    return %arg0, %c0_i32, %c0_i32_0 : i32, i32, i32
  }
  func.func @transform_3(%arg0: i32) -> (i32, i32, i32) {
    %c0_i32 = arith.constant 0 : i32
    %c0_i32_0 = arith.constant 0 : i32
    %c0_i32_1 = arith.constant 0 : i32
    return %arg0, %c0_i32, %c0_i32_0 : i32, i32, i32
  }
  func.func @transform_4(%arg0: i32) -> (i32, i32) {
    %c0_i32 = arith.constant 0 : i32
    %c0_i32_0 = arith.constant 0 : i32
    %c0_i32_1 = arith.constant 0 : i32
    return %c0_i32, %c0_i32_0 : i32, i32
  }
  func.func @transform_5(%arg0: i32) -> (i32, i32) {
    %c0_i32 = arith.constant 0 : i32
    %c0_i32_0 = arith.constant 0 : i32
    %c0_i32_1 = arith.constant 0 : i32
    return %c0_i32, %c0_i32_0 : i32, i32
  }
  func.func @transform_6(%arg0: i32) -> (i32, i32) {
    %c0_i32 = arith.constant 0 : i32
    %c0_i32_0 = arith.constant 0 : i32
    %c0_i32_1 = arith.constant 0 : i32
    return %c0_i32, %c0_i32_0 : i32, i32
  }
  func.func @transform_7(%arg0: i32) -> (i32, i32) {
    %c0_i32 = arith.constant 0 : i32
    %c0_i32_0 = arith.constant 0 : i32
    %c0_i32_1 = arith.constant 0 : i32
    return %c0_i32, %c0_i32_0 : i32, i32
  }
  func.func @transform_8(%arg0: i32) -> (i32, i32) {
    %c0_i32 = arith.constant 0 : i32
    %c0_i32_0 = arith.constant 0 : i32
    %c0_i32_1 = arith.constant 0 : i32
    return %c0_i32, %c0_i32_0 : i32, i32
  }
  func.func @transform_9(%arg0: i32) -> (i32, i32) {
    %c0_i32 = arith.constant 0 : i32
    %c0_i32_0 = arith.constant 0 : i32
    %c0_i32_1 = arith.constant 0 : i32
    return %c0_i32, %c0_i32_0 : i32, i32
  }
  func.func @transform_10(%arg0: i32) -> (i32, i32) {
    %c0_i32 = arith.constant 0 : i32
    %c0_i32_0 = arith.constant 0 : i32
    %c0_i32_1 = arith.constant 0 : i32
    return %c0_i32, %c0_i32_0 : i32, i32
  }
  func.func @transform_11(%arg0: i32) -> (i32, i32) {
    %c0_i32 = arith.constant 0 : i32
    %c0_i32_0 = arith.constant 0 : i32
    %c0_i32_1 = arith.constant 0 : i32
    return %c0_i32, %c0_i32_0 : i32, i32
  }
  func.func @transform_12(%arg0: i32) -> (i32, i32) {
    %c0_i32 = arith.constant 0 : i32
    %c0_i32_0 = arith.constant 0 : i32
    %c0_i32_1 = arith.constant 0 : i32
    return %c0_i32, %c0_i32_0 : i32, i32
  }
  func.func @transform_13(%arg0: i32) -> (i32, i32) {
    %c0_i32 = arith.constant 0 : i32
    %c0_i32_0 = arith.constant 0 : i32
    %c0_i32_1 = arith.constant 0 : i32
    return %c0_i32, %c0_i32_0 : i32, i32
  }
  func.func @transform_14(%arg0: i32) -> (i32, i32) {
    %c0_i32 = arith.constant 0 : i32
    %c0_i32_0 = arith.constant 0 : i32
    %c0_i32_1 = arith.constant 0 : i32
    return %c0_i32, %c0_i32_0 : i32, i32
  }
  func.func @transform_15(%arg0: i32) -> (i32, i32) {
    %c0_i32 = arith.constant 0 : i32
    %c0_i32_0 = arith.constant 0 : i32
    %c0_i32_1 = arith.constant 0 : i32
    return %c0_i32, %c0_i32_0 : i32, i32
  }
  func.func @transform_16(%arg0: i32) -> (i32, i32) {
    %c0_i32 = arith.constant 0 : i32
    %c0_i32_0 = arith.constant 0 : i32
    %c0_i32_1 = arith.constant 0 : i32
    return %c0_i32, %c0_i32_0 : i32, i32
  }
  func.func @transform_17(%arg0: i32) -> (i32, i32) {
    %c0_i32 = arith.constant 0 : i32
    %c0_i32_0 = arith.constant 0 : i32
    %c0_i32_1 = arith.constant 0 : i32
    return %c0_i32, %c0_i32_0 : i32, i32
  }
  func.func @transform_18(%arg0: i32) -> (i32, i32) {
    %c0_i32 = arith.constant 0 : i32
    %c0_i32_0 = arith.constant 0 : i32
    %c0_i32_1 = arith.constant 0 : i32
    return %c0_i32, %c0_i32_0 : i32, i32
  }
  func.func @transform_19(%arg0: i32) -> (i32, i32, i32) {
    %c0_i32 = arith.constant 0 : i32
    %c0_i32_0 = arith.constant 0 : i32
    %c0_i32_1 = arith.constant 0 : i32
    return %arg0, %c0_i32, %c0_i32_0 : i32, i32, i32
  }
}

</mosaic_0001>

<bundles_post_ra>
// kernel: tpu_custom_call.1
= control target key start
LH: loop header
LB: loop body
LE: loop exit
PB: predicated region body
PF: predicated region fallthrough
CT: control target
= control target key end

     0   :  { %s5876_s0 = inlined_call_operand.hbm [shape: f32[2,4,512], index: 0, kind: input, shape index: {}]   ;;  %s5877_s1 = inlined_call_operand.vmem [shape: f32[2,16,256], index: 1, kind: input, shape index: {}]   ;;  %s5878_s2 = inlined_call_operand.vmem [shape: f32[2,64,128], index: 2, kind: input, shape index: {}]   ;;  %s5879_s3 = inlined_call_operand.vmem [shape: f32[2,256,64], index: 3, kind: input, shape index: {}]   ;;  %s5880_s4 = inlined_call_operand.vmem [shape: f32[512,128], index: 4, kind: input, shape index: {}]   ;;  %s5881_s5 = inlined_call_operand.vmem [shape: f32[1,128], index: 5, kind: input, shape index: {}]   ;;  %s5882_s6 = inlined_call_operand.vmem [shape: f32[256,128], index: 6, kind: input, shape index: {}]   ;;  %s5883_s7 = inlined_call_operand.vmem [shape: f32[1,128], index: 7, kind: input, shape index: {}]   ;;  %s5884_s8 = inlined_call_operand.hbm [shape: f32[128,128], index: 8, kind: input, shape index: {}]   ;;  %s5885_s9 = inlined_call_operand.vmem [shape: f32[1,128], index: 9, kind: input, shape index: {}]   ;;  %s5886_s10 = inlined_call_operand.hbm [shape: f32[64,128], index: 10, kind: input, shape index: {}]   ;;  %s5887_s11 = inlined_call_operand.vmem [shape: f32[1,128], index: 11, kind: input, shape index: {}]   ;;  %s5888_s12 = inlined_call_operand.vmem [shape: f32[16,4], index: 12, kind: input, shape index: {}]   ;;  %s5889_s13 = inlined_call_operand.vmem [shape: f32[64,16], index: 13, kind: input, shape index: {}]   ;;  %s5890_s14 = inlined_call_operand.vmem [shape: f32[256,64], index: 14, kind: input, shape index: {}]   ;;  %s5891_s15 = inlined_call_operand.hbm [shape: f32[128,256], index: 15, kind: input, shape index: {}]   ;;  %s5892_s16 = inlined_call_operand.vmem [shape: f32[1,256], index: 16, kind: input, shape index: {}]   ;;  %s5893_s17 = inlined_call_operand.hbm [shape: f32[128,128], index: 17, kind: input, shape index: {}]   ;;  %s5894_s18 = inlined_call_operand.vmem [shape: f32[1,128], index: 18, kind: input, shape index: {}]   ;;  %s5895_s19 = inlined_call_operand.hbm [shape: f32[2,256,128], index: 19, kind: output, shape index: {}]  }
   0x1   :  { %5916 = sst [smem:[#allocation34_spill]] %s5876_s0 }
   0x2   :  { %5917 = sst [smem:[#allocation35_spill]] %s5877_s1 }
   0x3   :  { %5918 = sst [smem:[#allocation36_spill]] %s5878_s2 }
   0x4   :  { %5919 = sst [smem:[#allocation37_spill]] %s5879_s3 }
   0x5   :  { %5920 = sst [smem:[#allocation38_spill]] %s5884_s8 }
   0x6   :  { %5921 = sst [smem:[#allocation39_spill]] %s5886_s10 }
   0x7   :  { %5922 = sst [smem:[#allocation40_spill]] %s5887_s11 }
   0x8   :  { %5923 = sst [smem:[#allocation41_spill]] %s5891_s15 }
   0x9   :  { %5924 = sst [smem:[#allocation42_spill]] %s5892_s16 }
   0xa   :  { %5925 = sst [smem:[#allocation43_spill]] %s5893_s17 }
   0xb   :  { %5926 = sst [smem:[#allocation44_spill]] %s5894_s18 }
   0xc   :  { %5927 = sst [smem:[#allocation45_spill]] %s5895_s19 }
   0xd   :  { %24 = vsyncpa [#allocation3], 0 }
   0xe   :  { %26 = vsyncpa [#allocation3 + $0x1], 0 }
   0xf   :  { %27 = vsyncpa [#allocation6], 0 }
  0x10   :  { %28 = vsyncpa [#allocation9], 0 }
  0x11   :  { %29 = vsyncpa [#allocation4], 0 }
  0x12   :  { %31 = vsyncpa [#allocation4 + $0x1], 0  ;;  %s3984_s0 = smov 0   ;;  %s3986_s30 = smov 0  }
  0x13   :  { %s3988_s20 = smov 0   ;;  %s3990_s21 = smov 0  }
  0x14 LB: > { %5928 = sst [smem:[#allocation16_spill]] %s3868_s20  ;;  %s4008_s23 = sadd.s32 4294967295, %s3872_s21   ;;  %s3872_s21 = sphi %s3990_s21, %s5981_s21   ;;  %s3868_s20 = sphi %s3988_s20, %s5983_s20   ;;  %s3864_s30 = sphi %s3986_s30, %s5985_s30   ;;  %s3860_s0 = sphi %s3984_s0, %s5984_s0  }
  0x15   : > { %s5929_s8 = sld [smem:[#allocation38_spill]]  ;;  %p3227_p0 = scmp.ge.s32.totalorder %s3872_s21, 1 }
  0x16   : > { %p58_p1 = scmp.eq.s32.totalorder %s4008_s23, 0  ;;  %p487_p2 = scmp.lt.s32.totalorder %s3872_s21, 3 }
  0x17   : > { %s3874_s25 = smov [#allocation5]   ;;  %s5931_s15 = sld [smem:[#allocation41_spill]] }
  0x18   : > { %p4013_p3 = pnand %p3227_p0, %p487_p2  ;;  %s512_s3 = sshll.u32 %s3874_s25, 4  ;;  %s513_s3 = int_to_ptr.vmem [resolvable:$true] %s512_s3 }
  0x19   : > { %s3875_s1 = smov [#allocation8]   ;;  %s3876_s25 = smov 128  }
  0x1a   : > { %p3378_p4 = pneg %p4013_p3  ;;  %s555_s22 = sshll.u32 %s3875_s1, 4  ;;  %s556_s22 = int_to_ptr.vmem [resolvable:$true] %s555_s22 }
  0x1b   : > { %s510_s2 = sshll.u32 %s5929_s8, 4  ;;  %s3877_s8 = smov 8   ;;  %s511_s2 = int_to_ptr.hbm [resolvable:$true] %s510_s2 }
  0x1c   : > { %p4025_p6 = pnand %p3378_p4, %p58_p1  ;;  %s3878_s26 = smov 256  }
  0x1d   : > { %s553_s28 = sshll.u32 %s5931_s15, 4  ;;  %s3879_s27 = smov 16   ;;  %s554_s28 = int_to_ptr.hbm [resolvable:$true] %s553_s28 }
  0x1e   : > { %3381 = dma.hbm_to_vmem [thread:$0]  (!%p4025_p6), %s511_s2, 2048, %s513_s3, [#allocation6], %s3876_s25, %s3876_s25, %s3877_s8  }
  0x1f   : > { %3387 = dma.hbm_to_vmem [thread:$0]  (!%p4025_p6), %s554_s28, 4096, %s556_s22, [#allocation9], %s3878_s26, %s3878_s26, %s3879_s27  }
  0x20   : > { %s5933_s10 = sld [smem:[#allocation39_spill]]  ;;  %s3880_s1 = smov [#allocation7]  }
  0x21   : > { %s529_s2 = sshll.u32 %s3880_s1, 4  ;;  %s5934_s17 = sld [smem:[#allocation43_spill]]  ;;  %s530_s2 = int_to_ptr.vmem [resolvable:$true] %s529_s2 }
  0x22   : > { %s3881_s15 = smov [#allocation10]   ;;  %s3226_s28 = sadd.s32 4294967294, %s3872_s21  }
  0x23   : > { %s572_s19 = sshll.u32 %s3881_s15, 4  ;;  %s4045_s22 = sadd.s32 1, %s3872_s21   ;;  %s573_s19 = int_to_ptr.vmem [resolvable:$true] %s572_s19 }
  0x24   : > { %5935 = sst [smem:[#allocation17_spill]] %s4045_s22  ;;  %s41_s26 = ssub.s32 %s3872_s21, %s4045_s22 }
  0x25   : > { %s44_s16 = sadd.s32 1, %s3868_s20  ;;  %p42_p7 = scmp.eq.s32.totalorder %s41_s26, 0 }
  0x26   : > { %s527_s18 = sshll.u32 %s5933_s10, 4  ;;  %p51_p8 = scmp.ne.s32.totalorder %s3868_s20, %s3864_s30  ;;  %s528_s18 = int_to_ptr.hbm [resolvable:$true] %s527_s18 }
  0x27   : > { %s570_s11 = sshll.u32 %s5934_s17, 4  ;;  %p52_p9 = scmp.eq.s32.totalorder %s3872_s21, 0  ;;  %s571_s11 = int_to_ptr.hbm [resolvable:$true] %s570_s11 }
  0x28   : > { %3384 = dma.hbm_to_vmem [thread:$0]  (!%p4025_p6), %s528_s18, 1024, %s530_s2, [#allocation6], %s3876_s25, %s3876_s25, %s3877_s8  }
  0x29   : > { %3390 = dma.hbm_to_vmem [thread:$0]  (!%p4025_p6), %s571_s11, 2048, %s573_s19, [#allocation9], %s3876_s25, %s3876_s25, %s3877_s8  }
  0x2a   : > { %p57_p10 = scmp.ne.s32.totalorder %s3864_s30, %s3860_s0  ;;  %p4058_p11 = por %p52_p9, %p51_p8 }
  0x2b   : > { %s4056_s18 = scalar_select %p42_p7, %s3868_s20, %s44_s16  }
  0x2c   : > { %p4064_p12 = por %p58_p1, %p57_p10  ;;  %p474_p13 = scmp.eq.s32.totalorder %s4008_s23, 1 }
  0x2d   : > { %5936 = sst [smem:[#allocation18_spill]] %s4056_s18  ;;  %p480_p0 = scmp.eq.s32.totalorder %s3226_s28, 1 }
  0x2e   : > { %p3403_p2 = scmp.lt.s32.totalorder %s3872_s21, 2  ;;  %s589_s11 = sand.u32 1, %s3868_s20  }
  0x2f   : > { %p4071_p4 = por %p474_p13, %p51_p8  ;;  %p4075_p6 = por %p480_p0, %p57_p10 }
  0x30   : > { %s3233_s1 = sshll.u32 %s589_s11, 4  ;;  %s3329_s2 = sshll.u32 %s3872_s21, 4 }
  0x31   : > { %s5941_s19 = sld [smem:[#allocation34_spill]]  ;;  %s593_s16 = scalar_lea.vmem [#allocation2], %s3233_s1 }
  0x32   : > { %s602_s10 = sshll.u32 %s593_s16, 4  ;;  %p4085_p7 = pnand %p3403_p2, %p4058_p11  ;;  %s603_s10 = int_to_ptr.vmem [resolvable:$true] %s602_s10 }
  0x33   : > { %s590_s18 = scalar_lea.sflag [#allocation3], %s589_s11 }
  0x34   : > { %p3772_p9 = pneg %p4085_p7 }
  0x37   : > { %s598_s26 = scalar_lea.hbm %s5941_s19, %s3329_s2  ;;  %s3775_s3 = scalar_lea.hbm %s5941_s19, 32 }
  0x38   : > { %s600_s17 = sshll.u32 %s598_s26, 4  ;;  %s601_s17 = int_to_ptr.hbm [resolvable:$true] %s600_s17 }
  0x39   : > { %s3768_s20 = sshra.s32 %s601_s17, 4  ;;  %s3769_s20 = int_to_ptr.hbm [resolvable:$true] %s3768_s20 }
  0x3a   : > { %s3770_s22 = scalar_lea.hbm %s3769_s20, 16  ;;  %p3776_p11 = scmp.lt.s32.totalorder %s3769_s20, %s5941_s19 }
  0x3b   : > { %p3771_p8 = scmp.ne.s32.totalorder %s3769_s20, %s3770_s22  ;;  %p3777_p0 = scmp.lt.s32.totalorder %s3775_s3, %s3770_s22 }
  0x3d   : > { %p3773_p10 = pnand %p3772_p9, %p3771_p8  ;;  %p3778_p2 = por %p3777_p0, %p3776_p11 }
  0x3f   : > { %p3774_p13 = pneg %p3773_p10 }
  0x41   : > { %p3779_p5 = pnand %p3778_p2, %p3774_p13 }
  0x43   : > { %3782 = shalt.err (!%p3779_p5)
}
  0x44   : > { %3394 = dma.hbm_to_vmem [thread:$0]  (!%p4085_p7), %s601_s17, 256, %s603_s10, %s590_s18  }
  0x45   : > { %635 = sbr.rel (%p4013_p3) target bundleno = 2157 (0x86d), region = 96 }
  0x4a   : > { %s4102_s11 = sand.u32 1, %s3864_s30  }
  0x4b   : > { %s3237_s26 = sshll.u32 %s4102_s11, 4  ;;  %s638_s16 = scalar_lea.sflag [#allocation3], %s4102_s11 }
  0x4c   : > { %s4106_s1 = scalar_lea.vmem [#allocation2], %s3237_s26 }
  0x4d   : > { %3843 = dma.done.wait (%p4064_p12), %s638_s16, 256  }
  0x4e   : > { %3845 = vsyncadd (%p4064_p12), %s638_s16, 4294967040 }
  0x4f   : > { %3847 = dma.done.wait (%p58_p1), [#allocation6], 3072  }
  0x50   : > { %3849 = vsyncadd (%p58_p1), [#allocation6], 4294964224 }
  0x51   : > { %3851 = dma.done.wait (%p58_p1), [#allocation9], 6144  }
  0x52   : > { %3853 = vsyncadd (%p58_p1), [#allocation9], 4294961152  ;;  %v796_v0 = vld [vmem:[%s5880_s4 + $0x178] sm:$0xff]  ;;  %v795_v2 = vld [vmem:[%s5880_s4 + $0x170] sm:$0xff]  ;;  %p732_p1 = scmp.lt.s32.totalorder %s4008_s23, 1  ;;  %s5943_s24 = sld [smem:[#allocation35_spill]] }
  0x53   : > { %v764_v1 = vld [vmem:[%s5880_s4 + $0x78] sm:$0xff]  ;;  %870 = vmatpush.msra.mxu2 %v796_v0  ;;  %v763_v4 = vld [vmem:[%s5880_s4 + $0x70] sm:$0xff]  ;;  %v794_v6 = vld [vmem:[%s5880_s4 + $0x168] sm:$0xff]  ;;  %s5944_s10 = sld [smem:[#allocation37_spill]]  ;;  %vm1109_vm0 = vcmask 523264   ;;  %vm1328_vm1 = vcmask 1043456  }
  0x54   : > { %830 = vmatpush.msra.mxu0 %v764_v1  ;;  %v812_v3 = vld [vmem:[%s5880_s4 + $0x1f8] sm:$0xff]  ;;  %v811_v7 = vld [vmem:[%s5880_s4 + $0x1f0] sm:$0xff]  ;;  %v762_v8 = vld [vmem:[%s5880_s4 + $0x68] sm:$0xff]  ;;  %s4403_s27 = scalar_select %p732_p1, %s4008_s23, 1  ;;  %vm1321_vm2 = vcmask 31744   ;;  %vm1363_vm3 = vcmask 130048  }
  0x55   : > { %v780_v5 = vld [vmem:[%s5880_s4 + $0xf8] sm:$0xff]  ;;  %890 = vmatpush.msra.mxu3 %v812_v3  ;;  %871 = vmatpush.msra.mxu2 %v795_v2  ;;  %v779_v9 = vld [vmem:[%s5880_s4 + $0xf0] sm:$0xff]  ;;  %v810_v10 = vld [vmem:[%s5880_s4 + $0x1e8] sm:$0xff]  ;;  %s5963_s8 = sld [smem:[#allocation44_spill]]  ;;  %s3242_s28 = sshll.u32 %s4102_s11, 8 }
  0x56   : > { %850 = vmatpush.msra.mxu1 %v780_v5  ;;  %831 = vmatpush.msra.mxu0 %v763_v4  ;;  %v793_v11 = vld [vmem:[%s5880_s4 + $0x160] sm:$0xff]  ;;  %v778_v13 = vld [vmem:[%s5880_s4 + $0xe8] sm:$0xff]  ;;  %v792_v16 = vld [vmem:[%s5880_s4 + $0x158] sm:$0xff]  ;;  %s3331_s2 = sshll.u32 %s4403_s27, 6 }
  0x57   : > { %891 = vmatpush.msra.mxu3 %v811_v7  ;;  %v761_v12 = vld [vmem:[%s5880_s4 + $0x60] sm:$0xff]  ;;  %872 = vmatpush.msra.mxu2 %v794_v6  ;;  %v760_v17 = vld [vmem:[%s5880_s4 + $0x58] sm:$0xff]  ;;  %v791_v20 = vld [vmem:[%s5880_s4 + $0x150] sm:$0xff] }
  0x58   : > { %851 = vmatpush.msra.mxu1 %v779_v9  ;;  %832 = vmatpush.msra.mxu0 %v762_v8  ;;  %v809_v14 = vld [vmem:[%s5880_s4 + $0x1e0] sm:$0xff]  ;;  %v808_v18 = vld [vmem:[%s5880_s4 + $0x1d8] sm:$0xff]  ;;  %v759_v21 = vld [vmem:[%s5880_s4 + $0x50] sm:$0xff] }
  0x59   : > { %v777_v15 = vld [vmem:[%s5880_s4 + $0xe0] sm:$0xff]  ;;  %892 = vmatpush.msra.mxu3 %v810_v10  ;;  %873 = vmatpush.msra.mxu2 %v793_v11  ;;  %v776_v19 = vld [vmem:[%s5880_s4 + $0xd8] sm:$0xff]  ;;  %v807_v22 = vld [vmem:[%s5880_s4 + $0x1d0] sm:$0xff] }
  0x5a   : > { %852 = vmatpush.msra.mxu1 %v778_v13  ;;  %833 = vmatpush.msra.mxu0 %v761_v12  ;;  %v775_v23 = vld [vmem:[%s5880_s4 + $0xd0] sm:$0xff]  ;;  %v790_v24 = vld [vmem:[%s5880_s4 + $0x148] sm:$0xff]  ;;  %v789_v28 = vld [vmem:[%s5880_s4 + $0x140] sm:$0xff] }
  0x5b   : > { %893 = vmatpush.msra.mxu3 %v809_v14  ;;  %874 = vmatpush.msra.mxu2 %v792_v16  ;;  %v758_v25 = vld [vmem:[%s5880_s4 + $0x48] sm:$0xff]  ;;  %v757_v29 = vld [vmem:[%s5880_s4 + $0x40] sm:$0xff]  ;;  %v788_v32 = vld [vmem:[%s5880_s4 + $0x138] sm:$0xff] }
  0x5c   : > { %853 = vmatpush.msra.mxu1 %v777_v15  ;;  %834 = vmatpush.msra.mxu0 %v760_v17  ;;  %v806_v26 = vld [vmem:[%s5880_s4 + $0x1c8] sm:$0xff]  ;;  %v805_v30 = vld [vmem:[%s5880_s4 + $0x1c0] sm:$0xff]  ;;  %v756_v33 = vld [vmem:[%s5880_s4 + $0x38] sm:$0xff] }
  0x5d   : > { %894 = vmatpush.msra.mxu3 %v808_v18  ;;  %875 = vmatpush.msra.mxu2 %v791_v20  ;;  %v774_v27 = vld [vmem:[%s5880_s4 + $0xc8] sm:$0xff]  ;;  %v773_v31 = vld [vmem:[%s5880_s4 + $0xc0] sm:$0xff]  ;;  %v804_v34 = vld [vmem:[%s5880_s4 + $0x1b8] sm:$0xff] }
  0x5e   : > { %854 = vmatpush.msra.mxu1 %v776_v19  ;;  %835 = vmatpush.msra.mxu0 %v759_v21  ;;  %v772_v35 = vld [vmem:[%s5880_s4 + $0xb8] sm:$0xff]  ;;  %v787_v36 = vld [vmem:[%s5880_s4 + $0x130] sm:$0xff]  ;;  %v786_v40 = vld [vmem:[%s5880_s4 + $0x128] sm:$0xff] }
  0x5f   : > { %895 = vmatpush.msra.mxu3 %v807_v22  ;;  %876 = vmatpush.msra.mxu2 %v790_v24  ;;  %v755_v37 = vld [vmem:[%s5880_s4 + $0x30] sm:$0xff]  ;;  %v754_v41 = vld [vmem:[%s5880_s4 + $0x28] sm:$0xff]  ;;  %v785_v44 = vld [vmem:[%s5880_s4 + $0x120] sm:$0xff] }
  0x60   : > { %855 = vmatpush.msra.mxu1 %v775_v23  ;;  %836 = vmatpush.msra.mxu0 %v758_v25  ;;  %v803_v38 = vld [vmem:[%s5880_s4 + $0x1b0] sm:$0xff]  ;;  %v802_v42 = vld [vmem:[%s5880_s4 + $0x1a8] sm:$0xff]  ;;  %v753_v45 = vld [vmem:[%s5880_s4 + $0x20] sm:$0xff] }
  0x61   : > { %896 = vmatpush.msra.mxu3 %v806_v26  ;;  %877 = vmatpush.msra.mxu2 %v789_v28  ;;  %v771_v39 = vld [vmem:[%s5880_s4 + $0xb0] sm:$0xff]  ;;  %v770_v43 = vld [vmem:[%s5880_s4 + $0xa8] sm:$0xff]  ;;  %v801_v47 = vld [vmem:[%s5880_s4 + $0x1a0] sm:$0xff] }
  0x62   : > { %856 = vmatpush.msra.mxu1 %v774_v27  ;;  %837 = vmatpush.msra.mxu0 %v757_v29  ;;  %v748_v46 = vld [vmem:[%s4106_s1 + $0x8] sm:$0xff]  ;;  %v747_v49 = vld [vmem:[%s4106_s1] sm:$0xff]  ;;  %s3330_s1 = sshll.u32 %s4403_s27, 5 }
  0x63   : > { %897 = vmatpush.msra.mxu3 %v805_v30  ;;  %878 = vmatpush.msra.mxu2 %v788_v32  ;;  %v769_v48 = vld [vmem:[%s5880_s4 + $0xa0] sm:$0xff]  ;;  %821 = vst [vmem:[#allocation1 + $0x10] ss:$2 sm:$0xff] %v748_v46  ;;  %v784_v50 = vld [vmem:[%s5880_s4 + $0x118] sm:$0xff]  ;;  %v783_v54 = vld [vmem:[%s5880_s4 + $0x110] sm:$0xff]  ;;  %s736_s22 = scalar_lea.vmem %s5943_s24, %s3330_s1  ;;  %s3332_s1 = sshll.u32 %s4403_s27, 8 }
  0x64   : > { %857 = vmatpush.msra.mxu1 %v773_v31  ;;  %838 = vmatpush.msra.mxu0 %v756_v33  ;;  %v752_v51 = vld [vmem:[%s5880_s4 + $0x18] sm:$0xff]  ;;  %819 = vst [vmem:[#allocation1] ss:$2 sm:$0xff] %v747_v49  ;;  %v751_v55 = vld [vmem:[%s5880_s4 + $0x10] sm:$0xff]  ;;  %v782_v58 = vld [vmem:[%s5880_s4 + $0x108] sm:$0xff]  ;;  %s4455_s17 = scalar_lea.vmem %s5944_s10, %s3332_s1  ;;  %s5945_s1 = sld [smem:[#allocation36_spill]] }
  0x65   : > { %898 = vmatpush.msra.mxu3 %v804_v34  ;;  %879 = vmatpush.msra.mxu2 %v787_v36  ;;  %v800_v52 = vld [vmem:[%s5880_s4 + $0x198] sm:$0xff]  ;;  %v799_v56 = vld [vmem:[%s5880_s4 + $0x190] sm:$0xff]  ;;  %v750_v59 = vld [vmem:[%s5880_s4 + $0x8] sm:$0xff]  ;;  %s5954_s24 = sld [smem:[#allocation42_spill]]  ;;  %s3064_s10 = scalar_lea.sflag [#allocation4], %s4102_s11 }
  0x66   : > { %858 = vmatpush.msra.mxu1 %v772_v35  ;;  %839 = vmatpush.msra.mxu0 %v755_v37  ;;  %v768_v53 = vld [vmem:[%s5880_s4 + $0x98] sm:$0xff]  ;;  %v767_v57 = vld [vmem:[%s5880_s4 + $0x90] sm:$0xff]  ;;  %v798_v60 = vld [vmem:[%s5880_s4 + $0x188] sm:$0xff] }
  0x67   : > { %899 = vmatpush.msra.mxu3 %v803_v38  ;;  %880 = vmatpush.msra.mxu2 %v786_v40  ;;  %v766_v61 = vld [vmem:[%s5880_s4 + $0x88] sm:$0xff]  ;;  %v781_v62 = vld [vmem:[%s5880_s4 + $0x100] sm:$0xff]  ;;  %v929_v5 = vld [vmem:[%s5882_s6 + $0x78] sm:$0xff] }
  0x68   : > { %859 = vmatpush.msra.mxu1 %v771_v39  ;;  %840 = vmatpush.msra.mxu0 %v754_v41  ;;  %v749_v63 = vld [vmem:[%s5880_s4] sm:$0xff]  ;;  %v928_v7 = vld [vmem:[%s5882_s6 + $0x70] sm:$0xff]  ;;  %v945_v8 = vld [vmem:[%s5882_s6 + $0xf8] sm:$0xff] }
  0x69   : > { %900 = vmatpush.msra.mxu3 %v802_v42  ;;  %881 = vmatpush.msra.mxu2 %v785_v44  ;;  %v797_v1 = vld [vmem:[%s5880_s4 + $0x180] sm:$0xff]  ;;  %v927_v9 = vld [vmem:[%s5882_s6 + $0x68] sm:$0xff]  ;;  %v944_v10 = vld [vmem:[%s5882_s6 + $0xf0] sm:$0xff] }
  0x6a   : > { %860 = vmatpush.msra.mxu1 %v770_v43  ;;  %841 = vmatpush.msra.mxu0 %v753_v45  ;;  %v824_v0 = vld.sshfl [vmem:[#allocation1 + $0x10] sm:$0xff pattern:$0x75316420]  ;;  %v825_v3 = vld.sshfl [vmem:[#allocation1 + $0x18] sm:$0xff pattern:$0x75316420]  ;;  %s4515_s26 = scalar_lea.vmem %s5945_s1, %s3331_s2 }
  0x6b   : > { %901 = vmatpush.msra.mxu3 %v801_v47  ;;  %882 = vmatpush.msra.mxu2 %v784_v50  ;;  %v822_v2 = vld.sshfl [vmem:[#allocation1] sm:$0xff pattern:$0x75316420]  ;;  %v823_v6 = vld.sshfl [vmem:[#allocation1 + $0x8] sm:$0xff pattern:$0x75316420] }
  0x6c   : > { %861 = vmatpush.msra.mxu1 %v769_v48  ;;  %842 = vmatpush.msra.mxu0 %v752_v51  ;;  %v765_v4 = vld [vmem:[%s5880_s4 + $0x80] sm:$0xff]  ;;  %v943_v12 = vld [vmem:[%s5882_s6 + $0xe8] sm:$0xff]  ;;  %v4338_v14 = vld [vmem:[#allocation7 + $0x30] sm:$0xff]  ;;  %s5946_s1 = sld [smem:[#allocation40_spill]]  ;;  %s3333_s2 = sshll.u32 %s4008_s23, 8 }
  0x6d   : > { %902 = vmatpush.msra.mxu3 %v800_v52  ;;  %883 = vmatpush.msra.mxu2 %v783_v54  ;;  %v926_v11 = vld [vmem:[%s5882_s6 + $0x60] sm:$0xff]  ;;  %v925_v15 = vld [vmem:[%s5882_s6 + $0x58] sm:$0xff]  ;;  %v4347_v17 = vld [vmem:[#allocation7 + $0x28] sm:$0xff] }
  0x6e   : > { %862 = vmatpush.msra.mxu1 %v768_v53  ;;  %843 = vmatpush.msra.mxu0 %v751_v55  ;;  %v4335_v13 = vld [vmem:[#allocation7 + $0x38] sm:$0xff]  ;;  %v924_v18 = vld [vmem:[%s5882_s6 + $0x50] sm:$0xff]  ;;  %v941_v19 = vld [vmem:[%s5882_s6 + $0xd8] sm:$0xff] }
  0x6f   : > { %903 = vmatpush.msra.mxu3 %v799_v56  ;;  %884 = vmatpush.msra.mxu2 %v782_v58  ;;  %v942_v16 = vld [vmem:[%s5882_s6 + $0xe0] sm:$0xff]  ;;  %v4356_v20 = vld [vmem:[#allocation7 + $0x20] sm:$0xff]  ;;  %v940_v22 = vld [vmem:[%s5882_s6 + $0xd0] sm:$0xff] }
  0x70   : > { %863 = vmatpush.msra.mxu1 %v767_v57  ;;  %844 = vmatpush.msra.mxu0 %v750_v59  ;;  %v923_v21 = vld [vmem:[%s5882_s6 + $0x48] sm:$0xff]  ;;  %v4365_v23 = vld [vmem:[#allocation7 + $0x18] sm:$0xff]  ;;  %v4374_v26 = vld [vmem:[#allocation7 + $0x10] sm:$0xff] }
  0x71   : > { %904 = vmatpush.msra.mxu3 %v798_v60  ;;  %885 = vmatpush.msra.mxu2 %v781_v62  ;;  %v922_v24 = vld [vmem:[%s5882_s6 + $0x40] sm:$0xff]  ;;  %v939_v25 = vld [vmem:[%s5882_s6 + $0xc8] sm:$0xff]  ;;  %v921_v27 = vld [vmem:[%s5882_s6 + $0x38] sm:$0xff] }
  0x72   : > { %864 = vmatpush.msra.mxu1 %v766_v61  ;;  %845 = vmatpush.msra.mxu0 %v749_v63  ;;  %v938_v28 = vld [vmem:[%s5882_s6 + $0xc0] sm:$0xff]  ;;  %v4384_v29 = vld [vmem:[#allocation7 + $0x8] sm:$0xff]  ;;  %v937_v31 = vld [vmem:[%s5882_s6 + $0xb8] sm:$0xff] }
  0x73   : > { %886 = vmatmul.f32.vlgmr.msra.gmra.mxu2 %v824_v0  ;;  %905 = vmatpush.msra.mxu3 %v797_v1  ;;  %v920_v30 = vld [vmem:[%s5882_s6 + $0x30] sm:$0xff]  ;;  %v4393_v32 = vld [vmem:[#allocation7] sm:$0xff]  ;;  %v918_v35 = vld [vmem:[%s5882_s6 + $0x20] sm:$0xff] }
  0x74   : > { %846 = vmatmul.f32.vlgmr.msra.gmra.mxu0 %v822_v2  ;;  %906 = vmatmul.f32.vlgmr.msra.gmra.mxu3 %v825_v3  ;;  %v919_v33 = vld [vmem:[%s5882_s6 + $0x28] sm:$0xff]  ;;  %v936_v34 = vld [vmem:[%s5882_s6 + $0xb0] sm:$0xff]  ;;  %v917_v37 = vld [vmem:[%s5882_s6 + $0x18] sm:$0xff] }
  0x75   : > { %865 = vmatpush.msra.mxu1 %v765_v4  ;;  %950 = vmatpush.msrb.mxu0 %v929_v5  ;;  %v935_v36 = vld [vmem:[%s5882_s6 + $0xa8] sm:$0xff]  ;;  %v934_v38 = vld [vmem:[%s5882_s6 + $0xa0] sm:$0xff]  ;;  %v916_v39 = vld [vmem:[%s5882_s6 + $0x10] sm:$0xff] }
  0x76   : > { %866 = vmatmul.f32.vlgmr.msra.gmra.mxu1 %v823_v6  ;;  %3336 = vmatpush.msrb.mxu3 %v4335_v13  ;;  %v933_v40 = vld [vmem:[%s5882_s6 + $0x98] sm:$0xff]  ;;  %v915_v41 = vld [vmem:[%s5882_s6 + $0x8] sm:$0xff]  ;;  %v932_v42 = vld [vmem:[%s5882_s6 + $0x90] sm:$0xff] }
  0x77   : > { %951 = vmatpush.msrb.mxu0 %v928_v7  ;;  %973 = vmatpush.msrb.mxu1 %v945_v8  ;;  %v914_v43 = vld [vmem:[%s5882_s6] sm:$0xff]  ;;  %v931_v44 = vld [vmem:[%s5882_s6 + $0x88] sm:$0xff]  ;;  %v912_v48 = vld [vmem:[%s736_s22 + $0x10] sm:$0xff] }
  0x78   : > { %3339 = vmatpush.msrb.mxu3 %v4338_v14  ;;  %v910_v45 = vld [vmem:[%s736_s22] sm:$0xff]  ;;  %v911_v47 = vld [vmem:[%s736_s22 + $0x8] sm:$0xff]  ;;  %v913_v49 = vld [vmem:[%s736_s22 + $0x18] sm:$0xff] }
  0x79   : > { %952 = vmatpush.msrb.mxu0 %v927_v9  ;;  %974 = vmatpush.msrb.mxu1 %v944_v10  ;;  %v930_v46 = vld [vmem:[%s5882_s6 + $0x80] sm:$0xff]  ;;  %v1066_v51 = vld [vmem:[%s4455_s17 + $0x8] sm:$0xff]  ;;  %v1067_v52 = vld [vmem:[%s4455_s17 + $0x10] sm:$0xff] }
  0x7a   : > { %3342 = vmatpush.msrb.mxu3 %v4347_v17  ;;  %v1065_v50 = vld [vmem:[%s4455_s17] sm:$0xff]  ;;  %v1068_v53 = vld [vmem:[%s4455_s17 + $0x18] sm:$0xff]  ;;  %v1070_v55 = vld [vmem:[%s4455_s17 + $0x28] sm:$0xff] }
  0x7b   : > { %953 = vmatpush.msrb.mxu0 %v926_v11  ;;  %975 = vmatpush.msrb.mxu1 %v943_v12  ;;  %v1069_v54 = vld [vmem:[%s4455_s17 + $0x20] sm:$0xff]  ;;  %v1071_v56 = vld [vmem:[%s4455_s17 + $0x30] sm:$0xff]  ;;  %v1072_v57 = vld [vmem:[%s4455_s17 + $0x38] sm:$0xff] }
  0x7c   : > { %3345 = vmatpush.msrb.mxu3 %v4356_v20  ;;  %v1073_v58 = vld [vmem:[%s4455_s17 + $0x40] sm:$0xff]  ;;  %v1320_v5 = vld [vmem:[%s5888_s12 + $0x8] sm:$0xff]  ;;  %v1018_v11 = vld [vmem:[#allocation5 + $0x70] sm:$0xff] }
  0x7d   : > { %954 = vmatpush.msrb.mxu0 %v925_v15  ;;  %976 = vmatpush.msrb.mxu1 %v942_v16  ;;  %v3451_v59 = vld [vmem:[%s5881_s5] ss:$0 sm:$0xff]  ;;  %v1017_v12 = vld [vmem:[#allocation5 + $0x68] sm:$0xff]  ;;  %v1016_v16 = vld [vmem:[#allocation5 + $0x60] sm:$0xff] }
  0x7e   : > { %3348 = vmatpush.msrb.mxu3 %v4365_v23  ;;  %v1319_v4 = vld [vmem:[%s5888_s12] sm:$0xff] }
  0x7f   : > { %955 = vmatpush.msrb.mxu0 %v924_v18  ;;  %977 = vmatpush.msrb.mxu1 %v941_v19  ;;  %v1019_v10 = vld [vmem:[#allocation5 + $0x78] sm:$0xff]  ;;  %v1014_v19 = vld [vmem:[#allocation5 + $0x50] sm:$0xff] }
  0x80   : > { %3351 = vmatpush.msrb.mxu3 %v4374_v26  ;;  %1024 = vmatpush.msrb.mxu2 %v1019_v10  ;;  %v1015_v18 = vld [vmem:[#allocation5 + $0x58] sm:$0xff] }
  0x81   : > { %956 = vmatpush.msrb.mxu0 %v923_v21  ;;  %978 = vmatpush.msrb.mxu1 %v940_v22  ;;  %v1013_v21 = vld [vmem:[#allocation5 + $0x48] sm:$0xff]  ;;  %v1074_v22 = vld [vmem:[%s4455_s17 + $0x48] sm:$0xff] }
  0x82   : > { %3354 = vmatpush.msrb.mxu3 %v4384_v29  ;;  %1025 = vmatpush.msrb.mxu2 %v1018_v11 }
  0x83   : > { %957 = vmatpush.msrb.mxu0 %v922_v24  ;;  %979 = vmatpush.msrb.mxu1 %v939_v25  ;;  %v1012_v24 = vld [vmem:[#allocation5 + $0x40] sm:$0xff] }
  0x84   : > { %3357 = vmatpush.msrb.mxu3 %v4393_v32  ;;  %1026 = vmatpush.msrb.mxu2 %v1017_v12 }
  0x85   : > { %958 = vmatpush.msrb.mxu0 %v921_v27  ;;  %980 = vmatpush.msrb.mxu1 %v938_v28  ;;  %v1011_v27 = vld [vmem:[#allocation5 + $0x38] sm:$0xff]  ;;  %v1010_v28 = vld [vmem:[#allocation5 + $0x30] sm:$0xff] }
  0x86   : > { %1027 = vmatpush.msrb.mxu2 %v1016_v16 }
  0x87   : > { %959 = vmatpush.msrb.mxu0 %v920_v30  ;;  %981 = vmatpush.msrb.mxu1 %v937_v31  ;;  %v1009_v30 = vld [vmem:[#allocation5 + $0x28] sm:$0xff] }
  0x88   : > { %1028 = vmatpush.msrb.mxu2 %v1015_v18  ;;  %v1075_v31 = vld [vmem:[%s4455_s17 + $0x50] sm:$0xff] }
  0x89   : > { %960 = vmatpush.msrb.mxu0 %v919_v33  ;;  %982 = vmatpush.msrb.mxu1 %v936_v34  ;;  %v1008_v33 = vld [vmem:[#allocation5 + $0x20] sm:$0xff]  ;;  %v1007_v34 = vld [vmem:[#allocation5 + $0x18] sm:$0xff] }
  0x8a   : > { %1029 = vmatpush.msrb.mxu2 %v1014_v19 }
  0x8b   : > { %961 = vmatpush.msrb.mxu0 %v918_v35  ;;  %983 = vmatpush.msrb.mxu1 %v935_v36 }
  0x8c   : > { %1030 = vmatpush.msrb.mxu2 %v1013_v21 }
  0x8d   : > { %962 = vmatpush.msrb.mxu0 %v917_v37  ;;  %984 = vmatpush.msrb.mxu1 %v934_v38  ;;  %v1006_v37 = vld [vmem:[#allocation5 + $0x10] sm:$0xff]  ;;  %v1005_v38 = vld [vmem:[#allocation5 + $0x8] sm:$0xff] }
  0x8e   : > { %1031 = vmatpush.msrb.mxu2 %v1012_v24 }
  0x8f   : > { %963 = vmatpush.msrb.mxu0 %v916_v39  ;;  %985 = vmatpush.msrb.mxu1 %v933_v40  ;;  %v1004_v40 = vld [vmem:[#allocation5] sm:$0xff] }
  0x90   : > { %1032 = vmatpush.msrb.mxu2 %v1011_v27  ;;  %v3454_v27 = vld [vmem:[%s5885_s9] ss:$0 sm:$0xff] }
  0x91   : > { %964 = vmatpush.msrb.mxu0 %v915_v41  ;;  %986 = vmatpush.msrb.mxu1 %v932_v42  ;;  %v1076_v41 = vld [vmem:[%s4455_s17 + $0x58] sm:$0xff]  ;;  %v996_v42 = vld [vmem:[%s4515_s26] sm:$0xff] }
  0x92   : > { %1033 = vmatpush.msrb.mxu2 %v1010_v28 }
  0x93   : > { %965 = vmatpush.msrb.mxu0 %v914_v43  ;;  %987 = vmatpush.msrb.mxu1 %v931_v44  ;;  %v997_v44 = vld [vmem:[%s4515_s26 + $0x8] sm:$0xff] }
  0x94   : > { %966 = vmatmul.f32.vlgmr.msrb.gmra.mxu0 %v910_v45  ;;  %1034 = vmatpush.msrb.mxu2 %v1009_v30  ;;  %v998_v45 = vld [vmem:[%s4515_s26 + $0x10] sm:$0xff] }
  0x95   : > { %988 = vmatpush.msrb.mxu1 %v930_v46  ;;  %1214 = vmatpush.msra.mxu0 %v4335_v13 }
  0x96   : > { %989 = vmatmul.f32.vlgmr.msrb.gmra.mxu1 %v911_v47  ;;  %1035 = vmatpush.msrb.mxu2 %v1008_v33 }
  0x97   : > { %1215 = vmatpush.msra.mxu0 %v4338_v14  ;;  %3334 = vmatpush.msra.mxu1 %v4335_v13 }
  0x98   : > { %1036 = vmatpush.msrb.mxu2 %v1007_v34 }
  0x99   : > { %1216 = vmatpush.msra.mxu0 %v4347_v17  ;;  %3337 = vmatpush.msra.mxu1 %v4338_v14 }
  0x9a   : > { %1037 = vmatpush.msrb.mxu2 %v1006_v37 }
  0x9b   : > { %1217 = vmatpush.msra.mxu0 %v4356_v20  ;;  %3340 = vmatpush.msra.mxu1 %v4347_v17 }
  0x9c   : > { %969 = vmatmul.f32.gmra.mxu0 %v912_v48  ;;  %1038 = vmatpush.msrb.mxu2 %v1005_v38 }
  0x9d   : > { %1218 = vmatpush.msra.mxu0 %v4365_v23  ;;  %3343 = vmatpush.msra.mxu1 %v4356_v20 }
  0x9e   : > { %992 = vmatmul.f32.gmra.mxu1 %v913_v49  ;;  %1039 = vmatpush.msrb.mxu2 %v1004_v40 }
  0x9f   : > { %1219 = vmatpush.msra.mxu0 %v4374_v26  ;;  %3346 = vmatpush.msra.mxu1 %v4365_v23 }
  0xa0   : > { %1040 = vmatmul.f32.vlgmr.msrb.gmra.mxu2 %v996_v42 }
  0xa1   : > { %1220 = vmatpush.msra.mxu0 %v4384_v29  ;;  %3349 = vmatpush.msra.mxu1 %v4374_v26 }
  0xa2   : > { %3335 = vmatpush.msra.mxu2 %v4335_v13 }
  0xa3   : > { %1221 = vmatpush.msra.mxu0 %v4393_v32  ;;  %3352 = vmatpush.msra.mxu1 %v4384_v29 }
  0xa4   : > { %3249 = vmatmul.msk.f32.vlgmr.msra.gmra.mxu0 %vm1109_vm0, %v1065_v50  ;;  %3338 = vmatpush.msra.mxu2 %v4338_v14 }
  0xa5   : > { %3355 = vmatpush.msra.mxu1 %v4393_v32 }
  0xa6   : > { %3258 = vmatmul.msk.f32.vlgmr.msra.gmra.mxu1 %vm1109_vm0, %v1074_v22  ;;  %3341 = vmatpush.msra.mxu2 %v4347_v17  ;;  %v999_v17 = vld [vmem:[%s4515_s26 + $0x18] sm:$0xff] }
  0xa8   : > { %3344 = vmatpush.msra.mxu2 %v4356_v20  ;;  %v3452_v20 = vld [vmem:[%s5883_s7] ss:$0 sm:$0xff] }
  0xa9   : > { %1043 = vmatmul.f32.gmra.mxu2 %v997_v44 }
  0xaa   : > { %3347 = vmatpush.msra.mxu2 %v4365_v23 }
  0xac   : > { %3250 = vmatmul.msk.f32.gmra.mxu0 %vm1109_vm0, %v1066_v51  ;;  %3350 = vmatpush.msra.mxu2 %v4374_v26  ;;  %v1000_v26 = vld [vmem:[%s4515_s26 + $0x20] sm:$0xff] }
  0xae   : > { %3259 = vmatmul.msk.f32.gmra.mxu1 %vm1109_vm0, %v1075_v31  ;;  %3353 = vmatpush.msra.mxu2 %v4384_v29 }
  0xb0   : > { %3356 = vmatpush.msra.mxu2 %v4393_v32 }
  0xb1   : > { %1046 = vmatmul.f32.gmra.mxu2 %v998_v45 }
  0xb4   : > { %3251 = vmatmul.msk.f32.gmra.mxu0 %vm1109_vm0, %v1067_v52  ;;  %v1355_v52 = vld [vmem:[%s5889_s13] sm:$0xff] }
  0xb6   : > { %3260 = vmatmul.msk.f32.gmra.mxu1 %vm1109_vm0, %v1076_v41 }
  0xb9   : > { %1049 = vmatmul.f32.gmra.mxu2 %v999_v17 }
  0xbc   : > { %3252 = vmatmul.msk.f32.gmra.mxu0 %vm1109_vm0, %v1068_v53  ;;  %v1001_v53 = vld [vmem:[%s4515_s26 + $0x28] sm:$0xff] }
  0xc1   : > { %1052 = vmatmul.f32.gmra.mxu2 %v1000_v26  ;;  %v1429_v26 = vld [vmem:[%s5890_s14] sm:$0xff] }
  0xc4   : > { %3253 = vmatmul.msk.f32.gmra.mxu0 %vm1109_vm0, %v1069_v54  ;;  %v1356_v54 = vld [vmem:[%s5889_s13 + $0x8] sm:$0xff] }
  0xc9   : > { %1055 = vmatmul.f32.gmra.mxu2 %v1001_v53  ;;  %v1078_v53 = vld [vmem:[%s4455_s17 + $0x68] sm:$0xff] }
  0xcc   : > { %3254 = vmatmul.msk.f32.gmra.mxu0 %vm1109_vm0, %v1070_v55  ;;  %v1002_v55 = vld [vmem:[%s4515_s26 + $0x30] sm:$0xff] }
  0xd1   : > { %1058 = vmatmul.f32.gmra.mxu2 %v1002_v55  ;;  %v1700_v55 = vld [vmem:[#allocation8 + $0xf0] sm:$0xff] }
  0xd2   : > { %1708 = vmatpush.msrb.mxu2 %v1700_v55 }
  0xd4   : > { %3255 = vmatmul.msk.f32.gmra.mxu0 %vm1109_vm0, %v1071_v56  ;;  %v1357_v56 = vld [vmem:[%s5889_s13 + $0x10] sm:$0xff] }
  0xdc   : > { %3256 = vmatmul.msk.f32.gmra.mxu0 %vm1109_vm0, %v1072_v57  ;;  %v1003_v57 = vld [vmem:[%s4515_s26 + $0x38] sm:$0xff] }
  0xdd   : > { %1061 = vmatmul.f32.gmra.mxu2 %v1003_v57  ;;  %v1698_v57 = vld [vmem:[#allocation8 + $0xe0] sm:$0xff] }
  0xde   : > { %1709 = vmatpush.msrb.mxu2 %v1698_v57 }
  0xe4   : > { %3257 = vmatmul.msk.f32.gmra.mxu0 %vm1109_vm0, %v1073_v58  ;;  %v1358_v58 = vld [vmem:[%s5889_s13 + $0x18] sm:$0xff] }
  0xf1   : > { %v847_v60 = vpop.f32.mrf.mxu0 }
  0xf2   : > { %v848_v61 = vadd.f32 %v3451_v59, %v847_v60  ;;  %v1359_v59 = vld [vmem:[%s5889_s13 + $0x20] sm:$0xff]  ;;  %v1360_v60 = vld [vmem:[%s5889_s13 + $0x28] sm:$0xff] }
  0xf3   : > { %v867_v62 = vpop.f32.mrf.mxu1 }
  0xf4   : > { %v868_v63 = vadd.f32 %v867_v62, %v848_v61  ;;  %v1361_v61 = vld [vmem:[%s5889_s13 + $0x30] sm:$0xff]  ;;  %v1362_v62 = vld [vmem:[%s5889_s13 + $0x38] sm:$0xff] }
  0xf6   : > { %v887_v0 = vpop.f32.mrf.mxu2 }
  0xf7   : > { %v888_v1 = vadd.f32 %v887_v0, %v868_v63  ;;  %v907_v2 = vpop.f32.mrf.mxu3 }
  0xf9   : > { %v908_v3 = vadd.f32 %v907_v2, %v888_v1 }
  0xfb   : > { %3281 = vmatpush.msk.msrb.mxu0 %vm1328_vm1, %v908_v3 }
  0xfc   : > { %3282 = vmatmul.msk.f32.vlgmr.msrb.gmra.mxu0 %vm1321_vm2, %v1319_v4 }
 0x104   : > { %3283 = vmatmul.msk.f32.gmra.mxu0 %vm1321_vm2, %v1320_v5 }
 0x111   : > { %v4491_v6 = vpop.f32.mrf.mxu0 }
 0x112   : > { %v968_v29 = vadd.f32 %v3452_v20, %v4491_v6 }
 0x113   : > { %v990_v14 = vpop.f32.mrf.mxu1 }
 0x114   : > { %v991_v49 = vadd.f32 %v990_v14, %v968_v29  ;;  %v1431_v29 = vld [vmem:[%s5890_s14 + $0x10] sm:$0xff] }
 0x119   : > { %v4493_v7 = vpop.f32.mrf.mxu0 }
 0x11a   : > { %v971_v23 = vadd.f32 %v3452_v20, %v4493_v7 }
 0x11b   : > { %v993_v47 = vpop.f32.mrf.mxu1 }
 0x11c   : > { %v994_v32 = vadd.f32 %v993_v47, %v971_v23  ;;  %v1430_v47 = vld [vmem:[%s5890_s14 + $0x8] sm:$0xff] }
 0x121   : > { %v4495_v8 = vpop.f32.mrf.mxu0 }
 0x123   : > { %v4578_v63 = vpop.f32.mrf.mxu1  ;;  %v1041_v1 = vpop.f32.mrf.mxu2 }
 0x124   : > { %v1042_v17 = vadd.f32 %v3454_v27, %v1041_v1  ;;  %v1695_v1 = vld [vmem:[#allocation8 + $0xc8] sm:$0xff] }
 0x129   : > { %v4497_v9 = vpop.f32.mrf.mxu0 }
 0x12b   : > { %v4580_v0 = vpop.f32.mrf.mxu1 }
 0x12c   : > { %v1044_v3 = vpop.f32.mrf.mxu2 }
 0x12d   : > { %v1045_v45 = vadd.f32 %v3454_v27, %v1044_v3  ;;  %v1438_v3 = vld [vmem:[%s5890_s14 + $0x48] sm:$0xff] }
 0x131   : > { %v4499_v15 = vpop.f32.mrf.mxu0 }
 0x133   : > { %v4582_v2 = vpop.f32.mrf.mxu1 }
 0x134   : > { %v1047_v5 = vpop.f32.mrf.mxu2 }
 0x135   : > { %v1048_v42 = vadd.f32 %v3454_v27, %v1047_v5  ;;  %v1693_v5 = vld [vmem:[#allocation8 + $0xb8] sm:$0xff] }
 0x139   : > { %v4503_v25 = vpop.f32.mrf.mxu0 }
 0x13c   : > { %v1050_v7 = vpop.f32.mrf.mxu2 }
 0x13d   : > { %v1051_v40 = vadd.f32 %v3454_v27, %v1050_v7  ;;  %v1691_v7 = vld [vmem:[#allocation8 + $0xa8] sm:$0xff] }
 0x141   : > { %v4507_v35 = vpop.f32.mrf.mxu0 }
 0x144   : > { %v1053_v11 = vpop.f32.mrf.mxu2 }
 0x145   : > { %v1054_v37 = vadd.f32 %v3454_v27, %v1053_v11  ;;  %v1689_v11 = vld [vmem:[#allocation8 + $0x98] sm:$0xff] }
 0x149   : > { %v4509_v36 = vpop.f32.mrf.mxu0 }
 0x14c   : > { %v1056_v16 = vpop.f32.mrf.mxu2 }
 0x14d   : > { %v1057_v33 = vadd.f32 %v3454_v27, %v1056_v16  ;;  %v1686_v16 = vld [vmem:[#allocation8 + $0x80] sm:$0xff] }
 0x151   : > { %v4517_v39 = vpop.f32.mrf.mxu0 }
 0x154   : > { %v1059_v21 = vpop.f32.mrf.mxu2 }
 0x155   : > { %v1060_v30 = vadd.f32 %v3454_v27, %v1059_v21  ;;  %v1684_v21 = vld [vmem:[#allocation8 + $0x70] sm:$0xff] }
 0x159   : > { %v4525_v43 = vpop.f32.mrf.mxu0 }
 0x160   : > { %v1062_v24 = vpop.f32.mrf.mxu2 }
 0x161   : > { %v4534_v13 = vpop.f32.mrf.mxu0  ;;  %v1063_v28 = vadd.f32 %v3454_v27, %v1062_v24  ;;  %v1682_v24 = vld [vmem:[#allocation8 + $0x60] sm:$0xff]  ;;  %v1683_v27 = vld [vmem:[#allocation8 + $0x68] sm:$0xff] }
 0x179   : > { %v1349_v46 = vpop.f32.mrf.mxu0 }
 0x17a   : > { %v1350_v51 = vadd.f32 %v1349_v46, %v991_v49  ;;  %v1434_v49 = vld [vmem:[%s5890_s14 + $0x28] sm:$0xff] }
 0x181   : > { %v1352_v48 = vpop.f32.mrf.mxu0 }
 0x182   : > { %v1353_v50 = vadd.f32 %v1352_v48, %v994_v32  ;;  %v1432_v32 = vld [vmem:[%s5890_s14 + $0x18] sm:$0xff]  ;;  %v1433_v48 = vld [vmem:[%s5890_s14 + $0x20] sm:$0xff] }
 0x184   : > { %1402 = vmatpush.msrb.mxu1 %v1353_v50  ;;  %v1435_v50 = vld [vmem:[%s5890_s14 + $0x30] sm:$0xff] }
 0x186   : > { %1403 = vmatpush.msrb.mxu1 %v1350_v51  ;;  %v1077_v51 = vld [vmem:[%s4455_s17 + $0x60] sm:$0xff] }
 0x187   : > { %3284 = vmatmul.msk.f32.vlgmr.msrb.gmra.mxu1 %vm1363_vm3, %v1355_v52  ;;  %3261 = vmatmul.msk.f32.vlgmr.msra.gmra.mxu2 %vm1109_vm0, %v1077_v51  ;;  %v1436_v52 = vld [vmem:[%s5890_s14 + $0x38] sm:$0xff] }
 0x18f   : > { %3285 = vmatmul.msk.f32.gmra.mxu1 %vm1363_vm3, %v1356_v54  ;;  %3262 = vmatmul.msk.f32.gmra.mxu2 %vm1109_vm0, %v1078_v53  ;;  %v1437_v54 = vld [vmem:[%s5890_s14 + $0x40] sm:$0xff] }
 0x197   : > { %3286 = vmatmul.msk.f32.gmra.mxu1 %vm1363_vm3, %v1357_v56  ;;  %v1701_v56 = vld [vmem:[#allocation8 + $0xf8] sm:$0xff] }
 0x198   : > { %1821 = vmatpush.msra.mxu1 %v1701_v56  ;;  %v1446_v56 = vld [vmem:[%s5890_s14 + $0x88] sm:$0xff] }
 0x19f   : > { %3287 = vmatmul.msk.f32.gmra.mxu1 %vm1363_vm3, %v1358_v58  ;;  %v1699_v58 = vld [vmem:[#allocation8 + $0xe8] sm:$0xff] }
 0x1a0   : > { %1822 = vmatpush.msra.mxu1 %v1699_v58  ;;  %v1087_v58 = vld [vmem:[%s4455_s17 + $0xb0] sm:$0xff] }
 0x1a7   : > { %3288 = vmatmul.msk.f32.gmra.mxu1 %vm1363_vm3, %v1359_v59  ;;  %v1696_v59 = vld [vmem:[#allocation8 + $0xd0] sm:$0xff] }
 0x1a8   : > { %1710 = vmatpush.msrb.mxu2 %v1696_v59 }
 0x1af   : > { %3289 = vmatmul.msk.f32.gmra.mxu1 %vm1363_vm3, %v1360_v60  ;;  %v1697_v60 = vld [vmem:[#allocation8 + $0xd8] sm:$0xff] }
 0x1b0   : > { %1823 = vmatpush.msra.mxu1 %v1697_v60  ;;  %v1447_v60 = vld [vmem:[%s5890_s14 + $0x90] sm:$0xff] }
 0x1b2   : > { %1824 = vmatpush.msra.mxu1 %v1695_v1 }
 0x1b4   : > { %1825 = vmatpush.msra.mxu1 %v1693_v5  ;;  %v1089_v5 = vld [vmem:[%s4455_s17 + $0xc0] sm:$0xff] }
 0x1b6   : > { %1826 = vmatpush.msra.mxu1 %v1691_v7  ;;  %v1449_v7 = vld [vmem:[%s5890_s14 + $0xa0] sm:$0xff] }
 0x1b7   : > { %3290 = vmatmul.msk.f32.gmra.mxu1 %vm1363_vm3, %v1361_v61  ;;  %v1079_v61 = vld [vmem:[%s4455_s17 + $0x70] sm:$0xff] }
 0x1b8   : > { %3263 = vmatmul.msk.f32.gmra.mxu2 %vm1109_vm0, %v1079_v61  ;;  %1827 = vmatpush.msra.mxu1 %v1689_v11  ;;  %v1090_v11 = vld [vmem:[%s4455_s17 + $0xc8] sm:$0xff] }
 0x1bf   : > { %3291 = vmatmul.msk.f32.gmra.mxu1 %vm1363_vm3, %v1362_v62  ;;  %v1694_v62 = vld [vmem:[#allocation8 + $0xc0] sm:$0xff] }
 0x1c0   : > { %1711 = vmatpush.msrb.mxu2 %v1694_v62  ;;  %v1088_v62 = vld [vmem:[%s4455_s17 + $0xb8] sm:$0xff] }
 0x204   : > { %v1405_v4 = vpop.f32.mrf.mxu1 }
 0x205   : > { %v1406_v23 = vadd.f32 %v1405_v4, %v1042_v17  ;;  %v1692_v4 = vld [vmem:[#allocation8 + $0xb0] sm:$0xff]  ;;  %v1670_v17 = vld [vmem:[#allocation8] sm:$0xff] }
 0x206   : > { %1712 = vmatpush.msrb.mxu2 %v1692_v4 }
 0x20c   : > { %v1408_v6 = vpop.f32.mrf.mxu1 }
 0x20d   : > { %v1409_v20 = vadd.f32 %v1408_v6, %v1045_v45  ;;  %v1690_v6 = vld [vmem:[#allocation8 + $0xa0] sm:$0xff]  ;;  %v1673_v45 = vld [vmem:[#allocation8 + $0x18] sm:$0xff] }
 0x20e   : > { %1713 = vmatpush.msrb.mxu2 %v1690_v6 }
 0x214   : > { %v1411_v10 = vpop.f32.mrf.mxu1 }
 0x215   : > { %v1412_v46 = vadd.f32 %v1411_v10, %v1048_v42  ;;  %v1688_v10 = vld [vmem:[#allocation8 + $0x90] sm:$0xff]  ;;  %v1675_v42 = vld [vmem:[#allocation8 + $0x28] sm:$0xff] }
 0x216   : > { %1714 = vmatpush.msrb.mxu2 %v1688_v10 }
 0x218   : > { %1715 = vmatpush.msrb.mxu2 %v1686_v16  ;;  %v1450_v16 = vld [vmem:[%s5890_s14 + $0xa8] sm:$0xff] }
 0x21a   : > { %1716 = vmatpush.msrb.mxu2 %v1684_v21 }
 0x21c   : > { %v1414_v12 = vpop.f32.mrf.mxu1  ;;  %1717 = vmatpush.msrb.mxu2 %v1682_v24 }
 0x21d   : > { %v1415_v14 = vadd.f32 %v1414_v12, %v1051_v40  ;;  %v1080_v12 = vld [vmem:[%s4455_s17 + $0x78] sm:$0xff]  ;;  %v1677_v40 = vld [vmem:[#allocation8 + $0x38] sm:$0xff] }
 0x21e   : > { %3264 = vmatmul.msk.f32.gmra.mxu2 %vm1109_vm0, %v1080_v12 }
 0x224   : > { %v1417_v18 = vpop.f32.mrf.mxu1 }
 0x225   : > { %v1418_v44 = vadd.f32 %v1417_v18, %v1054_v37  ;;  %v1687_v18 = vld [vmem:[#allocation8 + $0x88] sm:$0xff]  ;;  %v1440_v37 = vld [vmem:[%s5890_s14 + $0x58] sm:$0xff] }
 0x226   : > { %1828 = vmatpush.msra.mxu1 %v1687_v18 }
 0x22c   : > { %v1420_v19 = vpop.f32.mrf.mxu1 }
 0x22d   : > { %v1421_v41 = vadd.f32 %v1420_v19, %v1057_v33  ;;  %v1439_v19 = vld [vmem:[%s5890_s14 + $0x50] sm:$0xff]  ;;  %v1678_v33 = vld [vmem:[#allocation8 + $0x40] sm:$0xff] }
 0x234   : > { %v1423_v22 = vpop.f32.mrf.mxu1 }
 0x235   : > { %v1424_v38 = vadd.f32 %v1423_v22, %v1060_v30  ;;  %v1685_v22 = vld [vmem:[#allocation8 + $0x78] sm:$0xff] }
 0x236   : > { %1829 = vmatpush.msra.mxu1 %v1685_v22  ;;  %v1681_v30 = vld [vmem:[#allocation8 + $0x58] sm:$0xff]  ;;  %v1451_v22 = vld [vmem:[%s5890_s14 + $0xb0] sm:$0xff] }
 0x238   : > { %1830 = vmatpush.msra.mxu1 %v1683_v27  ;;  %v1092_v27 = vld [vmem:[%s4455_s17 + $0xd8] sm:$0xff] }
 0x23a   : > { %1831 = vmatpush.msra.mxu1 %v1681_v30  ;;  %v1452_v30 = vld [vmem:[%s5890_s14 + $0xb8] sm:$0xff] }
 0x23c   : > { %v1426_v31 = vpop.f32.mrf.mxu1 }
 0x23d   : > { %v1427_v34 = vadd.f32 %v1426_v31, %v1063_v28  ;;  %v1680_v28 = vld [vmem:[#allocation8 + $0x50] sm:$0xff]  ;;  %v1081_v31 = vld [vmem:[%s4455_s17 + $0x80] sm:$0xff] }
 0x23e   : > { %3265 = vmatmul.msk.f32.gmra.mxu2 %vm1109_vm0, %v1081_v31 }
 0x23f   : > { %1565 = vmatpush.msra.mxu0 %v1427_v34  ;;  %v1679_v34 = vld [vmem:[#allocation8 + $0x48] sm:$0xff]  ;;  %1718 = vmatpush.msrb.mxu2 %v1680_v28 }
 0x240   : > { %1832 = vmatpush.msra.mxu1 %v1679_v34 }
 0x241   : > { %1566 = vmatpush.msra.mxu0 %v1424_v38  ;;  %1719 = vmatpush.msrb.mxu2 %v1678_v33  ;;  %v1676_v38 = vld [vmem:[#allocation8 + $0x30] sm:$0xff]  ;;  %v1093_v33 = vld [vmem:[%s4455_s17 + $0xe0] sm:$0xff] }
 0x242   : > { %1833 = vmatpush.msra.mxu1 %v1677_v40  ;;  %v1094_v40 = vld [vmem:[%s4455_s17 + $0xe8] sm:$0xff] }
 0x243   : > { %1567 = vmatpush.msra.mxu0 %v1421_v41  ;;  %v1674_v41 = vld [vmem:[#allocation8 + $0x20] sm:$0xff]  ;;  %1720 = vmatpush.msrb.mxu2 %v1676_v38 }
 0x244   : > { %1834 = vmatpush.msra.mxu1 %v1675_v42  ;;  %v1454_v42 = vld [vmem:[%s5890_s14 + $0xc8] sm:$0xff] }
 0x245   : > { %1568 = vmatpush.msra.mxu0 %v1418_v44  ;;  %1721 = vmatpush.msrb.mxu2 %v1674_v41  ;;  %v1672_v44 = vld [vmem:[#allocation8 + $0x10] sm:$0xff] }
 0x246   : > { %1835 = vmatpush.msra.mxu1 %v1673_v45  ;;  %v1095_v45 = vld [vmem:[%s4455_s17 + $0xf0] sm:$0xff] }
 0x247   : > { %1569 = vmatpush.msra.mxu0 %v1415_v14  ;;  %v1441_v14 = vld [vmem:[%s5890_s14 + $0x60] sm:$0xff]  ;;  %1722 = vmatpush.msrb.mxu2 %v1672_v44 }
 0x249   : > { %1570 = vmatpush.msra.mxu0 %v1412_v46  ;;  %v1671_v46 = vld [vmem:[#allocation8 + $0x8] sm:$0xff]  ;;  %1723 = vmatpush.msrb.mxu2 %v1670_v17 }
 0x24a   : > { %1836 = vmatpush.msra.mxu1 %v1671_v46  ;;  %v1455_v17 = vld [vmem:[%s5890_s14 + $0xd0] sm:$0xff] }
 0x24b   : > { %1571 = vmatpush.msra.mxu0 %v1409_v20  ;;  %v1082_v20 = vld [vmem:[%s4455_s17 + $0x88] sm:$0xff] }
 0x24c   : > { %3266 = vmatmul.msk.f32.vlgmr.msrb.gmra.mxu3 %vm1109_vm0, %v1082_v20  ;;  %v1259_v20 = vpop.f32.mrf.mxu2 }
 0x24d   : > { %1572 = vmatpush.msra.mxu0 %v1406_v23  ;;  %v1442_v23 = vld [vmem:[%s5890_s14 + $0x68] sm:$0xff] }
 0x24e   : > { %3292 = vmatmul.msk.f32.vlgmr.msra.gmra.mxu0 %vm1109_vm0, %v1429_v26  ;;  %v1083_v26 = vld [vmem:[%s4455_s17 + $0x90] sm:$0xff] }
 0x254   : > { %3267 = vmatmul.msk.f32.gmra.mxu3 %vm1109_vm0, %v1083_v26 }
 0x256   : > { %3293 = vmatmul.msk.f32.gmra.mxu0 %vm1109_vm0, %v1430_v47  ;;  %v1443_v47 = vld [vmem:[%s5890_s14 + $0x70] sm:$0xff] }
 0x25e   : > { %3294 = vmatmul.msk.f32.gmra.mxu0 %vm1109_vm0, %v1431_v29  ;;  %v1084_v29 = vld [vmem:[%s4455_s17 + $0x98] sm:$0xff] }
 0x25f   : > { %3268 = vmatmul.msk.f32.gmra.mxu3 %vm1109_vm0, %v1084_v29 }
 0x266   : > { %3295 = vmatmul.msk.f32.gmra.mxu0 %vm1109_vm0, %v1432_v32  ;;  %v1444_v32 = vld [vmem:[%s5890_s14 + $0x78] sm:$0xff] }
 0x26e   : > { %3296 = vmatmul.msk.f32.gmra.mxu0 %vm1109_vm0, %v1433_v48  ;;  %v1085_v48 = vld [vmem:[%s4455_s17 + $0xa0] sm:$0xff] }
 0x26f   : > { %3269 = vmatmul.msk.f32.gmra.mxu3 %vm1109_vm0, %v1085_v48 }
 0x276   : > { %3297 = vmatmul.msk.f32.gmra.mxu0 %vm1109_vm0, %v1434_v49  ;;  %v4670_v49 = vld [vmem:[%s5946_s1] ss:$0 sm:$0xff]  ;;  %s5978_s1 = sld [smem:[#allocation45_spill]] }
 0x277   : > { %v1260_v48 = vadd.f32 %v4670_v49, %v1259_v20 }
 0x27c   : > { %s3075_s27 = scalar_lea.hbm %s5978_s1, %s3333_s2  ;;  %s3818_s18 = scalar_lea.hbm %s5978_s1, 512 }
 0x27d   : > { %s3078_s16 = sshll.u32 %s3075_s27, 4  ;;  %s3079_s16 = int_to_ptr.hbm [resolvable:$true] %s3078_s16 }
 0x27e   : > { %3298 = vmatmul.msk.f32.gmra.mxu0 %vm1109_vm0, %v1435_v50  ;;  %v1224_v50 = vadd.f32 %v4670_v49, %v4495_v8  ;;  %v1227_v8 = vadd.f32 %v4670_v49, %v4497_v9  ;;  %v1230_v9 = vadd.f32 %v4670_v49, %v4499_v15  ;;  %v1233_v15 = vadd.f32 %v4670_v49, %v4503_v25  ;;  %s3812_s23 = sshra.s32 %s3079_s16, 4  ;;  %s3813_s23 = int_to_ptr.hbm [resolvable:$true] %s3812_s23 }
 0x27f   : > { %v1236_v25 = vadd.f32 %v4670_v49, %v4507_v35  ;;  %v1239_v35 = vadd.f32 %v4670_v49, %v4509_v36  ;;  %v1242_v36 = vadd.f32 %v4670_v49, %v4517_v39  ;;  %v1245_v39 = vadd.f32 %v4670_v49, %v4525_v43  ;;  %s3814_s20 = scalar_lea.hbm %s3813_s23, 256  ;;  %p3819_p7 = scmp.lt.s32.totalorder %s3813_s23, %s5978_s1 }
 0x280   : > { %v1248_v43 = vadd.f32 %v4670_v49, %v4534_v13  ;;  %v1251_v13 = vadd.f32 %v4670_v49, %v4578_v63  ;;  %p3815_p3 = scmp.ne.s32.totalorder %s3813_s23, %s3814_s20  ;;  %p3820_p8 = scmp.lt.s32.totalorder %s3818_s18, %s3814_s20 }
 0x282   : > { %p3816_p5 = pnand %p3815_p3, %p4071_p4  ;;  %p3821_p9 = por %p3820_p8, %p3819_p7 }
 0x284   : > { %p3817_p12 = pneg %p3816_p5 }
 0x286   : > { %3299 = vmatmul.msk.f32.gmra.mxu0 %vm1109_vm0, %v1436_v52  ;;  %v1445_v52 = vld [vmem:[%s5890_s14 + $0x80] sm:$0xff]  ;;  %p3822_p10 = pnand %p3821_p9, %p3817_p12 }
 0x28e   : > { %3300 = vmatmul.msk.f32.gmra.mxu0 %vm1109_vm0, %v1437_v54  ;;  %v1086_v54 = vld [vmem:[%s4455_s17 + $0xa8] sm:$0xff] }
 0x28f   : > { %3270 = vmatmul.msk.f32.gmra.mxu3 %vm1109_vm0, %v1086_v54 }
 0x296   : > { %3301 = vmatmul.msk.f32.gmra.mxu0 %vm1109_vm0, %v1438_v3  ;;  %v1448_v3 = vld [vmem:[%s5890_s14 + $0x98] sm:$0xff] }
 0x297   : > { %3271 = vmatmul.msk.f32.gmra.mxu3 %vm1109_vm0, %v1087_v58 }
 0x29e   : > { %3302 = vmatmul.msk.f32.gmra.mxu0 %vm1109_vm0, %v1439_v19  ;;  %v1091_v19 = vld [vmem:[%s4455_s17 + $0xd0] sm:$0xff] }
 0x29f   : > { %3272 = vmatmul.msk.f32.gmra.mxu3 %vm1109_vm0, %v1088_v62  ;;  %v1459_v62 = vld [vmem:[%s5890_s14 + $0xf0] sm:$0xff] }
 0x2a6   : > { %3303 = vmatmul.msk.f32.gmra.mxu0 %vm1109_vm0, %v1440_v37  ;;  %v1453_v37 = vld [vmem:[%s5890_s14 + $0xc0] sm:$0xff] }
 0x2a7   : > { %3273 = vmatmul.msk.f32.gmra.mxu3 %vm1109_vm0, %v1089_v5 }
 0x2ae   : > { %3304 = vmatmul.msk.f32.gmra.mxu0 %vm1109_vm0, %v1441_v14  ;;  %v1254_v14 = vadd.f32 %v4670_v49, %v4580_v0  ;;  %v1257_v0 = vadd.f32 %v4670_v49, %v4582_v2  ;;  %v1457_v2 = vld [vmem:[%s5890_s14 + $0xe0] sm:$0xff] }
 0x2af   : > { %3274 = vmatmul.msk.f32.gmra.mxu3 %vm1109_vm0, %v1090_v11 }
 0x2b6   : > { %3305 = vmatmul.msk.f32.gmra.mxu0 %vm1109_vm0, %v1442_v23  ;;  %v1096_v23 = vld [vmem:[%s4455_s17 + $0xf8] sm:$0xff]  ;;  %s5650_s17 = scalar_lea.vmem [#allocation11], %s3242_s28 }
 0x2b7   : > { %3275 = vmatmul.msk.f32.gmra.mxu3 %vm1109_vm0, %v1091_v19  ;;  %s3076_s26 = sshll.u32 %s5650_s17, 4  ;;  %s3077_s26 = int_to_ptr.vmem [resolvable:$true] %s3076_s26 }
 0x2be   : > { %3306 = vmatmul.msk.f32.gmra.mxu0 %vm1109_vm0, %v1443_v47  ;;  %v1456_v47 = vld [vmem:[%s5890_s14 + $0xd8] sm:$0xff] }
 0x2bf   : > { %3276 = vmatmul.msk.f32.gmra.mxu3 %vm1109_vm0, %v1092_v27 }
 0x2c6   : > { %3307 = vmatmul.msk.f32.gmra.mxu0 %vm1109_vm0, %v1444_v32  ;;  %v1262_v32 = vpop.f32.mrf.mxu2 }
 0x2c7   : > { %3277 = vmatmul.msk.f32.gmra.mxu3 %vm1109_vm0, %v1093_v33 }
 0x2cb   : > { %v1574_v51 = vpop.f32.mrf.mxu0 }
 0x2cc   : > { %v4679_v53 = vadd.f32 %v1574_v51, %v1224_v50 }
 0x2ce   : > { %3308 = vmatmul.msk.f32.gmra.mxu0 %vm1109_vm0, %v1445_v52  ;;  %1724 = vmatmul.f32.vlgmr.msrb.gmra.mxu2 %v4679_v53  ;;  %v1263_v52 = vadd.f32 %v4670_v49, %v1262_v32  ;;  %v1265_v54 = vpop.f32.mrf.mxu2 }
 0x2cf   : > { %1837 = vmatmul.f32.vlgmr.msra.gmra.mxu1 %v4679_v53  ;;  %3278 = vmatmul.msk.f32.gmra.mxu3 %vm1109_vm0, %v1094_v40 }
 0x2d3   : > { %v1577_v55 = vpop.f32.mrf.mxu0 }
 0x2d4   : > { %v4691_v57 = vadd.f32 %v1577_v55, %v1227_v8  ;;  %v1274_v8 = vpop.f32.mrf.mxu3 }
 0x2d6   : > { %3309 = vmatmul.msk.f32.gmra.mxu0 %vm1109_vm0, %v1446_v56  ;;  %1727 = vmatmul.f32.gmra.mxu2 %v4691_v57  ;;  %v1458_v56 = vld [vmem:[%s5890_s14 + $0xe8] sm:$0xff] }
 0x2d7   : > { %1840 = vmatmul.f32.gmra.mxu1 %v4691_v57  ;;  %3279 = vmatmul.msk.f32.gmra.mxu3 %vm1109_vm0, %v1095_v45 }
 0x2db   : > { %v1580_v59 = vpop.f32.mrf.mxu0 }
 0x2dc   : > { %v4703_v61 = vadd.f32 %v1580_v59, %v1230_v9  ;;  %v1266_v9 = vadd.f32 %v4670_v49, %v1265_v54  ;;  %v1268_v59 = vpop.f32.mrf.mxu2 }
 0x2de   : > { %3310 = vmatmul.msk.f32.gmra.mxu0 %vm1109_vm0, %v1447_v60  ;;  %1730 = vmatmul.f32.gmra.mxu2 %v4703_v61 }
 0x2df   : > { %1843 = vmatmul.f32.gmra.mxu1 %v4703_v61  ;;  %3280 = vmatmul.msk.f32.gmra.mxu3 %vm1109_vm0, %v1096_v23 }
 0x2e3   : > { %v1583_v1 = vpop.f32.mrf.mxu0 }
 0x2e4   : > { %v4715_v4 = vadd.f32 %v1583_v1, %v1233_v15  ;;  %v1277_v15 = vpop.f32.mrf.mxu3 }
 0x2e6   : > { %3311 = vmatmul.msk.f32.gmra.mxu0 %vm1109_vm0, %v1448_v3  ;;  %1733 = vmatmul.f32.gmra.mxu2 %v4715_v4  ;;  %v1269_v3 = vadd.f32 %v4670_v49, %v1268_v59 }
 0x2e7   : > { %1846 = vmatmul.f32.gmra.mxu1 %v4715_v4 }
 0x2eb   : > { %v1586_v6 = vpop.f32.mrf.mxu0 }
 0x2ec   : > { %v4727_v10 = vadd.f32 %v1586_v6, %v1236_v25  ;;  %v1460_v25 = vld [vmem:[%s5890_s14 + $0xf8] sm:$0xff]  ;;  %v1280_v11 = vpop.f32.mrf.mxu3 }
 0x2ee   : > { %3312 = vmatmul.msk.f32.gmra.mxu0 %vm1109_vm0, %v1449_v7  ;;  %1736 = vmatmul.f32.gmra.mxu2 %v4727_v10  ;;  %v1271_v7 = vpop.f32.mrf.mxu2 }
 0x2ef   : > { %1849 = vmatmul.f32.gmra.mxu1 %v4727_v10 }
 0x2f3   : > { %v1589_v12 = vpop.f32.mrf.mxu0 }
 0x2f4   : > { %v4739_v18 = vadd.f32 %v1589_v12, %v1239_v35  ;;  %v1272_v35 = vadd.f32 %v4670_v49, %v1271_v7 }
 0x2f6   : > { %3313 = vmatmul.msk.f32.gmra.mxu0 %vm1109_vm0, %v1450_v16  ;;  %1739 = vmatmul.f32.gmra.mxu2 %v4739_v18 }
 0x2f7   : > { %1852 = vmatmul.f32.gmra.mxu1 %v4739_v18 }
 0x2fb   : > { %v1592_v21 = vpop.f32.mrf.mxu0 }
 0x2fc   : > { %v4751_v24 = vadd.f32 %v1592_v21, %v1242_v36  ;;  %v1283_v36 = vpop.f32.mrf.mxu3  ;;  %v1275_v21 = vadd.f32 %v4670_v49, %v1274_v8 }
 0x2fe   : > { %3314 = vmatmul.msk.f32.gmra.mxu0 %vm1109_vm0, %v1451_v22  ;;  %1742 = vmatmul.f32.gmra.mxu2 %v4751_v24 }
 0x2ff   : > { %1855 = vmatmul.f32.gmra.mxu1 %v4751_v24 }
 0x303   : > { %v1595_v28 = vpop.f32.mrf.mxu0 }
 0x304   : > { %v4763_v31 = vadd.f32 %v1595_v28, %v1245_v39 }
 0x306   : > { %3315 = vmatmul.msk.f32.gmra.mxu0 %vm1109_vm0, %v1452_v30  ;;  %1745 = vmatmul.f32.gmra.mxu2 %v4763_v31  ;;  %v1278_v30 = vadd.f32 %v4670_v49, %v1277_v15 }
 0x307   : > { %1858 = vmatmul.f32.gmra.mxu1 %v4763_v31 }
 0x30b   : > { %v1598_v34 = vpop.f32.mrf.mxu0 }
 0x30c   : > { %v4775_v38 = vadd.f32 %v1598_v34, %v1248_v43 }
 0x30e   : > { %3316 = vmatmul.msk.f32.gmra.mxu0 %vm1109_vm0, %v1453_v37  ;;  %1748 = vmatmul.f32.gmra.mxu2 %v4775_v38 }
 0x30f   : > { %1861 = vmatmul.f32.gmra.mxu1 %v4775_v38 }
 0x312   : > { %v1286_v43 = vpop.f32.mrf.mxu3 }
 0x313   : > { %v1601_v41 = vpop.f32.mrf.mxu0  ;;  %v1287_v32 = vadd.f32 %v4670_v49, %v1286_v43 }
 0x314   : > { %v4787_v44 = vadd.f32 %v1601_v41, %v1251_v13  ;;  %v1281_v13 = vadd.f32 %v4670_v49, %v1280_v11 }
 0x316   : > { %5947 = vst [vmem:[#allocation19_spill] sm:$0xff] %v4787_v44  ;;  %3317 = vmatmul.msk.f32.gmra.mxu0 %vm1109_vm0, %v1454_v42  ;;  %1751 = vmatmul.f32.gmra.mxu2 %v4787_v44 }
 0x317   : > { %1864 = vmatmul.f32.gmra.mxu1 %v4787_v44 }
 0x31a   : > { %v1289_v45 = vpop.f32.mrf.mxu3 }
 0x31b   : > { %v1604_v63 = vpop.f32.mrf.mxu0  ;;  %v1290_v8 = vadd.f32 %v4670_v49, %v1289_v45 }
 0x31c   : > { %v4799_v46 = vadd.f32 %v1604_v63, %v1254_v14 }
 0x31e   : > { %5948 = vst [vmem:[#allocation20_spill] sm:$0xff] %v4799_v46  ;;  %3318 = vmatmul.msk.f32.gmra.mxu0 %vm1109_vm0, %v1455_v17  ;;  %1754 = vmatmul.f32.gmra.mxu2 %v4799_v46  ;;  %v1284_v17 = vadd.f32 %v4670_v49, %v1283_v36 }
 0x31f   : > { %1867 = vmatmul.f32.gmra.mxu1 %v4799_v46 }
 0x323   : > { %v1607_v26 = vpop.f32.mrf.mxu0 }
 0x324   : > { %v4811_v29 = vadd.f32 %v1607_v26, %v1257_v0 }
 0x326   : > { %5949 = vst [vmem:[#allocation21_spill] sm:$0xff] %v4811_v29  ;;  %3319 = vmatmul.msk.f32.gmra.mxu0 %vm1109_vm0, %v1456_v47  ;;  %1757 = vmatmul.f32.gmra.mxu2 %v4811_v29  ;;  %v1292_v47 = vpop.f32.mrf.mxu3 }
 0x327   : > { %1870 = vmatmul.f32.gmra.mxu1 %v4811_v29  ;;  %v1293_v15 = vadd.f32 %v4670_v49, %v1292_v47 }
 0x32b   : > { %v1610_v50 = vpop.f32.mrf.mxu0 }
 0x32c   : > { %v4820_v51 = vadd.f32 %v1610_v50, %v1260_v48 }
 0x32e   : > { %5950 = vst [vmem:[#allocation22_spill] sm:$0xff] %v4820_v51  ;;  %3320 = vmatmul.msk.f32.gmra.mxu0 %vm1109_vm0, %v1457_v2  ;;  %1760 = vmatmul.f32.gmra.mxu2 %v4820_v51  ;;  %v1295_v54 = vpop.f32.mrf.mxu3 }
 0x32f   : > { %1873 = vmatmul.f32.gmra.mxu1 %v4820_v51 }
 0x333   : > { %v1613_v55 = vpop.f32.mrf.mxu0 }
 0x334   : > { %v4829_v58 = vadd.f32 %v1613_v55, %v1263_v52 }
 0x336   : > { %5951 = vst [vmem:[#allocation23_spill] sm:$0xff] %v4829_v58  ;;  %3321 = vmatmul.msk.f32.gmra.mxu0 %vm1109_vm0, %v1458_v56  ;;  %1763 = vmatmul.f32.gmra.mxu2 %v4829_v58 }
 0x337   : > { %1876 = vmatmul.f32.gmra.mxu1 %v4829_v58 }
 0x33b   : > { %v1616_v60 = vpop.f32.mrf.mxu0 }
 0x33c   : > { %v4838_v1 = vadd.f32 %v1616_v60, %v1266_v9  ;;  %v4929_v60 = vld [vmem:[%s5954_s24] sm:$0x3] }
 0x33e   : > { %5952 = vst [vmem:[#allocation24_spill] sm:$0xff] %v4838_v1  ;;  %3322 = vmatmul.msk.f32.gmra.mxu0 %vm1109_vm0, %v1459_v62  ;;  %1766 = vmatmul.f32.gmra.mxu2 %v4838_v1  ;;  %v4934_v62 = vperm.slane %v4929_v60, 0 }
 0x33f   : > { %1879 = vmatmul.f32.gmra.mxu1 %v4838_v1 }
 0x343   : > { %v1619_v5 = vpop.f32.mrf.mxu0 }
 0x344   : > { %v4847_v6 = vadd.f32 %v1619_v5, %v1269_v3  ;;  %v1298_v5 = vpop.f32.mrf.mxu3 }
 0x346   : > { %5953 = vst [vmem:[#allocation25_spill] sm:$0xff] %v4847_v6  ;;  %3323 = vmatmul.msk.f32.gmra.mxu0 %vm1109_vm0, %v1460_v25  ;;  %1769 = vmatmul.f32.gmra.mxu2 %v4847_v6 }
 0x347   : > { %1882 = vmatmul.f32.gmra.mxu1 %v4847_v6  ;;  %1934 = vmatpush.xpose.msra.mxu3 %v4847_v6 }
 0x34b   : > { %1935 = vmatpush.xpose.msra.mxu3 %v4838_v1  ;;  %v1622_v12 = vpop.f32.mrf.mxu0 }
 0x34c   : > { %v4855_v16 = vadd.f32 %v1622_v12, %v1272_v35  ;;  %v4857_v19 = vpop.f32.mrf.mxu1  ;;  %v1296_v12 = vadd.f32 %v4670_v49, %v1295_v54 }
 0x34e   : > { %1772 = vmatmul.f32.gmra.mxu2 %v4855_v16 }
 0x34f   : > { %1885 = vmatmul.f32.gmra.mxu1 %v4855_v16  ;;  %1936 = vmatpush.xpose.msra.mxu3 %v4829_v58 }
 0x351   : > { %v4863_v22 = vpop.f32.mrf.mxu2 }
 0x352   : > { %v4942_v7 = vadd.f32 %v4863_v22, %v4934_v62 }
 0x353   : > { %1937 = vmatpush.xpose.msra.mxu3 %v4820_v51  ;;  %v1625_v27 = vpop.f32.mrf.mxu0 }
 0x354   : > { %v4866_v39 = vadd.f32 %v1625_v27, %v1275_v21  ;;  %v4868_v28 = vpop.f32.mrf.mxu1  ;;  %v1301_v27 = vpop.f32.mrf.mxu3 }
 0x355   : > { %v1302_v47 = vadd.f32 %v4670_v49, %v1301_v27 }
 0x356   : > { %1775 = vmatmul.f32.gmra.mxu2 %v4866_v39 }
 0x357   : > { %1888 = vmatmul.f32.gmra.mxu1 %v4866_v39  ;;  %1938 = vmatpush.xpose.msra.mxu3 %v4811_v29 }
 0x359   : > { %v4874_v33 = vpop.f32.mrf.mxu2 }
 0x35a   : > { %v4958_v22 = vadd.f32 %v4874_v33, %v4934_v62 }
 0x35b   : > { %1939 = vmatpush.xpose.msra.mxu3 %v4799_v46  ;;  %v1628_v34 = vpop.f32.mrf.mxu0 }
 0x35c   : > { %v4877_v37 = vadd.f32 %v1628_v34, %v1278_v30  ;;  %v4879_v40 = vpop.f32.mrf.mxu1  ;;  %v1299_v34 = vadd.f32 %v4670_v49, %v1298_v5  ;;  %v1304_v33 = vpop.f32.mrf.mxu3 }
 0x35e   : > { %1778 = vmatmul.f32.gmra.mxu2 %v4877_v37 }
 0x35f   : > { %1891 = vmatmul.f32.gmra.mxu1 %v4877_v37  ;;  %1940 = vmatpush.xpose.msra.mxu3 %v4787_v44 }
 0x361   : > { %v4885_v41 = vpop.f32.mrf.mxu2 }
 0x363   : > { %1941 = vmatpush.xpose.msra.mxu3 %v4775_v38  ;;  %v1631_v42 = vpop.f32.mrf.mxu0 }
 0x364   : > { %v4888_v14 = vadd.f32 %v1631_v42, %v1281_v13  ;;  %v4890_v63 = vpop.f32.mrf.mxu1 }
 0x366   : > { %1781 = vmatmul.f32.gmra.mxu2 %v4888_v14 }
 0x367   : > { %1894 = vmatmul.f32.gmra.mxu1 %v4888_v14  ;;  %1942 = vmatpush.xpose.msra.mxu3 %v4763_v31 }
 0x369   : > { %v4896_v20 = vpop.f32.mrf.mxu2 }
 0x36b   : > { %1943 = vmatpush.xpose.msra.mxu3 %v4751_v24  ;;  %v1634_v23 = vpop.f32.mrf.mxu0 }
 0x36c   : > { %v4899_v0 = vadd.f32 %v1634_v23, %v1284_v17  ;;  %v4901_v26 = vpop.f32.mrf.mxu1  ;;  %v4970_v23 = vadd.f32 %v4885_v41, %v4934_v62 }
 0x36e   : > { %1784 = vmatmul.f32.gmra.mxu2 %v4899_v0 }
 0x36f   : > { %1897 = vmatmul.f32.gmra.mxu1 %v4899_v0  ;;  %1944 = vmatpush.xpose.msra.mxu3 %v4739_v18 }
 0x371   : > { %v4907_v48 = vpop.f32.mrf.mxu2 }
 0x373   : > { %1945 = vmatpush.xpose.msra.mxu3 %v4727_v10  ;;  %v1637_v50 = vpop.f32.mrf.mxu0 }
 0x374   : > { %v4910_v2 = vadd.f32 %v1637_v50, %v1287_v32  ;;  %v4912_v52 = vpop.f32.mrf.mxu1 }
 0x376   : > { %1787 = vmatmul.f32.gmra.mxu2 %v4910_v2 }
 0x377   : > { %1900 = vmatmul.f32.gmra.mxu1 %v4910_v2  ;;  %1946 = vmatpush.xpose.msra.mxu3 %v4715_v4 }
 0x379   : > { %v4918_v55 = vpop.f32.mrf.mxu2 }
 0x37b   : > { %1947 = vmatpush.xpose.msra.mxu3 %v4703_v61  ;;  %v1640_v56 = vpop.f32.mrf.mxu0 }
 0x37c   : > { %v4921_v9 = vadd.f32 %v1640_v56, %v1290_v8  ;;  %v4923_v59 = vpop.f32.mrf.mxu1  ;;  %v4982_v8 = vadd.f32 %v4896_v20, %v4934_v62  ;;  %v1307_v56 = vpop.f32.mrf.mxu3 }
 0x37d   : > { %v1308_v27 = vadd.f32 %v4670_v49, %v1307_v56 }
 0x37e   : > { %1790 = vmatmul.f32.gmra.mxu2 %v4921_v9 }
 0x37f   : > { %1903 = vmatmul.f32.gmra.mxu1 %v4921_v9  ;;  %1948 = vmatpush.xpose.msra.mxu3 %v4691_v57 }
 0x381   : > { %v4937_v3 = vpop.f32.mrf.mxu2 }
 0x383   : > { %1949 = vmatpush.xpose.msra.mxu3 %v4679_v53  ;;  %v1643_v25 = vpop.f32.mrf.mxu0 }
 0x384   : > { %v4944_v11 = vadd.f32 %v1643_v25, %v1293_v15  ;;  %v4946_v35 = vpop.f32.mrf.mxu1  ;;  %v1305_v15 = vadd.f32 %v4670_v49, %v1304_v33 }
 0x386   : > { %1950 = vmatmul.f32.vlgmr.msra.gmra.mxu3 %v4942_v7  ;;  %1793 = vmatmul.f32.gmra.mxu2 %v4944_v11 }
 0x387   : > { %1906 = vmatmul.f32.gmra.mxu1 %v4944_v11 }
 0x389   : > { %v1746_v36 = vpop.f32.mrf.mxu2 }
 0x38b   : > { %v1646_v21 = vpop.f32.mrf.mxu0 }
 0x38c   : > { %v4952_v30 = vadd.f32 %v1646_v21, %v1296_v12  ;;  %v4954_v43 = vpop.f32.mrf.mxu1  ;;  %v4992_v21 = vadd.f32 %v4907_v48, %v4934_v62 }
 0x38e   : > { %5955 = vst [vmem:[#allocation26_spill] sm:$0xff] %v4952_v30  ;;  %1953 = vmatmul.f32.gmra.mxu3 %v4958_v22  ;;  %1796 = vmatmul.f32.gmra.mxu2 %v4952_v30 }
 0x38f   : > { %1909 = vmatmul.f32.gmra.mxu1 %v4952_v30 }
 0x391   : > { %v1749_v13 = vpop.f32.mrf.mxu2 }
 0x393   : > { %v1649_v42 = vpop.f32.mrf.mxu0 }
 0x394   : > { %v4964_v45 = vadd.f32 %v1649_v42, %v1299_v34  ;;  %v4966_v17 = vpop.f32.mrf.mxu1  ;;  %v1310_v34 = vpop.f32.mrf.mxu3 }
 0x395   : > { %v1311_v48 = vadd.f32 %v4670_v49, %v1310_v34 }
 0x396   : > { %5956 = vst [vmem:[#allocation27_spill] sm:$0xff] %v4964_v45  ;;  %1956 = vmatmul.f32.gmra.mxu3 %v4970_v23  ;;  %1799 = vmatmul.f32.gmra.mxu2 %v4964_v45 }
 0x397   : > { %1912 = vmatmul.f32.gmra.mxu1 %v4964_v45 }
 0x399   : > { %v1752_v41 = vpop.f32.mrf.mxu2 }
 0x39b   : > { %v1652_v32 = vpop.f32.mrf.mxu0 }
 0x39c   : > { %v4976_v50 = vadd.f32 %v1652_v32, %v1302_v47  ;;  %v4978_v54 = vpop.f32.mrf.mxu1  ;;  %v5004_v32 = vadd.f32 %v4918_v55, %v4934_v62 }
 0x39e   : > { %5957 = vst [vmem:[#allocation28_spill] sm:$0xff] %v4976_v50  ;;  %1959 = vmatmul.f32.gmra.mxu3 %v4982_v8  ;;  %1802 = vmatmul.f32.gmra.mxu2 %v4976_v50 }
 0x39f   : > { %1915 = vmatmul.f32.gmra.mxu1 %v4976_v50 }
 0x3a1   : > { %v4996_v20 = vpop.f32.mrf.mxu2 }
 0x3a3   : > { %v1655_v5 = vpop.f32.mrf.mxu0 }
 0x3a4   : > { %v4988_v25 = vadd.f32 %v1655_v5, %v1305_v15  ;;  %v1871_v12 = vpop.f32.mrf.mxu1  ;;  %v1313_v5 = vpop.f32.mrf.mxu3 }
 0x3a5   : > { %v1314_v55 = vadd.f32 %v4670_v49, %v1313_v5  ;;  %v5034_v5 = vperm.slane %v4929_v60, 1 }
 0x3a6   : > { %5958 = vst [vmem:[#allocation29_spill] sm:$0xff] %v4988_v25  ;;  %1962 = vmatmul.f32.gmra.mxu3 %v4992_v21  ;;  %1805 = vmatmul.f32.gmra.mxu2 %v4988_v25 }
 0x3a7   : > { %1918 = vmatmul.f32.gmra.mxu1 %v4988_v25 }
 0x3a9   : > { %v5010_v15 = vpop.f32.mrf.mxu2 }
 0x3ab   : > { %v1658_v42 = vpop.f32.mrf.mxu0 }
 0x3ac   : > { %v5000_v33 = vadd.f32 %v1658_v42, %v1308_v27  ;;  %v1874_v47 = vpop.f32.mrf.mxu1  ;;  %v5016_v42 = vadd.f32 %v4937_v3, %v4934_v62  ;;  %v1316_v51 = vpop.f32.mrf.mxu3 }
 0x3ad   : > { %v1317_v3 = vadd.f32 %v4670_v49, %v1316_v51  ;;  %v1875_v60 = vadd.f32 %v1874_v47, %v5034_v5  ;;  %v1863_v47 = vadd.f32 %v4954_v43, %v5034_v5 }
 0x3ae   : > { %5959 = vst [vmem:[#allocation30_spill] sm:$0xff] %v5000_v33  ;;  %1965 = vmatmul.f32.gmra.mxu3 %v5004_v32  ;;  %1808 = vmatmul.f32.gmra.mxu2 %v5000_v33 }
 0x3af   : > { %1921 = vmatmul.f32.gmra.mxu1 %v5000_v33 }
 0x3b1   : > { %v5022_v34 = vpop.f32.mrf.mxu2 }
 0x3b3   : > { %v1661_v56 = vpop.f32.mrf.mxu0 }
 0x3b4   : > { %v5012_v6 = vadd.f32 %v1661_v56, %v1311_v48  ;;  %v1877_v27 = vpop.f32.mrf.mxu1  ;;  %v5027_v56 = vadd.f32 %v1746_v36, %v4934_v62 }
 0x3b5   : > { %v1878_v51 = vadd.f32 %v1877_v27, %v5034_v5 }
 0x3b6   : > { %5960 = vst [vmem:[#allocation31_spill] sm:$0xff] %v5012_v6  ;;  %1968 = vmatmul.f32.gmra.mxu3 %v5016_v42  ;;  %1811 = vmatmul.f32.gmra.mxu2 %v5012_v6 }
 0x3b7   : > { %1924 = vmatmul.f32.gmra.mxu1 %v5012_v6 }
 0x3b9   : > { %v1764_v46 = vpop.f32.mrf.mxu2 }
 0x3bb   : > { %v1664_v1 = vpop.f32.mrf.mxu0 }
 0x3bc   : > { %v5024_v58 = vadd.f32 %v1664_v1, %v1314_v55  ;;  %v1880_v48 = vpop.f32.mrf.mxu1  ;;  %v5037_v1 = vadd.f32 %v1749_v13, %v4934_v62 }
 0x3bd   : > { %v1881_v49 = vadd.f32 %v1880_v48, %v5034_v5 }
 0x3be   : > { %5961 = vst [vmem:[#allocation32_spill] sm:$0xff] %v5024_v58  ;;  %1971 = vmatmul.f32.gmra.mxu3 %v5027_v56  ;;  %1814 = vmatmul.f32.gmra.mxu2 %v5024_v58 }
 0x3bf   : > { %1927 = vmatmul.f32.gmra.mxu1 %v5024_v58 }
 0x3c1   : > { %v1767_v48 = vpop.f32.mrf.mxu2 }
 0x3c3   : > { %v1667_v29 = vpop.f32.mrf.mxu0 }
 0x3c4   : > { %v5039_v55 = vadd.f32 %v1667_v29, %v1317_v3  ;;  %v1883_v36 = vpop.f32.mrf.mxu1  ;;  %v5050_v29 = vadd.f32 %v1752_v41, %v4934_v62  ;;  %v1872_v3 = vadd.f32 %v1871_v12, %v5034_v5  ;;  %v1866_v41 = vadd.f32 %v4966_v17, %v5034_v5 }
 0x3c5   : > { %v1884_v44 = vadd.f32 %v1883_v36, %v5034_v5  ;;  %v5067_v12 = vadd.f32 %v4996_v20, %v4934_v62  ;;  %v1857_v17 = vadd.f32 %v4923_v59, %v5034_v5  ;;  %v1854_v20 = vadd.f32 %v4912_v52, %v5034_v5 }
 0x3c6   : > { %5962 = vst [vmem:[#allocation33_spill] sm:$0xff] %v5039_v55  ;;  %1974 = vmatmul.f32.gmra.mxu3 %v5037_v1  ;;  %1817 = vmatmul.f32.gmra.mxu2 %v5039_v55  ;;  %v1851_v36 = vadd.f32 %v4901_v26, %v5034_v5  ;;  %v1848_v59 = vadd.f32 %v4890_v63, %v5034_v5 }
 0x3c7   : > { %1930 = vmatmul.f32.gmra.mxu1 %v5039_v55  ;;  %2047 = vmatpush.xpose.msrb.mxu0 %v5039_v55  ;;  %v1845_v52 = vadd.f32 %v4879_v40, %v5034_v5  ;;  %v1842_v26 = vadd.f32 %v4868_v28, %v5034_v5  ;;  %v5101_v63 = vadd.f32 %v5022_v34, %v4934_v62 }
 0x3c8   : > { %2640 = vmatpush.msra.mxu2 %v1884_v44  ;;  %v1869_v44 = vadd.f32 %v4978_v54, %v5034_v5  ;;  %v1860_v54 = vadd.f32 %v4946_v35, %v5034_v5  ;;  %v5084_v35 = vadd.f32 %v5010_v15, %v4934_v62  ;;  %v5109_v28 = vadd.f32 %v1764_v46, %v4934_v62 }
 0x3c9   : > { %v1770_v43 = vpop.f32.mrf.mxu2  ;;  %v5117_v34 = vadd.f32 %v1767_v48, %v4934_v62 }
 0x3ca   : > { %2641 = vmatpush.msra.mxu2 %v1881_v49  ;;  %v5125_v46 = vadd.f32 %v1770_v43, %v4934_v62 }
 0x3cb   : > { %2048 = vmatpush.xpose.msrb.mxu0 %v5024_v58 }
 0x3cc   : > { %2642 = vmatpush.msra.mxu2 %v1878_v51  ;;  %v5053_v13 = vpop.f32.mrf.mxu1  ;;  %v1839_v51 = vadd.f32 %v4857_v19, %v5034_v5 }
 0x3ce   : > { %2643 = vmatpush.msra.mxu2 %v1875_v60  ;;  %1977 = vmatmul.f32.gmra.mxu3 %v5050_v29 }
 0x3cf   : > { %2049 = vmatpush.xpose.msrb.mxu0 %v5012_v6 }
 0x3d0   : > { %2644 = vmatpush.msra.mxu2 %v1872_v3 }
 0x3d1   : > { %v1773_v15 = vpop.f32.mrf.mxu2 }
 0x3d2   : > { %2645 = vmatpush.msra.mxu2 %v1869_v44 }
 0x3d3   : > { %2050 = vmatpush.xpose.msrb.mxu0 %v5000_v33 }
 0x3d4   : > { %2646 = vmatpush.msra.mxu2 %v1866_v41  ;;  %v5069_v27 = vpop.f32.mrf.mxu1 }
 0x3d6   : > { %2647 = vmatpush.msra.mxu2 %v1863_v47  ;;  %1980 = vmatmul.f32.gmra.mxu3 %v5067_v12  ;;  %v5133_v47 = vadd.f32 %v1773_v15, %v4934_v62 }
 0x3d7   : > { %2051 = vmatpush.xpose.msrb.mxu0 %v4988_v25 }
 0x3d8   : > { %2648 = vmatpush.msra.mxu2 %v1860_v54 }
 0x3d9   : > { %v1776_v19 = vpop.f32.mrf.mxu2 }
 0x3da   : > { %2649 = vmatpush.msra.mxu2 %v1857_v17  ;;  %v5140_v43 = vadd.f32 %v1776_v19, %v4934_v62 }
 0x3db   : > { %2052 = vmatpush.xpose.msrb.mxu0 %v4976_v50 }
 0x3dc   : > { %2650 = vmatpush.msra.mxu2 %v1854_v20  ;;  %v5086_v49 = vpop.f32.mrf.mxu1 }
 0x3de   : > { %2651 = vmatpush.msra.mxu2 %v1851_v36  ;;  %1983 = vmatmul.f32.gmra.mxu3 %v5084_v35 }
 0x3df   : > { %2053 = vmatpush.xpose.msrb.mxu0 %v4964_v45 }
 0x3e0   : > { %2652 = vmatpush.msra.mxu2 %v1848_v59 }
 0x3e1   : > { %v1779_v44 = vpop.f32.mrf.mxu2 }
 0x3e2   : > { %2653 = vmatpush.msra.mxu2 %v1845_v52  ;;  %v5145_v36 = vadd.f32 %v1779_v44, %v4934_v62 }
 0x3e3   : > { %2054 = vmatpush.xpose.msrb.mxu0 %v4952_v30 }
 0x3e4   : > { %2654 = vmatpush.msra.mxu2 %v1842_v26  ;;  %v5103_v60 = vpop.f32.mrf.mxu1 }
 0x3e6   : > { %2655 = vmatpush.msra.mxu2 %v1839_v51  ;;  %1986 = vmatmul.f32.gmra.mxu3 %v5101_v63 }
 0x3e7   : > { %2055 = vmatpush.xpose.msrb.mxu0 %v4944_v11 }
 0x3e9   : > { %v1782_v48 = vpop.f32.mrf.mxu2 }
 0x3eb   : > { %2056 = vmatpush.xpose.msrb.mxu0 %v4921_v9 }
 0x3ec   : > { %v5111_v40 = vpop.f32.mrf.mxu1 }
 0x3ee   : > { %1989 = vmatmul.f32.gmra.mxu3 %v5109_v28 }
 0x3ef   : > { %2057 = vmatpush.xpose.msrb.mxu0 %v4910_v2 }
 0x3f1   : > { %v1785_v17 = vpop.f32.mrf.mxu2 }
 0x3f3   : > { %2058 = vmatpush.xpose.msrb.mxu0 %v4899_v0 }
 0x3f4   : > { %v5119_v3 = vpop.f32.mrf.mxu1 }
 0x3f6   : > { %1992 = vmatmul.f32.gmra.mxu3 %v5117_v34 }
 0x3f7   : > { %2059 = vmatpush.xpose.msrb.mxu0 %v4888_v14 }
 0x3f9   : > { %v1788_v52 = vpop.f32.mrf.mxu2 }
 0x3fb   : > { %2060 = vmatpush.xpose.msrb.mxu0 %v4877_v37 }
 0x3fc   : > { %v5127_v41 = vpop.f32.mrf.mxu1 }
 0x3fe   : > { %1995 = vmatmul.f32.gmra.mxu3 %v5125_v46 }
 0x3ff   : > { %2061 = vmatpush.xpose.msrb.mxu0 %v4866_v39 }
 0x401   : > { %v1791_v15 = vpop.f32.mrf.mxu2 }
 0x403   : > { %2062 = vmatpush.xpose.msrb.mxu0 %v4855_v16 }
 0x404   : > { %v5135_v54 = vpop.f32.mrf.mxu1 }
 0x406   : > { %1998 = vmatmul.f32.gmra.mxu3 %v5133_v47  ;;  %2063 = vmatmul.f32.vlgmr.msrb.gmra.mxu0 %v4942_v7  ;;  %v5150_v7 = vadd.f32 %v1782_v48, %v4934_v62 }
 0x409   : > { %v1794_v19 = vpop.f32.mrf.mxu2  ;;  %v5169_v55 = vpop.f32.mrf.mxu3 }
 0x40c   : > { %v1910_v20 = vpop.f32.mrf.mxu1 }
 0x40e   : > { %2001 = vmatmul.f32.gmra.mxu3 %v5140_v43  ;;  %2066 = vmatmul.f32.gmra.mxu0 %v4958_v22  ;;  %v5155_v22 = vadd.f32 %v1785_v17, %v4934_v62 }
 0x411   : > { %v1797_v48 = vpop.f32.mrf.mxu2 }
 0x414   : > { %v1913_v59 = vpop.f32.mrf.mxu1 }
 0x416   : > { %2004 = vmatmul.f32.gmra.mxu3 %v5145_v36  ;;  %2069 = vmatmul.f32.gmra.mxu0 %v4970_v23  ;;  %v5160_v23 = vadd.f32 %v1788_v52, %v4934_v62 }
 0x419   : > { %v1800_v58 = vpop.f32.mrf.mxu2 }
 0x41c   : > { %v1916_v26 = vpop.f32.mrf.mxu1 }
 0x41e   : > { %2007 = vmatmul.f32.gmra.mxu3 %v5150_v7  ;;  %2072 = vmatmul.f32.gmra.mxu0 %v4982_v8  ;;  %v5165_v8 = vadd.f32 %v1791_v15, %v4934_v62  ;;  %v5179_v15 = vadd.f32 %v1797_v48, %v4934_v62  ;;  %v5190_v48 = vadd.f32 %v1800_v58, %v4934_v62 }
 0x424   : > { %v1919_v51 = vpop.f32.mrf.mxu1 }
 0x426   : > { %2010 = vmatmul.f32.gmra.mxu3 %v5155_v22  ;;  %2075 = vmatmul.f32.gmra.mxu0 %v4992_v21  ;;  %v5172_v21 = vadd.f32 %v1794_v19, %v4934_v62 }
 0x42c   : > { %v1922_v44 = vpop.f32.mrf.mxu1 }
 0x42e   : > { %2013 = vmatmul.f32.gmra.mxu3 %v5160_v23  ;;  %2078 = vmatmul.f32.gmra.mxu0 %v5004_v32  ;;  %v5176_v32 = vpop.f32.mrf.mxu3 }
 0x434   : > { %v1925_v17 = vpop.f32.mrf.mxu1 }
 0x435   : > { %v1926_v25 = vadd.f32 %v1925_v17, %v5034_v5 }
 0x436   : > { %2016 = vmatmul.f32.gmra.mxu3 %v5165_v8  ;;  %2081 = vmatmul.f32.gmra.mxu0 %v5016_v42  ;;  %v1803_v42 = vpop.f32.mrf.mxu2  ;;  %v5187_v50 = vpop.f32.mrf.mxu3 }
 0x437   : > { %v5199_v58 = vadd.f32 %v1803_v42, %v4934_v62 }
 0x43c   : > { %v1928_v52 = vpop.f32.mrf.mxu1 }
 0x43d   : > { %v1929_v19 = vadd.f32 %v1928_v52, %v5034_v5  ;;  %v1896_v52 = vadd.f32 %v5103_v60, %v5034_v5 }
 0x43e   : > { %2019 = vmatmul.f32.gmra.mxu3 %v5172_v21  ;;  %2084 = vmatmul.f32.gmra.mxu0 %v5027_v56  ;;  %v1923_v56 = vadd.f32 %v1922_v44, %v5034_v5  ;;  %v1806_v17 = vpop.f32.mrf.mxu2  ;;  %v5203_v44 = vpop.f32.mrf.mxu3 }
 0x444   : > { %v1931_v6 = vpop.f32.mrf.mxu1 }
 0x445   : > { %v1932_v33 = vadd.f32 %v1931_v6, %v5034_v5  ;;  %v1920_v6 = vadd.f32 %v1919_v51, %v5034_v5  ;;  %v1908_v51 = vadd.f32 %v5135_v54, %v5034_v5  ;;  %v5214_v54 = vadd.f32 %v1806_v17, %v4934_v62 }
 0x446   : > { %2022 = vmatmul.f32.gmra.mxu3 %v5179_v15  ;;  %2087 = vmatmul.f32.gmra.mxu0 %v5037_v1  ;;  %v1914_v1 = vadd.f32 %v1913_v59, %v5034_v5  ;;  %v1899_v59 = vadd.f32 %v5111_v40, %v5034_v5  ;;  %v1890_v40 = vadd.f32 %v5069_v27, %v5034_v5 }
 0x447   : > { %2753 = vmatpush.msrb.mxu1 %v1932_v33  ;;  %v1917_v33 = vadd.f32 %v1916_v26, %v5034_v5  ;;  %v1809_v26 = vpop.f32.mrf.mxu2 }
 0x448   : > { %v1810_v60 = vadd.f32 %v1809_v26, %v4934_v62 }
 0x449   : > { %2754 = vmatpush.msrb.mxu1 %v1929_v19 }
 0x44b   : > { %2755 = vmatpush.msrb.mxu1 %v1926_v25  ;;  %v1911_v25 = vadd.f32 %v1910_v20, %v5034_v5  ;;  %v1902_v20 = vadd.f32 %v5119_v3, %v5034_v5  ;;  %v5222_v3 = vpop.f32.mrf.mxu3 }
 0x44d   : > { %2756 = vmatpush.msrb.mxu1 %v1923_v56 }
 0x44e   : > { %2025 = vmatmul.f32.gmra.mxu3 %v5190_v48  ;;  %2090 = vmatmul.f32.gmra.mxu0 %v5050_v29  ;;  %v1905_v29 = vadd.f32 %v5127_v41, %v5034_v5  ;;  %v1887_v41 = vadd.f32 %v5053_v13, %v5034_v5 }
 0x44f   : > { %2757 = vmatpush.msrb.mxu1 %v1920_v6  ;;  %v1812_v42 = vpop.f32.mrf.mxu2 }
 0x451   : > { %2758 = vmatpush.msrb.mxu1 %v1917_v33 }
 0x453   : > { %2759 = vmatpush.msrb.mxu1 %v1914_v1 }
 0x455   : > { %2760 = vmatpush.msrb.mxu1 %v1911_v25 }
 0x456   : > { %2028 = vmatmul.f32.gmra.mxu3 %v5199_v58  ;;  %2093 = vmatmul.f32.gmra.mxu0 %v5067_v12  ;;  %v1893_v12 = vadd.f32 %v5086_v49, %v5034_v5  ;;  %v1813_v49 = vadd.f32 %v1812_v42, %v4934_v62 }
 0x457   : > { %2761 = vmatpush.msrb.mxu1 %v1908_v51  ;;  %v1815_v27 = vpop.f32.mrf.mxu2 }
 0x458   : > { %v1816_v5 = vadd.f32 %v1815_v27, %v4934_v62 }
 0x459   : > { %2762 = vmatpush.msrb.mxu1 %v1905_v29 }
 0x45b   : > { %2763 = vmatpush.msrb.mxu1 %v1902_v20 }
 0x45d   : > { %2764 = vmatpush.msrb.mxu1 %v1899_v59 }
 0x45e   : > { %2031 = vmatmul.f32.gmra.mxu3 %v5214_v54  ;;  %2096 = vmatmul.f32.gmra.mxu0 %v5084_v35  ;;  %v5230_v35 = vpop.f32.mrf.mxu3 }
 0x45f   : > { %2765 = vmatpush.msrb.mxu1 %v1896_v52  ;;  %v1818_v13 = vpop.f32.mrf.mxu2 }
 0x460   : > { %v1819_v56 = vadd.f32 %v1818_v13, %v4934_v62 }
 0x461   : > { %2766 = vmatpush.msrb.mxu1 %v1893_v12 }
 0x463   : > { %2767 = vmatpush.msrb.mxu1 %v1890_v40 }
 0x465   : > { %2768 = vmatpush.msrb.mxu1 %v1887_v41 }
 0x466   : > { %2034 = vmatmul.f32.gmra.mxu3 %v1810_v60  ;;  %2099 = vmatmul.f32.gmra.mxu0 %v5101_v63  ;;  %v5234_v19 = vpop.f32.mrf.mxu3 }
 0x46e   : > { %2037 = vmatmul.f32.gmra.mxu3 %v1813_v49  ;;  %2102 = vmatmul.f32.gmra.mxu0 %v5109_v28  ;;  %v5239_v6 = vpop.f32.mrf.mxu3 }
 0x476   : > { %2040 = vmatmul.f32.gmra.mxu3 %v1816_v5  ;;  %2105 = vmatmul.f32.gmra.mxu0 %v5117_v34 }
 0x47e   : > { %2043 = vmatmul.f32.gmra.mxu3 %v1819_v56  ;;  %2108 = vmatmul.f32.gmra.mxu0 %v5125_v46 }
 0x483   : > { %v2064_v63 = vpop.f32.mrf.mxu0 }
 0x484   : > { %v2160_v33 = vmax.f32 %v5169_v55, %v2064_v63 }
 0x486   : > { %2111 = vmatmul.f32.gmra.mxu0 %v5133_v47  ;;  %2161 = vmax.xlane.f32.xlu0 %v2160_v33 }
 0x48b   : > { %v2067_v28 = vpop.f32.mrf.mxu0 }
 0x48c   : > { %v2163_v1 = vmax.f32 %v5176_v32, %v2067_v28 }
 0x48e   : > { %2114 = vmatmul.f32.gmra.mxu0 %v5140_v43  ;;  %2164 = vmax.xlane.f32.xlu0 %v2163_v1 }
 0x493   : > { %v2070_v34 = vpop.f32.mrf.mxu0 }
 0x494   : > { %v2166_v62 = vmax.f32 %v5187_v50, %v2070_v34 }
 0x496   : > { %2117 = vmatmul.f32.gmra.mxu0 %v5145_v36  ;;  %2167 = vmax.xlane.f32.xlu1 %v2166_v62 }
 0x49b   : > { %v5248_v17 = vpop.f32.mrf.mxu0 }
 0x49c   : > { %v2169_v46 = vmax.f32 %v5203_v44, %v5248_v17 }
 0x49e   : > { %2120 = vmatmul.f32.gmra.mxu0 %v5150_v7  ;;  %2170 = vmax.xlane.f32.xlu1 %v2169_v46 }
 0x4a3   : > { %v5253_v47 = vpop.f32.mrf.mxu0 }
 0x4a4   : > { %v2172_v43 = vmax.f32 %v5222_v3, %v5253_v47 }
 0x4a6   : > { %2123 = vmatmul.f32.gmra.mxu0 %v5155_v22  ;;  %2173 = vmax.xlane.f32.xlu2 %v2172_v43 }
 0x4ab   : > { %v5258_v25 = vpop.f32.mrf.mxu0 }
 0x4ac   : > { %v2175_v36 = vmax.f32 %v5230_v35, %v5258_v25 }
 0x4ae   : > { %2126 = vmatmul.f32.gmra.mxu0 %v5160_v23  ;;  %2176 = vmax.xlane.f32.xlu2 %v2175_v36 }
 0x4b3   : > { %v5263_v51 = vpop.f32.mrf.mxu0 }
 0x4b4   : > { %v2178_v7 = vmax.f32 %v5234_v19, %v5263_v51 }
 0x4b6   : > { %2129 = vmatmul.f32.gmra.mxu0 %v5165_v8  ;;  %2179 = vmax.xlane.f32.xlu0 %v2178_v7 }
 0x4bb   : > { %v5268_v29 = vpop.f32.mrf.mxu0 }
 0x4bc   : > { %v2181_v22 = vmax.f32 %v5239_v6, %v5268_v29 }
 0x4be   : > { %2132 = vmatmul.f32.gmra.mxu0 %v5172_v21  ;;  %2182 = vmax.xlane.f32.xlu2 %v2181_v22  ;;  %v5280_v21 = vpop.f32.mrf.mxu3 }
 0x4c3   : > { %v5278_v52 = vpop.f32.mrf.mxu0 }
 0x4c6   : > { %2135 = vmatmul.f32.gmra.mxu0 %v5179_v15  ;;  %v5291_v42 = vpop.f32.mrf.mxu3 }
 0x4ce   : > { %2138 = vmatmul.f32.gmra.mxu0 %v5190_v48  ;;  %v5306_v46 = vpop.f32.mrf.mxu3 }
 0x4d6   : > { %2141 = vmatmul.f32.gmra.mxu0 %v5199_v58 }
 0x4de   : > { %2144 = vmatmul.f32.gmra.mxu0 %v5214_v54 }
 0x4e6   : > { %2147 = vmatmul.f32.gmra.mxu0 %v1810_v60  ;;  %v5289_v60 = vpop.f32.mrf.mxu0 }
 0x4ee   : > { %2150 = vmatmul.f32.gmra.mxu0 %v1813_v49  ;;  %v5302_v1 = vpop.f32.mrf.mxu0 }
 0x4f6   : > { %2153 = vmatmul.f32.gmra.mxu0 %v1816_v5 }
 0x4f9   : > { %v2162_v23 = vpop.xlane.xlu0 %2161 }
 0x4fa   : > { %v2256_v8 = vsub.f32 %v5169_v55, %v2162_v23  ;;  %v2257_v20 = vsub.f32 %v2064_v63, %v2162_v23 }
 0x4fc   : > { %v2320_v59 = vmul.f32 1.442695, %v2256_v8  ;;  %v2322_v26 = vmul.f32 1.442695, %v2257_v20  ;;  %v2187_v8 = vmax.f32 %v5291_v42, %v5289_v60 }
 0x4fe   : > { %3456 = vpow2.f32 %v2320_v59  ;;  %2156 = vmatmul.f32.gmra.mxu0 %v1819_v56  ;;  %v5318_v59 = vpop.f32.mrf.mxu0 }
 0x4ff   : > { %3458 = vpow2.f32 %v2322_v26 }
 0x501   : > { %v2165_v15 = vpop.xlane.xlu0 %2164 }
 0x502   : > { %v2258_v48 = vsub.f32 %v5176_v32, %v2165_v15  ;;  %v2259_v58 = vsub.f32 %v2067_v28, %v2165_v15  ;;  %v2184_v28 = vmax.f32 %v5280_v21, %v5278_v52 }
 0x504   : > { %v5283_v54 = vpop.eup %3456  ;;  %v2324_v12 = vmul.f32 1.442695, %v2258_v48  ;;  %v2326_v40 = vmul.f32 1.442695, %v2259_v58 }
 0x505   : > { %v5285_v41 = vpop.eup %3458 }
 0x506   : > { %3460 = vpow2.f32 %v2324_v12  ;;  %v2448_v55 = vadd.f32 %v5285_v41, %v5283_v54  ;;  %v5324_v12 = vpop.f32.mrf.mxu3 }
 0x507   : > { %3462 = vpow2.f32 %v2326_v40 }
 0x508   : > { %2449 = vadd.xlane.f32.xlu1 %v2448_v55  ;;  %v2190_v55 = vmax.f32 %v5306_v46, %v5302_v1 }
 0x509   : > { %v2168_v49 = vpop.xlane.xlu1 %2167 }
 0x50a   : > { %v2260_v32 = vsub.f32 %v5187_v50, %v2168_v49  ;;  %v2261_v27 = vsub.f32 %v2070_v34, %v2168_v49 }
 0x50c   : > { %v5294_v5 = vpop.eup %3460  ;;  %v2328_v13 = vmul.f32 1.442695, %v2260_v32  ;;  %v2330_v56 = vmul.f32 1.442695, %v2261_v27 }
 0x50d   : > { %v5296_v63 = vpop.eup %3462 }
 0x50e   : > { %3464 = vpow2.f32 %v2328_v13  ;;  %v2451_v33 = vadd.f32 %v5296_v63, %v5294_v5 }
 0x50f   : > { %3466 = vpow2.f32 %v2330_v56 }
 0x510   : > { %2452 = vadd.xlane.f32.xlu0 %v2451_v33  ;;  %2185 = vmax.xlane.f32.xlu1 %v2184_v28  ;;  %v5336_v33 = vpop.f32.mrf.mxu0 }
 0x511   : > { %v2171_v50 = vpop.xlane.xlu1 %2170 }
 0x512   : > { %v2262_v34 = vsub.f32 %v5203_v44, %v2171_v50  ;;  %v2263_v62 = vsub.f32 %v5248_v17, %v2171_v50  ;;  %v2193_v50 = vmax.f32 %v5324_v12, %v5318_v59 }
 0x514   : > { %v5308_v43 = vpop.eup %3464  ;;  %v2332_v36 = vmul.f32 1.442695, %v2262_v34  ;;  %v2334_v7 = vmul.f32 1.442695, %v2263_v62  ;;  %v5342_v34 = vpop.f32.mrf.mxu3 }
 0x515   : > { %v5310_v22 = vpop.eup %3466 }
 0x516   : > { %3468 = vpow2.f32 %v2332_v36  ;;  %v2454_v23 = vadd.f32 %v5310_v22, %v5308_v43 }
 0x517   : > { %3470 = vpow2.f32 %v2334_v7 }
 0x518   : > { %2455 = vadd.xlane.f32.xlu2 %v2454_v23  ;;  %2188 = vmax.xlane.f32.xlu0 %v2187_v8 }
 0x519   : > { %v2174_v44 = vpop.xlane.xlu2 %2173 }
 0x51a   : > { %v2264_v17 = vsub.f32 %v5222_v3, %v2174_v44  ;;  %v2265_v20 = vsub.f32 %v5253_v47, %v2174_v44 }
 0x51c   : > { %v5320_v26 = vpop.eup %3468  ;;  %v2336_v15 = vmul.f32 1.442695, %v2264_v17  ;;  %v2338_v48 = vmul.f32 1.442695, %v2265_v20  ;;  %v2196_v17 = vmax.f32 %v5342_v34, %v5336_v33  ;;  %v5354_v20 = vpop.f32.mrf.mxu0 }
 0x51d   : > { %v5322_v58 = vpop.eup %3470 }
 0x51e   : > { %3472 = vpow2.f32 %v2336_v15  ;;  %v2457_v40 = vadd.f32 %v5322_v58, %v5320_v26 }
 0x51f   : > { %3474 = vpow2.f32 %v2338_v48 }
 0x520   : > { %2458 = vadd.xlane.f32.xlu1 %v2457_v40  ;;  %2191 = vmax.xlane.f32.xlu2 %v2190_v55 }
 0x521   : > { %v2177_v3 = vpop.xlane.xlu2 %2176 }
 0x522   : > { %v2266_v47 = vsub.f32 %v5230_v35, %v2177_v3  ;;  %v2267_v49 = vsub.f32 %v5258_v25, %v2177_v3 }
 0x524   : > { %v5332_v32 = vpop.eup %3472  ;;  %v2340_v27 = vmul.f32 1.442695, %v2266_v47  ;;  %v2342_v13 = vmul.f32 1.442695, %v2267_v49 }
 0x525   : > { %v5334_v56 = vpop.eup %3474 }
 0x526   : > { %3476 = vpow2.f32 %v2340_v27  ;;  %v2460_v28 = vadd.f32 %v5334_v56, %v5332_v32 }
 0x527   : > { %3478 = vpow2.f32 %v2342_v13  ;;  %v5368_v13 = vpop.f32.mrf.mxu0 }
 0x528   : > { %2461 = vadd.xlane.f32.xlu0 %v2460_v28  ;;  %2194 = vmax.xlane.f32.xlu1 %v2193_v50 }
 0x529   : > { %v2180_v35 = vpop.xlane.xlu0 %2179 }
 0x52a   : > { %v2268_v25 = vsub.f32 %v5234_v19, %v2180_v35  ;;  %v2269_v62 = vsub.f32 %v5263_v51, %v2180_v35  ;;  %v5356_v19 = vpop.f32.mrf.mxu3 }
 0x52b   : > { %v2199_v27 = vmax.f32 %v5356_v19, %v5354_v20 }
 0x52c   : > { %v5346_v36 = vpop.eup %3476  ;;  %v2344_v7 = vmul.f32 1.442695, %v2268_v25  ;;  %v2346_v23 = vmul.f32 1.442695, %v2269_v62 }
 0x52d   : > { %v5348_v8 = vpop.eup %3478 }
 0x52e   : > { %3480 = vpow2.f32 %v2344_v7  ;;  %v2463_v44 = vadd.f32 %v5348_v8, %v5346_v36 }
 0x52f   : > { %3482 = vpow2.f32 %v2346_v23  ;;  %v5380_v25 = vpop.f32.mrf.mxu0 }
 0x530   : > { %2464 = vadd.xlane.f32.xlu2 %v2463_v44  ;;  %2197 = vmax.xlane.f32.xlu0 %v2196_v17 }
 0x531   : > { %v2183_v51 = vpop.xlane.xlu2 %2182 }
 0x532   : > { %v2270_v15 = vsub.f32 %v5239_v6, %v2183_v51  ;;  %v2271_v48 = vsub.f32 %v5268_v29, %v2183_v51  ;;  %v5370_v6 = vpop.f32.mrf.mxu3 }
 0x533   : > { %v2202_v35 = vmax.f32 %v5370_v6, %v5368_v13 }
 0x534   : > { %v5360_v40 = vpop.eup %3480  ;;  %v2348_v55 = vmul.f32 1.442695, %v2270_v15  ;;  %v2350_v3 = vmul.f32 1.442695, %v2271_v48 }
 0x535   : > { %v5362_v47 = vpop.eup %3482 }
 0x536   : > { %3484 = vpow2.f32 %v2348_v55  ;;  %v2466_v49 = vadd.f32 %v5362_v47, %v5360_v40 }
 0x537   : > { %3486 = vpow2.f32 %v2350_v3 }
 0x538   : > { %2467 = vadd.xlane.f32.xlu1 %v2466_v49  ;;  %2200 = vmax.xlane.f32.xlu2 %v2199_v27  ;;  %v5390_v49 = vpop.f32.mrf.mxu0 }
 0x53a   : > { %v5382_v62 = vpop.f32.mrf.mxu3 }
 0x53b   : > { %v2205_v7 = vmax.f32 %v5382_v62, %v5380_v25 }
 0x53c   : > { %v5372_v29 = vpop.eup %3484 }
 0x53d   : > { %v5374_v28 = vpop.eup %3486 }
 0x53e   : > { %v2469_v50 = vadd.f32 %v5374_v28, %v5372_v29 }
 0x540   : > { %2470 = vadd.xlane.f32.xlu0 %v2469_v50  ;;  %2203 = vmax.xlane.f32.xlu1 %v2202_v35 }
 0x542   : > { %v5392_v35 = vpop.f32.mrf.mxu3 }
 0x548   : > { %2206 = vmax.xlane.f32.xlu0 %v2205_v7 }
 0x57b   : > { %v2450_v23 = vpop.xlane.xlu1 %2449 }
 0x57c   : > { %3488 = vrcp.f32 %v2450_v23 }
 0x582   : > { %v3489_v44 = vpop.eup %3488 }
 0x583   : > { %v2576_v17 = vmul.f32 %v3489_v44, %v5283_v54  ;;  %v2577_v51 = vmul.f32 %v3489_v44, %v5285_v41  ;;  %v2453_v15 = vpop.xlane.xlu0 %2452  ;;  %v2186_v48 = vpop.xlane.xlu1 %2185 }
 0x584   : > { %3490 = vrcp.f32 %v2453_v15  ;;  %v2272_v55 = vsub.f32 %v5280_v21, %v2186_v48  ;;  %v2273_v3 = vsub.f32 %v5278_v52, %v2186_v48 }
 0x585   : > { %2656 = vmatmul.f32.vlgmr.msra.gmra.mxu2 %v2576_v17  ;;  %2769 = vmatmul.f32.vlgmr.msrb.gmra.mxu1 %v2577_v51 }
 0x586   : > { %v2352_v27 = vmul.f32 1.442695, %v2272_v55  ;;  %v2354_v50 = vmul.f32 1.442695, %v2273_v3  ;;  %v5402_v55 = vpop.f32.mrf.mxu0  ;;  %v5406_v3 = vpop.f32.mrf.mxu3 }
 0x588   : > { %3492 = vpow2.f32 %v2352_v27 }
 0x589   : > { %3494 = vpow2.f32 %v2354_v50 }
 0x58a   : > { %v3491_v54 = vpop.eup %3490 }
 0x58b   : > { %v2456_v7 = vpop.xlane.xlu2 %2455  ;;  %v2189_v41 = vpop.xlane.xlu0 %2188  ;;  %v2578_v23 = vmul.f32 %v3491_v54, %v5294_v5  ;;  %v2579_v44 = vmul.f32 %v3491_v54, %v5296_v63 }
 0x58c   : > { %3496 = vrcp.f32 %v2456_v7  ;;  %v2274_v52 = vsub.f32 %v5291_v42, %v2189_v41  ;;  %v2275_v21 = vsub.f32 %v5289_v60, %v2189_v41 }
 0x58d   : > { %2659 = vmatmul.f32.gmra.mxu2 %v2578_v23  ;;  %2772 = vmatmul.f32.gmra.mxu1 %v2579_v44 }
 0x58e   : > { %v5398_v17 = vpop.eup %3492  ;;  %v2356_v51 = vmul.f32 1.442695, %v2274_v52  ;;  %v2358_v15 = vmul.f32 1.442695, %v2275_v21 }
 0x58f   : > { %v5400_v48 = vpop.eup %3494 }
 0x590   : > { %3498 = vpow2.f32 %v2356_v51  ;;  %v2472_v5 = vadd.f32 %v5400_v48, %v5398_v17 }
 0x591   : > { %3500 = vpow2.f32 %v2358_v15 }
 0x592   : > { %v3497_v63 = vpop.eup %3496  ;;  %2473 = vadd.xlane.f32.xlu2 %v2472_v5 }
 0x593   : > { %v2459_v60 = vpop.xlane.xlu1 %2458  ;;  %v2192_v42 = vpop.xlane.xlu2 %2191  ;;  %v2580_v27 = vmul.f32 %v3497_v63, %v5308_v43  ;;  %v2581_v50 = vmul.f32 %v3497_v63, %v5310_v22  ;;  %v2208_v43 = vmax.f32 %v5392_v35, %v5390_v49 }
 0x594   : > { %3502 = vrcp.f32 %v2459_v60  ;;  %v2276_v54 = vsub.f32 %v5306_v46, %v2192_v42  ;;  %v2277_v7 = vsub.f32 %v5302_v1, %v2192_v42  ;;  %v5420_v46 = vpop.f32.mrf.mxu0  ;;  %v5426_v42 = vpop.f32.mrf.mxu3 }
 0x595   : > { %2662 = vmatmul.f32.gmra.mxu2 %v2580_v27  ;;  %2775 = vmatmul.f32.gmra.mxu1 %v2581_v50 }
 0x596   : > { %v5412_v41 = vpop.eup %3498  ;;  %v2360_v23 = vmul.f32 1.442695, %v2276_v54  ;;  %v2362_v44 = vmul.f32 1.442695, %v2277_v7 }
 0x597   : > { %v5414_v52 = vpop.eup %3500 }
 0x598   : > { %3504 = vpow2.f32 %v2360_v23  ;;  %v2475_v21 = vadd.f32 %v5414_v52, %v5412_v41 }
 0x599   : > { %3506 = vpow2.f32 %v2362_v44 }
 0x59a   : > { %v3503_v22 = vpop.eup %3502  ;;  %2476 = vadd.xlane.f32.xlu1 %v2475_v21  ;;  %2209 = vmax.xlane.f32.xlu2 %v2208_v43 }
 0x59b   : > { %v2462_v1 = vpop.xlane.xlu0 %2461  ;;  %v2195_v51 = vpop.xlane.xlu1 %2194  ;;  %v2582_v15 = vmul.f32 %v3503_v22, %v5320_v26  ;;  %v2583_v5 = vmul.f32 %v3503_v22, %v5322_v58  ;;  %v2211_v58 = vmax.f32 %v5406_v3, %v5402_v55 }
 0x59c   : > { %3508 = vrcp.f32 %v2462_v1  ;;  %v2278_v63 = vsub.f32 %v5324_v12, %v2195_v51  ;;  %v2279_v60 = vsub.f32 %v5318_v59, %v2195_v51  ;;  %v5440_v1 = vpop.f32.mrf.mxu0 }
 0x59d   : > { %2665 = vmatmul.f32.gmra.mxu2 %v2582_v15  ;;  %2778 = vmatmul.f32.gmra.mxu1 %v2583_v5 }
 0x59e   : > { %v5428_v27 = vpop.eup %3504  ;;  %v2364_v50 = vmul.f32 1.442695, %v2278_v63  ;;  %v2366_v54 = vmul.f32 1.442695, %v2279_v60  ;;  %v5446_v60 = vpop.f32.mrf.mxu3 }
 0x59f   : > { %v5430_v7 = vpop.eup %3506 }
 0x5a0   : > { %3510 = vpow2.f32 %v2364_v50  ;;  %v2478_v26 = vadd.f32 %v5430_v7, %v5428_v27 }
 0x5a1   : > { %3512 = vpow2.f32 %v2366_v54 }
 0x5a2   : > { %v3509_v12 = vpop.eup %3508  ;;  %2479 = vadd.xlane.f32.xlu0 %v2478_v26  ;;  %2212 = vmax.xlane.f32.xlu1 %v2211_v58 }
 0x5a3   : > { %v2465_v59 = vpop.xlane.xlu2 %2464  ;;  %v2198_v23 = vpop.xlane.xlu0 %2197  ;;  %v2584_v44 = vmul.f32 %v3509_v12, %v5332_v32  ;;  %v2585_v21 = vmul.f32 %v3509_v12, %v5334_v56  ;;  %v2214_v56 = vmax.f32 %v5426_v42, %v5420_v46 }
 0x5a4   : > { %3514 = vrcp.f32 %v2465_v59  ;;  %v2280_v43 = vsub.f32 %v5342_v34, %v2198_v23  ;;  %v2281_v22 = vsub.f32 %v5336_v33, %v2198_v23 }
 0x5a5   : > { %2668 = vmatmul.f32.gmra.mxu2 %v2584_v44  ;;  %2781 = vmatmul.f32.gmra.mxu1 %v2585_v21 }
 0x5a6   : > { %v5442_v51 = vpop.eup %3510  ;;  %v2368_v15 = vmul.f32 1.442695, %v2280_v43  ;;  %v2370_v5 = vmul.f32 1.442695, %v2281_v22  ;;  %v5460_v43 = vpop.f32.mrf.mxu0  ;;  %v2881_v22 = vld [vmem:[#allocation10 + $0x78] sm:$0xff] }
 0x5a7   : > { %v5444_v63 = vpop.eup %3512  ;;  %2886 = vmatpush.msrb.mxu3 %v2881_v22 }
 0x5a8   : > { %3516 = vpow2.f32 %v2368_v15  ;;  %v2481_v32 = vadd.f32 %v5444_v63, %v5442_v51 }
 0x5a9   : > { %3518 = vpow2.f32 %v2370_v5 }
 0x5aa   : > { %v3515_v33 = vpop.eup %3514  ;;  %2482 = vadd.xlane.f32.xlu2 %v2481_v32  ;;  %2215 = vmax.xlane.f32.xlu0 %v2214_v56 }
 0x5ab   : > { %v2468_v34 = vpop.xlane.xlu1 %2467  ;;  %v2201_v50 = vpop.xlane.xlu2 %2200  ;;  %v2586_v54 = vmul.f32 %v3515_v33, %v5346_v36  ;;  %v2587_v26 = vmul.f32 %v3515_v33, %v5348_v8  ;;  %v2217_v8 = vmax.f32 %v5446_v60, %v5440_v1  ;;  %v2880_v33 = vld [vmem:[#allocation10 + $0x70] sm:$0xff] }
 0x5ac   : > { %3520 = vrcp.f32 %v2468_v34  ;;  %v2282_v58 = vsub.f32 %v5356_v19, %v2201_v50  ;;  %v2283_v12 = vsub.f32 %v5354_v20, %v2201_v50  ;;  %v5466_v19 = vpop.f32.mrf.mxu3  ;;  %2887 = vmatpush.msrb.mxu3 %v2880_v33 }
 0x5ad   : > { %2671 = vmatmul.f32.gmra.mxu2 %v2586_v54  ;;  %2784 = vmatmul.f32.gmra.mxu1 %v2587_v26  ;;  %v2879_v54 = vld [vmem:[#allocation10 + $0x68] sm:$0xff] }
 0x5ae   : > { %v5456_v59 = vpop.eup %3516  ;;  %v2372_v23 = vmul.f32 1.442695, %v2282_v58  ;;  %v2374_v44 = vmul.f32 1.442695, %v2283_v12  ;;  %2888 = vmatpush.msrb.mxu3 %v2879_v54 }
 0x5af   : > { %v5458_v21 = vpop.eup %3518 }
 0x5b0   : > { %3522 = vpow2.f32 %v2372_v23  ;;  %v2484_v36 = vadd.f32 %v5458_v21, %v5456_v59 }
 0x5b1   : > { %3524 = vpow2.f32 %v2374_v44 }
 0x5b2   : > { %v3521_v20 = vpop.eup %3520  ;;  %2485 = vadd.xlane.f32.xlu1 %v2484_v36  ;;  %2218 = vmax.xlane.f32.xlu2 %v2217_v8 }
 0x5b3   : > { %v2471_v15 = vpop.xlane.xlu0 %2470  ;;  %v2204_v5 = vpop.xlane.xlu1 %2203  ;;  %v2588_v32 = vmul.f32 %v3521_v20, %v5360_v40  ;;  %v2589_v56 = vmul.f32 %v3521_v20, %v5362_v47  ;;  %v2220_v47 = vmax.f32 %v5466_v19, %v5460_v43 }
 0x5b4   : > { %3526 = vrcp.f32 %v2471_v15  ;;  %v2284_v34 = vsub.f32 %v5370_v6, %v2204_v5  ;;  %v2285_v50 = vsub.f32 %v5368_v13, %v2204_v5  ;;  %v2878_v6 = vld [vmem:[#allocation10 + $0x60] sm:$0xff]  ;;  %v5480_v13 = vpop.f32.mrf.mxu0  ;;  %v5482_v36 = vpop.f32.mrf.mxu3  ;;  %v2877_v15 = vld [vmem:[#allocation10 + $0x58] sm:$0xff] }
 0x5b5   : > { %2674 = vmatmul.f32.gmra.mxu2 %v2588_v32  ;;  %2787 = vmatmul.f32.gmra.mxu1 %v2589_v56  ;;  %v2876_v56 = vld [vmem:[#allocation10 + $0x50] sm:$0xff] }
 0x5b6   : > { %v5472_v26 = vpop.eup %3522  ;;  %v2376_v58 = vmul.f32 1.442695, %v2284_v34  ;;  %v2378_v12 = vmul.f32 1.442695, %v2285_v50  ;;  %2889 = vmatpush.msrb.mxu3 %v2878_v6  ;;  %v2872_v6 = vld [vmem:[#allocation10 + $0x30] sm:$0xff] }
 0x5b7   : > { %v5474_v23 = vpop.eup %3524 }
 0x5b8   : > { %3528 = vpow2.f32 %v2376_v58  ;;  %v2487_v40 = vadd.f32 %v5474_v23, %v5472_v26  ;;  %2890 = vmatpush.msrb.mxu3 %v2877_v15 }
 0x5b9   : > { %3530 = vpow2.f32 %v2378_v12  ;;  %v2873_v12 = vld [vmem:[#allocation10 + $0x38] sm:$0xff] }
 0x5ba   : > { %v3527_v44 = vpop.eup %3526  ;;  %2488 = vadd.xlane.f32.xlu0 %v2487_v40  ;;  %2221 = vmax.xlane.f32.xlu1 %v2220_v47 }
 0x5bb   : > { %v2207_v8 = vpop.xlane.xlu0 %2206  ;;  %v2590_v20 = vmul.f32 %v3527_v44, %v5372_v29  ;;  %v2591_v22 = vmul.f32 %v3527_v44, %v5374_v28  ;;  %v2223_v28 = vmax.f32 %v5482_v36, %v5480_v13  ;;  %2891 = vmatpush.msrb.mxu3 %v2876_v56  ;;  %v2870_v56 = vld [vmem:[#allocation10 + $0x20] sm:$0xff] }
 0x5bc   : > { %v2286_v5 = vsub.f32 %v5382_v62, %v2207_v8  ;;  %v2287_v32 = vsub.f32 %v5380_v25, %v2207_v8  ;;  %v2875_v62 = vld [vmem:[#allocation10 + $0x48] sm:$0xff]  ;;  %v2874_v25 = vld [vmem:[#allocation10 + $0x40] sm:$0xff]  ;;  %v5496_v58 = vpop.f32.mrf.mxu0  ;;  %v5498_v40 = vpop.f32.mrf.mxu3 }
 0x5bd   : > { %2677 = vmatmul.f32.gmra.mxu2 %v2590_v20  ;;  %2790 = vmatmul.f32.gmra.mxu1 %v2591_v22  ;;  %v2226_v20 = vmax.f32 %v5498_v40, %v5496_v58  ;;  %v2871_v22 = vld [vmem:[#allocation10 + $0x28] sm:$0xff] }
 0x5be   : > { %v5488_v33 = vpop.eup %3528  ;;  %v2380_v34 = vmul.f32 1.442695, %v2286_v5  ;;  %v2382_v50 = vmul.f32 1.442695, %v2287_v32  ;;  %2892 = vmatpush.msrb.mxu3 %v2875_v62 }
 0x5bf   : > { %v5490_v54 = vpop.eup %3530 }
 0x5c0   : > { %3532 = vpow2.f32 %v2380_v34  ;;  %v2490_v29 = vadd.f32 %v5490_v54, %v5488_v33  ;;  %2893 = vmatpush.msrb.mxu3 %v2874_v25  ;;  %v2869_v34 = vld [vmem:[#allocation10 + $0x18] sm:$0xff] }
 0x5c1   : > { %3534 = vpow2.f32 %v2382_v50  ;;  %v2868_v50 = vld [vmem:[#allocation10 + $0x10] sm:$0xff] }
 0x5c2   : > { %2491 = vadd.xlane.f32.xlu2 %v2490_v29  ;;  %2224 = vmax.xlane.f32.xlu0 %v2223_v28  ;;  %v2867_v29 = vld [vmem:[#allocation10 + $0x8] sm:$0xff]  ;;  %v2866_v28 = vld [vmem:[#allocation10] sm:$0xff] }
 0x5c3   : > { %2894 = vmatpush.msrb.mxu3 %v2873_v12 }
 0x5c4   : > { %v5508_v15 = vpop.f32.mrf.mxu0  ;;  %v5510_v5 = vpop.f32.mrf.mxu3 }
 0x5c5   : > { %2895 = vmatpush.msrb.mxu3 %v2872_v6  ;;  %v2229_v32 = vmax.f32 %v5510_v5, %v5508_v15 }
 0x5c6   : > { %v5500_v47 = vpop.eup %3532 }
 0x5c7   : > { %v5502_v44 = vpop.eup %3534  ;;  %2896 = vmatpush.msrb.mxu3 %v2871_v22 }
 0x5c8   : > { %v2493_v8 = vadd.f32 %v5502_v44, %v5500_v47 }
 0x5c9   : > { %2897 = vmatpush.msrb.mxu3 %v2870_v56 }
 0x5ca   : > { %2494 = vadd.xlane.f32.xlu1 %v2493_v8  ;;  %2227 = vmax.xlane.f32.xlu2 %v2226_v20 }
 0x5cb   : > { %2898 = vmatpush.msrb.mxu3 %v2869_v34 }
 0x5cd   : > { %2899 = vmatpush.msrb.mxu3 %v2868_v50 }
 0x5cf   : > { %2900 = vmatpush.msrb.mxu3 %v2867_v29  ;;  %v5518_v29 = vpop.f32.mrf.mxu0 }
 0x5d1   : > { %2901 = vmatpush.msrb.mxu3 %v2866_v28 }
 0x5d2   : > { %2230 = vmax.xlane.f32.xlu1 %v2229_v32 }
 0x602   : > { %v2770_v62 = vpop.f32.mrf.mxu1 }
 0x605   : > { %v2474_v25 = vpop.xlane.xlu2 %2473 }
 0x606   : > { %3536 = vrcp.f32 %v2474_v25 }
 0x608   : > { %v2657_v12 = vpop.f32.mrf.mxu2 }
 0x609   : > { %v2771_v6 = vadd.f32 %v2770_v62, %v2657_v12 }
 0x60a   : > { %v2773_v8 = vpop.f32.mrf.mxu1 }
 0x60b   : > { %2902 = vmatmul.f32.vlgmr.msrb.gmra.mxu3 %v2771_v6  ;;  %v5520_v6 = vpop.f32.mrf.mxu3 }
 0x60c   : > { %v3537_v20 = vpop.eup %3536 }
 0x60d   : > { %v2477_v22 = vpop.xlane.xlu1 %2476  ;;  %v2210_v32 = vpop.xlane.xlu2 %2209  ;;  %v2592_v45 = vmul.f32 %v3537_v20, %v5398_v17  ;;  %v2593_v56 = vmul.f32 %v3537_v20, %v5400_v48 }
 0x60e   : > { %3538 = vrcp.f32 %v2477_v22  ;;  %v2288_v34 = vsub.f32 %v5392_v35, %v2210_v32  ;;  %v2289_v50 = vsub.f32 %v5390_v49, %v2210_v32 }
 0x60f   : > { %2680 = vmatmul.f32.gmra.mxu2 %v2592_v45  ;;  %2793 = vmatmul.f32.gmra.mxu1 %v2593_v56 }
 0x610   : > { %v2384_v28 = vmul.f32 1.442695, %v2288_v34  ;;  %v2386_v62 = vmul.f32 1.442695, %v2289_v50  ;;  %v2660_v25 = vpop.f32.mrf.mxu2 }
 0x611   : > { %v2774_v12 = vadd.f32 %v2773_v8, %v2660_v25 }
 0x612   : > { %3540 = vpow2.f32 %v2384_v28  ;;  %v2776_v30 = vpop.f32.mrf.mxu1 }
 0x613   : > { %3542 = vpow2.f32 %v2386_v62  ;;  %2905 = vmatmul.f32.gmra.mxu3 %v2774_v12  ;;  %v5530_v62 = vpop.f32.mrf.mxu0 }
 0x614   : > { %v3539_v17 = vpop.eup %3538 }
 0x615   : > { %v2480_v48 = vpop.xlane.xlu0 %2479  ;;  %v2213_v20 = vpop.xlane.xlu1 %2212  ;;  %v2594_v35 = vmul.f32 %v3539_v17, %v5412_v41  ;;  %v2595_v45 = vmul.f32 %v3539_v17, %v5414_v52 }
 0x616   : > { %3544 = vrcp.f32 %v2480_v48  ;;  %v2290_v49 = vsub.f32 %v5406_v3, %v2213_v20  ;;  %v2291_v22 = vsub.f32 %v5402_v55, %v2213_v20  ;;  %v5534_v3 = vpop.f32.mrf.mxu3 }
 0x617   : > { %2683 = vmatmul.f32.gmra.mxu2 %v2594_v35  ;;  %2796 = vmatmul.f32.gmra.mxu1 %v2595_v45 }
 0x618   : > { %v5526_v8 = vpop.eup %3540  ;;  %v2388_v32 = vmul.f32 1.442695, %v2290_v49  ;;  %v2390_v56 = vmul.f32 1.442695, %v2291_v22  ;;  %v2663_v34 = vpop.f32.mrf.mxu2 }
 0x619   : > { %v5528_v50 = vpop.eup %3542  ;;  %v2777_v28 = vadd.f32 %v2776_v30, %v2663_v34 }
 0x61a   : > { %3546 = vpow2.f32 %v2388_v32  ;;  %v2779_v41 = vpop.f32.mrf.mxu1  ;;  %v2496_v52 = vadd.f32 %v5528_v50, %v5526_v8 }
 0x61b   : > { %3548 = vpow2.f32 %v2390_v56  ;;  %2908 = vmatmul.f32.gmra.mxu3 %v2777_v28 }
 0x61c   : > { %v3545_v55 = vpop.eup %3544  ;;  %2497 = vadd.xlane.f32.xlu0 %v2496_v52 }
 0x61d   : > { %v2483_v25 = vpop.xlane.xlu2 %2482  ;;  %v2216_v12 = vpop.xlane.xlu0 %2215  ;;  %v2596_v17 = vmul.f32 %v3545_v55, %v5428_v27  ;;  %v2597_v48 = vmul.f32 %v3545_v55, %v5430_v7 }
 0x61e   : > { %3550 = vrcp.f32 %v2483_v25  ;;  %v2292_v30 = vsub.f32 %v5426_v42, %v2216_v12  ;;  %v2293_v20 = vsub.f32 %v5420_v46, %v2216_v12  ;;  %v2232_v42 = vmax.f32 %v5520_v6, %v5518_v29  ;;  %v5548_v7 = vpop.f32.mrf.mxu0 }
 0x61f   : > { %2686 = vmatmul.f32.gmra.mxu2 %v2596_v17  ;;  %2799 = vmatmul.f32.gmra.mxu1 %v2597_v48  ;;  %v5554_v17 = vpop.f32.mrf.mxu3 }
 0x620   : > { %v5540_v35 = vpop.eup %3546  ;;  %v2392_v45 = vmul.f32 1.442695, %v2292_v30  ;;  %v2394_v49 = vmul.f32 1.442695, %v2293_v20  ;;  %v2666_v22 = vpop.f32.mrf.mxu2 }
 0x621   : > { %v5542_v32 = vpop.eup %3548  ;;  %v2780_v56 = vadd.f32 %v2779_v41, %v2666_v22 }
 0x622   : > { %3552 = vpow2.f32 %v2392_v45  ;;  %v2782_v34 = vpop.f32.mrf.mxu1  ;;  %v2499_v27 = vadd.f32 %v5542_v32, %v5540_v35 }
 0x623   : > { %3554 = vpow2.f32 %v2394_v49  ;;  %2911 = vmatmul.f32.gmra.mxu3 %v2780_v56 }
 0x624   : > { %v3551_v46 = vpop.eup %3550  ;;  %2500 = vadd.xlane.f32.xlu2 %v2499_v27  ;;  %2233 = vmax.xlane.f32.xlu0 %v2232_v42 }
 0x625   : > { %v2486_v28 = vpop.xlane.xlu1 %2485  ;;  %v2219_v52 = vpop.xlane.xlu2 %2218  ;;  %v2598_v55 = vmul.f32 %v3551_v46, %v5442_v51  ;;  %v2599_v41 = vmul.f32 %v3551_v46, %v5444_v63  ;;  %v2235_v63 = vmax.f32 %v5534_v3, %v5530_v62 }
 0x626   : > { %3556 = vrcp.f32 %v2486_v28  ;;  %v2294_v25 = vsub.f32 %v5446_v60, %v2219_v52  ;;  %v2295_v12 = vsub.f32 %v5440_v1, %v2219_v52  ;;  %v5568_v52 = vpop.f32.mrf.mxu0 }
 0x627   : > { %2689 = vmatmul.f32.gmra.mxu2 %v2598_v55  ;;  %2802 = vmatmul.f32.gmra.mxu1 %v2599_v41 }
 0x628   : > { %v5556_v48 = vpop.eup %3552  ;;  %v2396_v30 = vmul.f32 1.442695, %v2294_v25  ;;  %v2398_v20 = vmul.f32 1.442695, %v2295_v12  ;;  %v2669_v45 = vpop.f32.mrf.mxu2 }
 0x629   : > { %v5558_v49 = vpop.eup %3554  ;;  %v2783_v22 = vadd.f32 %v2782_v34, %v2669_v45 }
 0x62a   : > { %3558 = vpow2.f32 %v2396_v30  ;;  %v2502_v51 = vadd.f32 %v5558_v49, %v5556_v48  ;;  %v2785_v60 = vpop.f32.mrf.mxu1 }
 0x62b   : > { %3560 = vpow2.f32 %v2398_v20  ;;  %2914 = vmatmul.f32.gmra.mxu3 %v2783_v22  ;;  %v5574_v20 = vpop.f32.mrf.mxu3 }
 0x62c   : > { %v3557_v1 = vpop.eup %3556  ;;  %2503 = vadd.xlane.f32.xlu1 %v2502_v51  ;;  %2236 = vmax.xlane.f32.xlu2 %v2235_v63 }
 0x62d   : > { %v2489_v56 = vpop.xlane.xlu0 %2488  ;;  %v2222_v27 = vpop.xlane.xlu1 %2221  ;;  %v2600_v42 = vmul.f32 %v3557_v1, %v5456_v59  ;;  %v2601_v46 = vmul.f32 %v3557_v1, %v5458_v21 }
 0x62e   : > { %3562 = vrcp.f32 %v2489_v56  ;;  %v2296_v34 = vsub.f32 %v5466_v19, %v2222_v27  ;;  %v2297_v28 = vsub.f32 %v5460_v43, %v2222_v27  ;;  %v2238_v43 = vmax.f32 %v5554_v17, %v5548_v7 }
 0x62f   : > { %2692 = vmatmul.f32.gmra.mxu2 %v2600_v42  ;;  %2805 = vmatmul.f32.gmra.mxu1 %v2601_v46 }
 0x630   : > { %v5570_v55 = vpop.eup %3558  ;;  %v2400_v41 = vmul.f32 1.442695, %v2296_v34  ;;  %v2402_v25 = vmul.f32 1.442695, %v2297_v28  ;;  %v2672_v12 = vpop.f32.mrf.mxu2 }
 0x631   : > { %v5572_v30 = vpop.eup %3560  ;;  %v2786_v59 = vadd.f32 %v2785_v60, %v2672_v12 }
 0x632   : > { %3564 = vpow2.f32 %v2400_v41  ;;  %v2505_v21 = vadd.f32 %v5572_v30, %v5570_v55  ;;  %v2788_v1 = vpop.f32.mrf.mxu1  ;;  %v5588_v41 = vpop.f32.mrf.mxu0 }
 0x633   : > { %3566 = vpow2.f32 %v2402_v25  ;;  %2917 = vmatmul.f32.gmra.mxu3 %v2786_v59 }
 0x634   : > { %v3563_v19 = vpop.eup %3562  ;;  %2506 = vadd.xlane.f32.xlu0 %v2505_v21  ;;  %2239 = vmax.xlane.f32.xlu1 %v2238_v43 }
 0x635   : > { %v2492_v45 = vpop.xlane.xlu2 %2491  ;;  %v2225_v22 = vpop.xlane.xlu0 %2224  ;;  %v2602_v51 = vmul.f32 %v3563_v19, %v5472_v26  ;;  %v2603_v63 = vmul.f32 %v3563_v19, %v5474_v23 }
 0x636   : > { %3568 = vrcp.f32 %v2492_v45  ;;  %v2298_v60 = vsub.f32 %v5482_v36, %v2225_v22  ;;  %v2299_v56 = vsub.f32 %v5480_v13, %v2225_v22  ;;  %v2241_v36 = vmax.f32 %v5574_v20, %v5568_v52  ;;  %v5594_v13 = vpop.f32.mrf.mxu3 }
 0x637   : > { %2695 = vmatmul.f32.gmra.mxu2 %v2602_v51  ;;  %2808 = vmatmul.f32.gmra.mxu1 %v2603_v63 }
 0x638   : > { %v5584_v27 = vpop.eup %3564  ;;  %v2404_v42 = vmul.f32 1.442695, %v2298_v60  ;;  %v2406_v46 = vmul.f32 1.442695, %v2299_v56  ;;  %v2675_v34 = vpop.f32.mrf.mxu2 }
 0x639   : > { %v5586_v28 = vpop.eup %3566  ;;  %v2789_v26 = vadd.f32 %v2788_v1, %v2675_v34 }
 0x63a   : > { %3570 = vpow2.f32 %v2404_v42  ;;  %v2508_v23 = vadd.f32 %v5586_v28, %v5584_v27  ;;  %v2791_v51 = vpop.f32.mrf.mxu1 }
 0x63b   : > { %3572 = vpow2.f32 %v2406_v46  ;;  %2920 = vmatmul.f32.gmra.mxu3 %v2789_v26 }
 0x63c   : > { %v3569_v25 = vpop.eup %3568  ;;  %2509 = vadd.xlane.f32.xlu2 %v2508_v23  ;;  %2242 = vmax.xlane.f32.xlu0 %v2241_v36 }
 0x63d   : > { %v2495_v12 = vpop.xlane.xlu1 %2494  ;;  %v2228_v59 = vpop.xlane.xlu2 %2227  ;;  %v2604_v21 = vmul.f32 %v3569_v25, %v5488_v33  ;;  %v2605_v43 = vmul.f32 %v3569_v25, %v5490_v54  ;;  %v2244_v54 = vmax.f32 %v5594_v13, %v5588_v41 }
 0x63e   : > { %3574 = vrcp.f32 %v2495_v12  ;;  %v2300_v19 = vsub.f32 %v5498_v40, %v2228_v59  ;;  %v2301_v45 = vsub.f32 %v5496_v58, %v2228_v59  ;;  %v5608_v40 = vpop.f32.mrf.mxu0  ;;  %v5610_v46 = vpop.f32.mrf.mxu3 }
 0x63f   : > { %2698 = vmatmul.f32.gmra.mxu2 %v2604_v21  ;;  %2811 = vmatmul.f32.gmra.mxu1 %v2605_v43 }
 0x640   : > { %v5600_v22 = vpop.eup %3570  ;;  %v2408_v63 = vmul.f32 1.442695, %v2300_v19  ;;  %v2410_v1 = vmul.f32 1.442695, %v2301_v45  ;;  %v2678_v60 = vpop.f32.mrf.mxu2 }
 0x641   : > { %v5602_v56 = vpop.eup %3572  ;;  %v2792_v42 = vadd.f32 %v2791_v51, %v2678_v60 }
 0x642   : > { %3576 = vpow2.f32 %v2408_v63  ;;  %v2511_v33 = vadd.f32 %v5602_v56, %v5600_v22 }
 0x643   : > { %3578 = vpow2.f32 %v2410_v1  ;;  %2923 = vmatmul.f32.gmra.mxu3 %v2792_v42 }
 0x644   : > { %v3575_v58 = vpop.eup %3574  ;;  %2512 = vadd.xlane.f32.xlu1 %v2511_v33  ;;  %2245 = vmax.xlane.f32.xlu2 %v2244_v54  ;;  %v5645_v33 = vld [vmem:[%s5963_s8] ss:$0 sm:$0xff] }
 0x645   : > { %v2231_v34 = vpop.xlane.xlu1 %2230  ;;  %v2606_v26 = vmul.f32 %v3575_v58, %v5500_v47  ;;  %v2607_v23 = vmul.f32 %v3575_v58, %v5502_v44  ;;  %v2247_v47 = vmax.f32 %v5610_v46, %v5608_v40 }
 0x646   : > { %v2302_v36 = vsub.f32 %v5510_v5, %v2231_v34  ;;  %v2303_v25 = vsub.f32 %v5508_v15, %v2231_v34  ;;  %v5624_v44 = vpop.f32.mrf.mxu0  ;;  %v5626_v15 = vpop.f32.mrf.mxu3 }
 0x647   : > { %2701 = vmatmul.f32.gmra.mxu2 %v2606_v26  ;;  %2814 = vmatmul.f32.gmra.mxu1 %v2607_v23  ;;  %v2250_v63 = vmax.f32 %v5626_v15, %v5624_v44 }
 0x648   : > { %v5616_v12 = vpop.eup %3576  ;;  %v2412_v59 = vmul.f32 1.442695, %v2302_v36  ;;  %v2414_v21 = vmul.f32 1.442695, %v2303_v25 }
 0x649   : > { %v5618_v43 = vpop.eup %3578 }
 0x64a   : > { %3580 = vpow2.f32 %v2412_v59  ;;  %v2514_v19 = vadd.f32 %v5618_v43, %v5616_v12 }
 0x64b   : > { %3582 = vpow2.f32 %v2414_v21 }
 0x64c   : > { %2515 = vadd.xlane.f32.xlu0 %v2514_v19  ;;  %2248 = vmax.xlane.f32.xlu1 %v2247_v47 }
 0x64e   : > { %v5636_v1 = vpop.f32.mrf.mxu0  ;;  %v5638_v60 = vpop.f32.mrf.mxu3 }
 0x64f   : > { %v2253_v42 = vmax.f32 %v5638_v60, %v5636_v1 }
 0x650   : > { %v5628_v5 = vpop.eup %3580 }
 0x651   : > { %v5630_v45 = vpop.eup %3582 }
 0x652   : > { %v2517_v51 = vadd.f32 %v5630_v45, %v5628_v5 }
 0x654   : > { %2518 = vadd.xlane.f32.xlu2 %v2517_v51  ;;  %2251 = vmax.xlane.f32.xlu0 %v2250_v63 }
 0x65c   : > { %2254 = vmax.xlane.f32.xlu2 %v2253_v42 }
 0x68c   : > { %v2794_v54 = vpop.f32.mrf.mxu1 }
 0x68e   : > { %v2903_v58 = vpop.f32.mrf.mxu3 }
 0x68f   : > { %v2498_v34 = vpop.xlane.xlu0 %2497  ;;  %v2904_v26 = vadd.f32 %v5645_v33, %v2903_v58 }
 0x690   : > { %3584 = vrcp.f32 %v2498_v34 }
 0x691   : > { %v2999_v23 = vadd.f32 %v2904_v26, %v4679_v53 }
 0x692   : > { %v2681_v36 = vpop.f32.mrf.mxu2 }
 0x693   : > { %3031 = vst [vmem:[%s5650_s17] sm:$0xff] %v2999_v23  ;;  %v2795_v25 = vadd.f32 %v2794_v54, %v2681_v36 }
 0x694   : > { %v2797_v59 = vpop.f32.mrf.mxu1 }
 0x695   : > { %2926 = vmatmul.f32.gmra.mxu3 %v2795_v25 }
 0x696   : > { %v3585_v21 = vpop.eup %3584  ;;  %v2906_v19 = vpop.f32.mrf.mxu3 }
 0x697   : > { %v2501_v47 = vpop.xlane.xlu2 %2500  ;;  %v2234_v51 = vpop.xlane.xlu0 %2233  ;;  %v2907_v63 = vadd.f32 %v5645_v33, %v2906_v19  ;;  %v2608_v42 = vmul.f32 %v3585_v21, %v5526_v8  ;;  %v2609_v58 = vmul.f32 %v3585_v21, %v5528_v50 }
 0x698   : > { %3586 = vrcp.f32 %v2501_v47  ;;  %v2304_v53 = vsub.f32 %v5520_v6, %v2234_v51  ;;  %v2305_v34 = vsub.f32 %v5518_v29, %v2234_v51 }
 0x699   : > { %v3000_v54 = vadd.f32 %v2907_v63, %v4691_v57  ;;  %2704 = vmatmul.f32.gmra.mxu2 %v2608_v42  ;;  %2817 = vmatmul.f32.gmra.mxu1 %v2609_v58 }
 0x69a   : > { %v2416_v26 = vmul.f32 1.442695, %v2304_v53  ;;  %v2418_v23 = vmul.f32 1.442695, %v2305_v34  ;;  %v2684_v36 = vpop.f32.mrf.mxu2 }
 0x69b   : > { %3032 = vst [vmem:[%s5650_s17 + $0x8] sm:$0xff] %v3000_v54  ;;  %v2798_v25 = vadd.f32 %v2797_v59, %v2684_v36 }
 0x69c   : > { %3588 = vpow2.f32 %v2416_v26  ;;  %v2800_v19 = vpop.f32.mrf.mxu1 }
 0x69d   : > { %3590 = vpow2.f32 %v2418_v23  ;;  %2929 = vmatmul.f32.gmra.mxu3 %v2798_v25 }
 0x69e   : > { %v3587_v8 = vpop.eup %3586  ;;  %v2909_v50 = vpop.f32.mrf.mxu3 }
 0x69f   : > { %v2504_v21 = vpop.xlane.xlu1 %2503  ;;  %v2237_v6 = vpop.xlane.xlu2 %2236  ;;  %v2910_v29 = vadd.f32 %v5645_v33, %v2909_v50  ;;  %v2610_v57 = vmul.f32 %v3587_v8, %v5540_v35  ;;  %v2611_v47 = vmul.f32 %v3587_v8, %v5542_v32 }
 0x6a0   : > { %3592 = vrcp.f32 %v2504_v21  ;;  %v2306_v51 = vsub.f32 %v5534_v3, %v2237_v6  ;;  %v2307_v59 = vsub.f32 %v5530_v62, %v2237_v6 }
 0x6a1   : > { %v3001_v63 = vadd.f32 %v2910_v29, %v4703_v61  ;;  %2707 = vmatmul.f32.gmra.mxu2 %v2610_v57  ;;  %2820 = vmatmul.f32.gmra.mxu1 %v2611_v47 }
 0x6a2   : > { %v5666_v42 = vpop.eup %3588  ;;  %v2420_v58 = vmul.f32 1.442695, %v2306_v51  ;;  %v2422_v53 = vmul.f32 1.442695, %v2307_v59  ;;  %v2687_v34 = vpop.f32.mrf.mxu2 }
 0x6a3   : > { %v5668_v54 = vpop.eup %3590  ;;  %3033 = vst [vmem:[%s5650_s17 + $0x10] sm:$0xff] %v3001_v63  ;;  %v2801_v35 = vadd.f32 %v2800_v19, %v2687_v34 }
 0x6a4   : > { %3594 = vpow2.f32 %v2420_v58  ;;  %v2803_v32 = vpop.f32.mrf.mxu1  ;;  %v2520_v3 = vadd.f32 %v5668_v54, %v5666_v42 }
 0x6a5   : > { %3596 = vpow2.f32 %v2422_v53  ;;  %2932 = vmatmul.f32.gmra.mxu3 %v2801_v35 }
 0x6a6   : > { %v3593_v62 = vpop.eup %3592  ;;  %2521 = vadd.xlane.f32.xlu1 %v2520_v3  ;;  %v2912_v61 = vpop.f32.mrf.mxu3 }
 0x6a7   : > { %v2507_v26 = vpop.xlane.xlu0 %2506  ;;  %v2240_v23 = vpop.xlane.xlu1 %2239  ;;  %v2913_v36 = vadd.f32 %v5645_v33, %v2912_v61  ;;  %v2612_v25 = vmul.f32 %v3593_v62, %v5556_v48  ;;  %v2613_v8 = vmul.f32 %v3593_v62, %v5558_v49 }
 0x6a8   : > { %3598 = vrcp.f32 %v2507_v26  ;;  %v2308_v19 = vsub.f32 %v5554_v17, %v2240_v23  ;;  %v2309_v50 = vsub.f32 %v5548_v7, %v2240_v23 }
 0x6a9   : > { %v3002_v21 = vadd.f32 %v2913_v36, %v4715_v4  ;;  %2710 = vmatmul.f32.gmra.mxu2 %v2612_v25  ;;  %2823 = vmatmul.f32.gmra.mxu1 %v2613_v8 }
 0x6aa   : > { %v5679_v6 = vpop.eup %3594  ;;  %v2424_v29 = vmul.f32 1.442695, %v2308_v19  ;;  %v2426_v57 = vmul.f32 1.442695, %v2309_v50  ;;  %v2690_v47 = vpop.f32.mrf.mxu2 }
 0x6ab   : > { %v5681_v51 = vpop.eup %3596  ;;  %3034 = vst [vmem:[%s5650_s17 + $0x18] sm:$0xff] %v3002_v21  ;;  %v2804_v48 = vadd.f32 %v2803_v32, %v2690_v47 }
 0x6ac   : > { %3600 = vpow2.f32 %v2424_v29  ;;  %v2806_v49 = vpop.f32.mrf.mxu1  ;;  %v2523_v17 = vadd.f32 %v5681_v51, %v5679_v6 }
 0x6ad   : > { %3602 = vpow2.f32 %v2426_v57  ;;  %2935 = vmatmul.f32.gmra.mxu3 %v2804_v48 }
 0x6ae   : > { %v3599_v7 = vpop.eup %3598  ;;  %2524 = vadd.xlane.f32.xlu0 %v2523_v17  ;;  %v2915_v4 = vpop.f32.mrf.mxu3 }
 0x6af   : > { %v2510_v59 = vpop.xlane.xlu2 %2509  ;;  %v2243_v63 = vpop.xlane.xlu0 %2242  ;;  %v2916_v58 = vadd.f32 %v5645_v33, %v2915_v4  ;;  %v2614_v53 = vmul.f32 %v3599_v7, %v5570_v55  ;;  %v2615_v34 = vmul.f32 %v3599_v7, %v5572_v30 }
 0x6b0   : > { %3604 = vrcp.f32 %v2510_v59  ;;  %v2310_v35 = vsub.f32 %v5574_v20, %v2243_v63  ;;  %v2311_v32 = vsub.f32 %v5568_v52, %v2243_v63 }
 0x6b1   : > { %v3003_v3 = vadd.f32 %v2916_v58, %v4727_v10  ;;  %2713 = vmatmul.f32.gmra.mxu2 %v2614_v53  ;;  %2826 = vmatmul.f32.gmra.mxu1 %v2615_v34 }
 0x6b2   : > { %v5692_v62 = vpop.eup %3600  ;;  %v2428_v61 = vmul.f32 1.442695, %v2310_v35  ;;  %v2430_v26 = vmul.f32 1.442695, %v2311_v32  ;;  %v2693_v23 = vpop.f32.mrf.mxu2 }
 0x6b3   : > { %v5694_v36 = vpop.eup %3602  ;;  %3035 = vst [vmem:[%s5650_s17 + $0x20] sm:$0xff] %v3003_v3  ;;  %v2807_v55 = vadd.f32 %v2806_v49, %v2693_v23 }
 0x6b4   : > { %3606 = vpow2.f32 %v2428_v61  ;;  %v2526_v30 = vadd.f32 %v5694_v36, %v5692_v62  ;;  %v2809_v20 = vpop.f32.mrf.mxu1 }
 0x6b5   : > { %3608 = vpow2.f32 %v2430_v26  ;;  %2938 = vmatmul.f32.gmra.mxu3 %v2807_v55 }
 0x6b6   : > { %v3605_v52 = vpop.eup %3604  ;;  %2527 = vadd.xlane.f32.xlu1 %v2526_v30  ;;  %v2918_v10 = vpop.f32.mrf.mxu3 }
 0x6b7   : > { %v2513_v25 = vpop.xlane.xlu1 %2512  ;;  %v2246_v8 = vpop.xlane.xlu2 %2245  ;;  %v2919_v19 = vadd.f32 %v5645_v33, %v2918_v10  ;;  %v2616_v50 = vmul.f32 %v3605_v52, %v5584_v27  ;;  %v2617_v21 = vmul.f32 %v3605_v52, %v5586_v28 }
 0x6b8   : > { %3610 = vrcp.f32 %v2513_v25  ;;  %v2312_v29 = vsub.f32 %v5594_v13, %v2246_v8  ;;  %v2313_v57 = vsub.f32 %v5588_v41, %v2246_v8 }
 0x6b9   : > { %v3004_v47 = vadd.f32 %v2919_v19, %v4739_v18  ;;  %2716 = vmatmul.f32.gmra.mxu2 %v2616_v50  ;;  %2829 = vmatmul.f32.gmra.mxu1 %v2617_v21 }
 0x6ba   : > { %v5705_v48 = vpop.eup %3606  ;;  %v2432_v49 = vmul.f32 1.442695, %v2312_v29  ;;  %v2434_v17 = vmul.f32 1.442695, %v2313_v57  ;;  %v2696_v7 = vpop.f32.mrf.mxu2 }
 0x6bb   : > { %v5707_v4 = vpop.eup %3608  ;;  %3036 = vst [vmem:[%s5650_s17 + $0x28] sm:$0xff] %v3004_v47  ;;  %v2810_v27 = vadd.f32 %v2809_v20, %v2696_v7 }
 0x6bc   : > { %3612 = vpow2.f32 %v2432_v49  ;;  %v2529_v28 = vadd.f32 %v5707_v4, %v5705_v48  ;;  %v2812_v34 = vpop.f32.mrf.mxu1 }
 0x6bd   : > { %3614 = vpow2.f32 %v2434_v17  ;;  %2941 = vmatmul.f32.gmra.mxu3 %v2810_v27 }
 0x6be   : > { %v3611_v41 = vpop.eup %3610  ;;  %2530 = vadd.xlane.f32.xlu2 %v2529_v28  ;;  %v2921_v18 = vpop.f32.mrf.mxu3 }
 0x6bf   : > { %v2516_v13 = vpop.xlane.xlu0 %2515  ;;  %v2249_v59 = vpop.xlane.xlu1 %2248  ;;  %v2922_v63 = vadd.f32 %v5645_v33, %v2921_v18  ;;  %v2618_v58 = vmul.f32 %v3611_v41, %v5600_v22  ;;  %v2619_v53 = vmul.f32 %v3611_v41, %v5602_v56 }
 0x6c0   : > { %3616 = vrcp.f32 %v2516_v13  ;;  %v2314_v35 = vsub.f32 %v5610_v46, %v2249_v59  ;;  %v2315_v32 = vsub.f32 %v5608_v40, %v2249_v59 }
 0x6c1   : > { %v3005_v3 = vadd.f32 %v2922_v63, %v4751_v24  ;;  %2719 = vmatmul.f32.gmra.mxu2 %v2618_v58  ;;  %2832 = vmatmul.f32.gmra.mxu1 %v2619_v53 }
 0x6c2   : > { %v5718_v61 = vpop.eup %3612  ;;  %v2436_v26 = vmul.f32 1.442695, %v2314_v35  ;;  %v2438_v23 = vmul.f32 1.442695, %v2315_v32  ;;  %v2699_v55 = vpop.f32.mrf.mxu2 }
 0x6c3   : > { %v5720_v30 = vpop.eup %3614  ;;  %3037 = vst [vmem:[%s5650_s17 + $0x30] sm:$0xff] %v3005_v3  ;;  %v2813_v22 = vadd.f32 %v2812_v34, %v2699_v55 }
 0x6c4   : > { %3618 = vpow2.f32 %v2436_v26  ;;  %v2532_v56 = vadd.f32 %v5720_v30, %v5718_v61  ;;  %v2815_v29 = vpop.f32.mrf.mxu1 }
 0x6c5   : > { %3620 = vpow2.f32 %v2438_v23  ;;  %2944 = vmatmul.f32.gmra.mxu3 %v2813_v22 }
 0x6c6   : > { %v3617_v40 = vpop.eup %3616  ;;  %2533 = vadd.xlane.f32.xlu0 %v2532_v56  ;;  %v2924_v24 = vpop.f32.mrf.mxu3 }
 0x6c7   : > { %v2519_v46 = vpop.xlane.xlu2 %2518  ;;  %v2252_v52 = vpop.xlane.xlu0 %2251  ;;  %v2925_v20 = vadd.f32 %v5645_v33, %v2924_v24  ;;  %v2620_v10 = vmul.f32 %v3617_v40, %v5616_v12  ;;  %v2621_v25 = vmul.f32 %v3617_v40, %v5618_v43 }
 0x6c8   : > { %3622 = vrcp.f32 %v2519_v46  ;;  %v2316_v8 = vsub.f32 %v5626_v15, %v2252_v52  ;;  %v2317_v19 = vsub.f32 %v5624_v44, %v2252_v52  ;;  %v5964_v46 = vld [vmem:[#allocation19_spill] sm:$0xff] }
 0x6c9   : > { %v3006_v50 = vadd.f32 %v2925_v20, %v4763_v31  ;;  %2722 = vmatmul.f32.gmra.mxu2 %v2620_v10  ;;  %2835 = vmatmul.f32.gmra.mxu1 %v2621_v25 }
 0x6ca   : > { %v5731_v21 = vpop.eup %3618  ;;  %v2440_v57 = vmul.f32 1.442695, %v2316_v8  ;;  %v2442_v47 = vmul.f32 1.442695, %v2317_v19  ;;  %v2702_v49 = vpop.f32.mrf.mxu2 }
 0x6cb   : > { %v5733_v17 = vpop.eup %3620  ;;  %3038 = vst [vmem:[%s5650_s17 + $0x38] sm:$0xff] %v3006_v50  ;;  %v2816_v12 = vadd.f32 %v2815_v29, %v2702_v49  ;;  %v5965_v29 = vld [vmem:[#allocation20_spill] sm:$0xff] }
 0x6cc   : > { %3624 = vpow2.f32 %v2440_v57  ;;  %v2535_v43 = vadd.f32 %v5733_v17, %v5731_v21 }
 0x6cd   : > { %3626 = vpow2.f32 %v2442_v47  ;;  %2947 = vmatmul.f32.gmra.mxu3 %v2816_v12 }
 0x6ce   : > { %v3623_v44 = vpop.eup %3622  ;;  %2536 = vadd.xlane.f32.xlu1 %v2535_v43 }
 0x6cf   : > { %v2255_v31 = vpop.xlane.xlu2 %2254  ;;  %v2622_v15 = vmul.f32 %v3623_v44, %v5628_v5  ;;  %v2623_v7 = vmul.f32 %v3623_v44, %v5630_v45 }
 0x6d0   : > { %v2318_v27 = vsub.f32 %v5638_v60, %v2255_v31  ;;  %v2319_v28 = vsub.f32 %v5636_v1, %v2255_v31 }
 0x6d1   : > { %2725 = vmatmul.f32.gmra.mxu2 %v2622_v15  ;;  %2838 = vmatmul.f32.gmra.mxu1 %v2623_v7  ;;  %v5966_v7 = vld [vmem:[#allocation21_spill] sm:$0xff] }
 0x6d2   : > { %v5742_v41 = vpop.eup %3624  ;;  %v2444_v18 = vmul.f32 1.442695, %v2318_v27  ;;  %v2446_v13 = vmul.f32 1.442695, %v2319_v28 }
 0x6d3   : > { %v5744_v59 = vpop.eup %3626 }
 0x6d4   : > { %3628 = vpow2.f32 %v2444_v18  ;;  %v2538_v63 = vadd.f32 %v5744_v59, %v5742_v41 }
 0x6d5   : > { %3630 = vpow2.f32 %v2446_v13 }
 0x6d6   : > { %2539 = vadd.xlane.f32.xlu2 %v2538_v63 }
 0x6da   : > { %v5748_v5 = vpop.eup %3628 }
 0x6db   : > { %v5750_v45 = vpop.eup %3630 }
 0x6dc   : > { %v2541_v1 = vadd.f32 %v5750_v45, %v5748_v5 }
 0x6de   : > { %2542 = vadd.xlane.f32.xlu0 %v2541_v1 }
 0x716   : > { %v2818_v60 = vpop.f32.mrf.mxu1 }
 0x718   : > { %v2927_v58 = vpop.f32.mrf.mxu3 }
 0x719   : > { %v2522_v53 = vpop.xlane.xlu1 %2521  ;;  %v2928_v34 = vadd.f32 %v5645_v33, %v2927_v58 }
 0x71a   : > { %3632 = vrcp.f32 %v2522_v53  ;;  %v5967_v53 = vld [vmem:[#allocation22_spill] sm:$0xff] }
 0x71b   : > { %v3007_v35 = vadd.f32 %v2928_v34, %v4775_v38 }
 0x71c   : > { %v2705_v32 = vpop.f32.mrf.mxu2 }
 0x71d   : > { %3039 = vst [vmem:[%s5650_s17 + $0x40] sm:$0xff] %v3007_v35  ;;  %v2819_v3 = vadd.f32 %v2818_v60, %v2705_v32 }
 0x71e   : > { %v2821_v26 = vpop.f32.mrf.mxu1 }
 0x71f   : > { %2950 = vmatmul.f32.gmra.mxu3 %v2819_v3 }
 0x720   : > { %v3633_v23 = vpop.eup %3632  ;;  %v2930_v55 = vpop.f32.mrf.mxu3 }
 0x721   : > { %v2525_v22 = vpop.xlane.xlu0 %2524  ;;  %v2931_v56 = vadd.f32 %v5645_v33, %v2930_v55  ;;  %v2624_v40 = vmul.f32 %v3633_v23, %v5666_v42  ;;  %v2625_v24 = vmul.f32 %v3633_v23, %v5668_v54 }
 0x722   : > { %3634 = vrcp.f32 %v2525_v22 }
 0x723   : > { %v3008_v52 = vadd.f32 %v2931_v56, %v5964_v46  ;;  %2728 = vmatmul.f32.gmra.mxu2 %v2624_v40  ;;  %2841 = vmatmul.f32.gmra.mxu1 %v2625_v24  ;;  %v5968_v56 = vld [vmem:[#allocation23_spill] sm:$0xff] }
 0x724   : > { %v2708_v38 = vpop.f32.mrf.mxu2 }
 0x725   : > { %3040 = vst [vmem:[%s5650_s17 + $0x48] sm:$0xff] %v3008_v52  ;;  %v2822_v20 = vadd.f32 %v2821_v26, %v2708_v38 }
 0x726   : > { %v2824_v10 = vpop.f32.mrf.mxu1 }
 0x727   : > { %2953 = vmatmul.f32.gmra.mxu3 %v2822_v20 }
 0x728   : > { %v3635_v25 = vpop.eup %3634  ;;  %v2933_v8 = vpop.f32.mrf.mxu3 }
 0x729   : > { %v2528_v19 = vpop.xlane.xlu1 %2527  ;;  %v2934_v50 = vadd.f32 %v5645_v33, %v2933_v8  ;;  %v2626_v42 = vmul.f32 %v3635_v25, %v5679_v6  ;;  %v2627_v54 = vmul.f32 %v3635_v25, %v5681_v51  ;;  %v5969_v8 = vld [vmem:[#allocation24_spill] sm:$0xff] }
 0x72a   : > { %3636 = vrcp.f32 %v2528_v19 }
 0x72b   : > { %v3009_v57 = vadd.f32 %v2934_v50, %v5965_v29  ;;  %2731 = vmatmul.f32.gmra.mxu2 %v2626_v42  ;;  %2844 = vmatmul.f32.gmra.mxu1 %v2627_v54 }
 0x72c   : > { %v2711_v47 = vpop.f32.mrf.mxu2 }
 0x72d   : > { %3041 = vst [vmem:[%s5650_s17 + $0x50] sm:$0xff] %v3009_v57  ;;  %v2825_v49 = vadd.f32 %v2824_v10, %v2711_v47 }
 0x72e   : > { %v2827_v12 = vpop.f32.mrf.mxu1 }
 0x72f   : > { %2956 = vmatmul.f32.gmra.mxu3 %v2825_v49  ;;  %v5970_v49 = vld [vmem:[#allocation25_spill] sm:$0xff] }
 0x730   : > { %v3637_v43 = vpop.eup %3636  ;;  %v2936_v44 = vpop.f32.mrf.mxu3 }
 0x731   : > { %v2531_v31 = vpop.xlane.xlu2 %2530  ;;  %v2937_v15 = vadd.f32 %v5645_v33, %v2936_v44  ;;  %v2628_v6 = vmul.f32 %v3637_v43, %v5692_v62  ;;  %v2629_v51 = vmul.f32 %v3637_v43, %v5694_v36 }
 0x732   : > { %3638 = vrcp.f32 %v2531_v31 }
 0x733   : > { %v3010_v27 = vadd.f32 %v2937_v15, %v5966_v7  ;;  %2734 = vmatmul.f32.gmra.mxu2 %v2628_v6  ;;  %2847 = vmatmul.f32.gmra.mxu1 %v2629_v51 }
 0x734   : > { %v2714_v28 = vpop.f32.mrf.mxu2 }
 0x735   : > { %3042 = vst [vmem:[%s5650_s17 + $0x58] sm:$0xff] %v3010_v27  ;;  %v2828_v18 = vadd.f32 %v2827_v12, %v2714_v28 }
 0x736   : > { %v2830_v13 = vpop.f32.mrf.mxu1 }
 0x737   : > { %2959 = vmatmul.f32.gmra.mxu3 %v2828_v18 }
 0x738   : > { %v3639_v63 = vpop.eup %3638  ;;  %v2939_v1 = vpop.f32.mrf.mxu3 }
 0x739   : > { %v2534_v60 = vpop.xlane.xlu0 %2533  ;;  %v2940_v58 = vadd.f32 %v5645_v33, %v2939_v1  ;;  %v2630_v62 = vmul.f32 %v3639_v63, %v5705_v48  ;;  %v2631_v36 = vmul.f32 %v3639_v63, %v5707_v4 }
 0x73a   : > { %3640 = vrcp.f32 %v2534_v60 }
 0x73b   : > { %v3011_v34 = vadd.f32 %v2940_v58, %v5967_v53  ;;  %2737 = vmatmul.f32.gmra.mxu2 %v2630_v62  ;;  %2850 = vmatmul.f32.gmra.mxu1 %v2631_v36 }
 0x73c   : > { %v2717_v35 = vpop.f32.mrf.mxu2 }
 0x73d   : > { %3043 = vst [vmem:[%s5650_s17 + $0x60] sm:$0xff] %v3011_v34  ;;  %v2831_v32 = vadd.f32 %v2830_v13, %v2717_v35 }
 0x73e   : > { %v2833_v26 = vpop.f32.mrf.mxu1 }
 0x73f   : > { %2962 = vmatmul.f32.gmra.mxu3 %v2831_v32 }
 0x740   : > { %v3641_v3 = vpop.eup %3640  ;;  %v2942_v23 = vpop.f32.mrf.mxu3 }
 0x741   : > { %v2537_v55 = vpop.xlane.xlu1 %2536  ;;  %v2943_v22 = vadd.f32 %v5645_v33, %v2942_v23  ;;  %v2632_v48 = vmul.f32 %v3641_v3, %v5718_v61  ;;  %v2633_v4 = vmul.f32 %v3641_v3, %v5720_v30 }
 0x742   : > { %3642 = vrcp.f32 %v2537_v55 }
 0x743   : > { %v3012_v40 = vadd.f32 %v2943_v22, %v5968_v56  ;;  %2740 = vmatmul.f32.gmra.mxu2 %v2632_v48  ;;  %2853 = vmatmul.f32.gmra.mxu1 %v2633_v4 }
 0x744   : > { %v2720_v24 = vpop.f32.mrf.mxu2 }
 0x745   : > { %3044 = vst [vmem:[%s5650_s17 + $0x68] sm:$0xff] %v3012_v40  ;;  %v2834_v46 = vadd.f32 %v2833_v26, %v2720_v24 }
 0x746   : > { %v2836_v30 = vpop.f32.mrf.mxu1 }
 0x747   : > { %2965 = vmatmul.f32.gmra.mxu3 %v2834_v46 }
 0x748   : > { %v3643_v52 = vpop.eup %3642  ;;  %v2945_v38 = vpop.f32.mrf.mxu3 }
 0x749   : > { %v2540_v20 = vpop.xlane.xlu2 %2539  ;;  %v2946_v10 = vadd.f32 %v5645_v33, %v2945_v38  ;;  %v2634_v25 = vmul.f32 %v3643_v52, %v5731_v21  ;;  %v2635_v61 = vmul.f32 %v3643_v52, %v5733_v17 }
 0x74a   : > { %3644 = vrcp.f32 %v2540_v20 }
 0x74b   : > { %v3013_v19 = vadd.f32 %v2946_v10, %v5969_v8  ;;  %2743 = vmatmul.f32.gmra.mxu2 %v2634_v25  ;;  %2856 = vmatmul.f32.gmra.mxu1 %v2635_v61 }
 0x74c   : > { %v2723_v50 = vpop.f32.mrf.mxu2 }
 0x74d   : > { %3045 = vst [vmem:[%s5650_s17 + $0x70] sm:$0xff] %v3013_v19  ;;  %v2837_v42 = vadd.f32 %v2836_v30, %v2723_v50 }
 0x74e   : > { %v2839_v43 = vpop.f32.mrf.mxu1 }
 0x74f   : > { %2968 = vmatmul.f32.gmra.mxu3 %v2837_v42 }
 0x750   : > { %v3645_v54 = vpop.eup %3644  ;;  %v2948_v29 = vpop.f32.mrf.mxu3 }
 0x751   : > { %v2543_v57 = vpop.xlane.xlu0 %2542  ;;  %v2949_v47 = vadd.f32 %v5645_v33, %v2948_v29  ;;  %v2636_v21 = vmul.f32 %v3645_v54, %v5742_v41  ;;  %v2637_v17 = vmul.f32 %v3645_v54, %v5744_v59 }
 0x752   : > { %3646 = vrcp.f32 %v2543_v57  ;;  %v5971_v57 = vld [vmem:[#allocation26_spill] sm:$0xff] }
 0x753   : > { %v3014_v12 = vadd.f32 %v2949_v47, %v5970_v49  ;;  %2746 = vmatmul.f32.gmra.mxu2 %v2636_v21  ;;  %2859 = vmatmul.f32.gmra.mxu1 %v2637_v17  ;;  %v5972_v49 = vld [vmem:[#allocation27_spill] sm:$0xff] }
 0x754   : > { %v2726_v44 = vpop.f32.mrf.mxu2 }
 0x755   : > { %3046 = vst [vmem:[%s5650_s17 + $0x78] sm:$0xff] %v3014_v12  ;;  %v2840_v31 = vadd.f32 %v2839_v43, %v2726_v44  ;;  %v5973_v44 = vld [vmem:[#allocation28_spill] sm:$0xff] }
 0x757   : > { %2971 = vmatmul.f32.gmra.mxu3 %v2840_v31 }
 0x758   : > { %v3647_v15 = vpop.eup %3646 }
 0x759   : > { %v2638_v6 = vmul.f32 %v3647_v15, %v5748_v5  ;;  %v2639_v51 = vmul.f32 %v3647_v15, %v5750_v45 }
 0x75b   : > { %2749 = vmatmul.f32.gmra.mxu2 %v2638_v6  ;;  %2862 = vmatmul.f32.gmra.mxu1 %v2639_v51  ;;  %v5974_v51 = vld [vmem:[#allocation29_spill] sm:$0xff] }
 0x7a0   : > { %v2842_v41 = vpop.f32.mrf.mxu1 }
 0x7a2   : > { %v2951_v59 = vpop.f32.mrf.mxu3 }
 0x7a3   : > { %v2952_v7 = vadd.f32 %v5645_v33, %v2951_v59 }
 0x7a5   : > { %v3015_v27 = vadd.f32 %v2952_v7, %v4855_v16 }
 0x7a6   : > { %v2729_v28 = vpop.f32.mrf.mxu2 }
 0x7a7   : > { %3047 = vst [vmem:[%s5650_s17 + $0x80] sm:$0xff] %v3015_v27  ;;  %v2843_v18 = vadd.f32 %v2842_v41, %v2729_v28  ;;  %v5975_v27 = vld [vmem:[#allocation30_spill] sm:$0xff] }
 0x7a8   : > { %v2845_v13 = vpop.f32.mrf.mxu1 }
 0x7a9   : > { %2974 = vmatmul.f32.gmra.mxu3 %v2843_v18 }
 0x7aa   : > { %v2954_v63 = vpop.f32.mrf.mxu3 }
 0x7ab   : > { %v2955_v5 = vadd.f32 %v5645_v33, %v2954_v63  ;;  %v5976_v63 = vld [vmem:[#allocation31_spill] sm:$0xff] }
 0x7ad   : > { %v3016_v45 = vadd.f32 %v2955_v5, %v4866_v39 }
 0x7ae   : > { %v2732_v1 = vpop.f32.mrf.mxu2 }
 0x7af   : > { %3048 = vst [vmem:[%s5650_s17 + $0x88] sm:$0xff] %v3016_v45  ;;  %v2846_v60 = vadd.f32 %v2845_v13, %v2732_v1 }
 0x7b0   : > { %v2848_v58 = vpop.f32.mrf.mxu1 }
 0x7b1   : > { %2977 = vmatmul.f32.gmra.mxu3 %v2846_v60  ;;  %v5977_v60 = vld [vmem:[#allocation32_spill] sm:$0xff] }
 0x7b2   : > { %v2957_v62 = vpop.f32.mrf.mxu3 }
 0x7b3   : > { %v2958_v16 = vadd.f32 %v5645_v33, %v2957_v62 }
 0x7b5   : > { %v3017_v36 = vadd.f32 %v2958_v16, %v4877_v37 }
 0x7b6   : > { %v2735_v53 = vpop.f32.mrf.mxu2 }
 0x7b7   : > { %3049 = vst [vmem:[%s5650_s17 + $0x90] sm:$0xff] %v3017_v36  ;;  %v2849_v34 = vadd.f32 %v2848_v58, %v2735_v53  ;;  %v5979_v36 = vld [vmem:[#allocation33_spill] sm:$0xff] }
 0x7b8   : > { %v2851_v35 = vpop.f32.mrf.mxu1 }
 0x7b9   : > { %2980 = vmatmul.f32.gmra.mxu3 %v2849_v34 }
 0x7ba   : > { %v2960_v32 = vpop.f32.mrf.mxu3 }
 0x7bb   : > { %v2961_v39 = vadd.f32 %v5645_v33, %v2960_v32 }
 0x7bd   : > { %v3018_v3 = vadd.f32 %v2961_v39, %v4888_v14 }
 0x7be   : > { %v2738_v26 = vpop.f32.mrf.mxu2 }
 0x7bf   : > { %3050 = vst [vmem:[%s5650_s17 + $0x98] sm:$0xff] %v3018_v3  ;;  %v2852_v23 = vadd.f32 %v2851_v35, %v2738_v26 }
 0x7c0   : > { %v2854_v55 = vpop.f32.mrf.mxu1 }
 0x7c1   : > { %2983 = vmatmul.f32.gmra.mxu3 %v2852_v23 }
 0x7c2   : > { %v2963_v22 = vpop.f32.mrf.mxu3 }
 0x7c3   : > { %v2964_v37 = vadd.f32 %v5645_v33, %v2963_v22 }
 0x7c5   : > { %v3019_v48 = vadd.f32 %v2964_v37, %v4899_v0 }
 0x7c6   : > { %v2741_v4 = vpop.f32.mrf.mxu2 }
 0x7c7   : > { %3051 = vst [vmem:[%s5650_s17 + $0xa0] sm:$0xff] %v3019_v48  ;;  %v2855_v56 = vadd.f32 %v2854_v55, %v2741_v4 }
 0x7c8   : > { %v2857_v40 = vpop.f32.mrf.mxu1 }
 0x7c9   : > { %2986 = vmatmul.f32.gmra.mxu3 %v2855_v56 }
 0x7ca   : > { %v2966_v24 = vpop.f32.mrf.mxu3 }
 0x7cb   : > { %v2967_v14 = vadd.f32 %v5645_v33, %v2966_v24 }
 0x7cd   : > { %v3020_v46 = vadd.f32 %v2967_v14, %v4910_v2 }
 0x7ce   : > { %v2744_v52 = vpop.f32.mrf.mxu2 }
 0x7cf   : > { %3052 = vst [vmem:[%s5650_s17 + $0xa8] sm:$0xff] %v3020_v46  ;;  %v2858_v38 = vadd.f32 %v2857_v40, %v2744_v52 }
 0x7d0   : > { %v2860_v0 = vpop.f32.mrf.mxu1 }
 0x7d1   : > { %2989 = vmatmul.f32.gmra.mxu3 %v2858_v38 }
 0x7d2   : > { %v2969_v20 = vpop.f32.mrf.mxu3 }
 0x7d3   : > { %v2970_v10 = vadd.f32 %v5645_v33, %v2969_v20 }
 0x7d5   : > { %v3021_v25 = vadd.f32 %v2970_v10, %v4921_v9 }
 0x7d6   : > { %v2747_v61 = vpop.f32.mrf.mxu2 }
 0x7d7   : > { %3053 = vst [vmem:[%s5650_s17 + $0xb0] sm:$0xff] %v3021_v25  ;;  %v2861_v30 = vadd.f32 %v2860_v0, %v2747_v61 }
 0x7d8   : > { %v2863_v50 = vpop.f32.mrf.mxu1 }
 0x7d9   : > { %2992 = vmatmul.f32.gmra.mxu3 %v2861_v30 }
 0x7da   : > { %v2972_v8 = vpop.f32.mrf.mxu3 }
 0x7db   : > { %v2973_v2 = vadd.f32 %v5645_v33, %v2972_v8 }
 0x7dd   : > { %v3022_v19 = vadd.f32 %v2973_v2, %v4944_v11 }
 0x7de   : > { %v2750_v42 = vpop.f32.mrf.mxu2 }
 0x7df   : > { %3054 = vst [vmem:[%s5650_s17 + $0xb8] sm:$0xff] %v3022_v19  ;;  %v2864_v54 = vadd.f32 %v2863_v50, %v2750_v42 }
 0x7e1   : > { %2995 = vmatmul.f32.gmra.mxu3 %v2864_v54 }
 0x82c   : > { %v2975_v29 = vpop.f32.mrf.mxu3 }
 0x82d   : > { %v2976_v9 = vadd.f32 %v5645_v33, %v2975_v29 }
 0x82f   : > { %v3023_v47 = vadd.f32 %v2976_v9, %v5971_v57 }
 0x831   : > { %3055 = vst [vmem:[%s5650_s17 + $0xc0] sm:$0xff] %v3023_v47 }
 0x834   : > { %v2978_v21 = vpop.f32.mrf.mxu3 }
 0x835   : > { %v2979_v17 = vadd.f32 %v5645_v33, %v2978_v21 }
 0x837   : > { %v3024_v12 = vadd.f32 %v2979_v17, %v5972_v49 }
 0x839   : > { %3056 = vst [vmem:[%s5650_s17 + $0xc8] sm:$0xff] %v3024_v12 }
 0x83c   : > { %v2981_v11 = vpop.f32.mrf.mxu3 }
 0x83d   : > { %v2982_v43 = vadd.f32 %v5645_v33, %v2981_v11 }
 0x83f   : > { %v3025_v31 = vadd.f32 %v2982_v43, %v5973_v44 }
 0x841   : > { %3057 = vst [vmem:[%s5650_s17 + $0xd0] sm:$0xff] %v3025_v31 }
 0x844   : > { %v2984_v15 = vpop.f32.mrf.mxu3 }
 0x845   : > { %v2985_v6 = vadd.f32 %v5645_v33, %v2984_v15 }
 0x847   : > { %v3026_v41 = vadd.f32 %v2985_v6, %v5974_v51 }
 0x849   : > { %3058 = vst [vmem:[%s5650_s17 + $0xd8] sm:$0xff] %v3026_v41 }
 0x84c   : > { %v2987_v59 = vpop.f32.mrf.mxu3 }
 0x84d   : > { %v2988_v7 = vadd.f32 %v5645_v33, %v2987_v59 }
 0x84f   : > { %v3027_v28 = vadd.f32 %v2988_v7, %v5975_v27 }
 0x851   : > { %3059 = vst [vmem:[%s5650_s17 + $0xe0] sm:$0xff] %v3027_v28 }
 0x854   : > { %v2990_v18 = vpop.f32.mrf.mxu3 }
 0x855   : > { %v2991_v13 = vadd.f32 %v5645_v33, %v2990_v18 }
 0x857   : > { %v3028_v5 = vadd.f32 %v2991_v13, %v5976_v63 }
 0x859   : > { %3060 = vst [vmem:[%s5650_s17 + $0xe8] sm:$0xff] %v3028_v5 }
 0x85c   : > { %v2993_v45 = vpop.f32.mrf.mxu3 }
 0x85d   : > { %v2994_v1 = vadd.f32 %v5645_v33, %v2993_v45 }
 0x85f   : > { %v3029_v58 = vadd.f32 %v2994_v1, %v5977_v60 }
 0x861   : > { %3061 = vst [vmem:[%s5650_s17 + $0xf0] sm:$0xff] %v3029_v58 }
 0x864   : > { %v2996_v62 = vpop.f32.mrf.mxu3 }
 0x865   : > { %v2997_v16 = vadd.f32 %v5645_v33, %v2996_v62 }
 0x867   : > { %v3030_v53 = vadd.f32 %v2997_v16, %v5979_v36 }
 0x869   : > { %3062 = vst [vmem:[%s5650_s17 + $0xf8] sm:$0xff] %v3030_v53 }
 0x86a   : > { %3825 = shalt.err (!%p3822_p10)
}
 0x86b   : > { %s3882_s11 = smov 128   ;;  %s3883_s17 = smov 8  }
 0x86c   : > { %3376 = dma.vmem_to_hbm [thread:$0]  (%p4071_p4), %s3077_s26, 4096, %s3079_s16, %s3064_s10, %s3882_s11, %s3882_s11, %s3883_s17  }
 0x86d PF: > { %s3093_s2 = sand.u32 1, %s3860_s0   ;;  %p5980_p13 = scmp.ge.s32.totalorder %s3872_s21, 2 }
 0x86e   : > { %s3094_s3 = scalar_lea.sflag [#allocation4], %s3093_s2 }
 0x86f   : > { %p3396_p11 = pnand %p5980_p13, %p4075_p6 }
 0x871   : > { %p3397_p0 = pneg %p3396_p11 }
 0x873   : > { %3855 = dma.done.wait (%p3397_p0), %s3094_s3, 4096  }
 0x874   : > { %3857 = vsyncadd (%p3397_p0), %s3094_s3, 4294963200  ;;  %s5981_s21 = sld [smem:[#allocation17_spill]]  ;;  %s5984_s0 = smov %s3864_s30 }
 0x875   : > { %s5982_s15 = sld [smem:[#allocation16_spill]] }
 0x876   : > { %s5983_s20 = sld [smem:[#allocation18_spill]] }
 0x87a   : > { %p34_p2 = scmp.ge.s32.totalorder %s5981_s21, 4  }
 0x87b   : > { %s5985_s30 = smov %s5982_s15 }
 0x87c   :  { %36 = sbr.rel (!%p34_p2) target bundleno = 20 (0x14), region = 167 }
 0x881   :  { %3100 = vsyncpa [#allocation3], 1 }
 0x882   :  { %3102 = vsyncpa [#allocation3 + $0x1], 1 }
 0x883   :  { %3103 = vsyncpa [#allocation6], 1 }
 0x884   :  { %3104 = vsyncpa [#allocation9], 1 }
 0x885   :  { %3105 = vsyncpa [#allocation4], 1 }
 0x886   :  { %3107 = vsyncpa [#allocation4 + $0x1], 1 }

</bundles_post_ra>
